<compile_context>
chip_gen: v5e
topology: v5e:2x2
jax: 0.10.0
libtpu: 0.0.40
codegen_flags: <defaults>
</compile_context>

<pallas_src>
import functools

import jax
import jax.numpy as jnp
from jax import lax
from jax.experimental import pallas as pl
from jax.experimental.pallas import tpu as pltpu

BN_EPS = 1e-5
KH = KW = 3
PAD = 1


# ----------------------------------------------------------------------------
# Pallas kernel: zero-pad (fused) + 3x3 conv (im2col matmul) +
#                BatchNorm2d (batch stats) + ReLU.
# ----------------------------------------------------------------------------
def single_conv_kernel(x_ref, w_ref, g_ref, b_ref, o_ref, xp_ref,
                       *, n, cin, cout, h, w):
    # x_ref : (N*Cin, H*W)        f32, lane-dense view of the NCHW input
    # w_ref : (Cout, 9*Cin)       f32 im2col weight matrix (row k = (dy*3+dx)*Cin+ci)
    # g_ref : (Cout, 1)           f32 BN gamma
    # b_ref : (Cout, 1)           f32 BN beta
    # o_ref : (N*Cout, H*W)       f32, lane-dense output (free reshape back to NCHW)
    # xp_ref: (N*Cin, H+2, W+2)   f32 VMEM scratch: zero-padded activations
    hw = h * w

    # --- Zero-pad fused into the kernel (no padded tensor through HBM). ---
    xp_ref[...] = jnp.zeros_like(xp_ref)
    xp_ref[:, PAD:PAD + h, PAD:PAD + w] = x_ref[...].reshape(n * cin, h, w)
    xp = xp_ref[...]                                    # (N*Cin, H+2, W+2) f32

    wmat = w_ref[...].astype(jnp.bfloat16)              # (Cout, 9*Cin) bf16

    # --- 3x3 conv: one im2col MXU matmul per image (bf16 operands, f32 acc). ---
    rows = []
    for ni in range(n):                                  # N is tiny & static
        xn = xp[ni * cin:(ni + 1) * cin]                 # (Cin, H+2, W+2)
        taps = []
        for dy in range(KH):
            for dx in range(KW):
                taps.append(xn[:, dy:dy + h, dx:dx + w].reshape(cin, hw))
        patches = jnp.concatenate(taps, axis=0).astype(jnp.bfloat16)  # (9*Cin, H*W)
        rows.append(jnp.dot(wmat, patches,
                            preferred_element_type=jnp.float32))      # (Cout, H*W)
    acc = jnp.concatenate(rows, axis=0)                  # (N*Cout, H*W) f32

    # --- BatchNorm2d, training-mode batch statistics, single pass. ---
    # (No conv bias: with bn=True the Conv2d has bias=False; a per-channel bias
    #  would be cancelled by the mean subtraction anyway.)
    m = float(n * hw)
    row_sum = jnp.sum(acc, axis=1, keepdims=True)        # (N*Cout, 1)
    row_ssq = jnp.sum(acc * acc, axis=1, keepdims=True)  # (N*Cout, 1)
    ch_sum = row_sum[0:cout]
    ch_ssq = row_ssq[0:cout]
    for ni in range(1, n):
        ch_sum = ch_sum + row_sum[ni * cout:(ni + 1) * cout]
        ch_ssq = ch_ssq + row_ssq[ni * cout:(ni + 1) * cout]
    mean = ch_sum * (1.0 / m)                            # (Cout, 1)
    var = jnp.maximum(ch_ssq * (1.0 / m) - mean * mean, 0.0)
    scale = g_ref[...] * lax.rsqrt(var + BN_EPS)         # gamma folded into rsqrt
    shift = b_ref[...] - mean * scale

    # Per-row (n-tiled) scale/shift, then one fused FMA + ReLU + dense store.
    scale_rows = jnp.concatenate([scale] * n, axis=0)    # (N*Cout, 1)
    shift_rows = jnp.concatenate([shift] * n, axis=0)    # (N*Cout, 1)
    o_ref[...] = jnp.maximum(acc * scale_rows + shift_rows, 0.0).astype(o_ref.dtype)


# ----------------------------------------------------------------------------
# Wrapper: PyTorch NCHW / OIHW in, NCHW out.  Only zero-cost reshapes here.
# ----------------------------------------------------------------------------
def single_conv_forward(x_nchw, w_oihw, gamma, beta):
    """x: (N, Cin, H, W) f32, w: (Cout, Cin, 3, 3) f32 -> (N, Cout, H, W) f32."""
    N, Cin, H, W = x_nchw.shape
    Cout = w_oihw.shape[0]
    HW = H * W

    # Free row-major reshape (no transpose, no pad) to a lane-dense 2-D view.
    x2 = x_nchw.reshape(N * Cin, HW).astype(jnp.float32)
    # Parameter prep (one-time, tiny): OIHW -> (Cout, 3, 3, Cin) -> (Cout, 9*Cin).
    wmat = jnp.transpose(w_oihw, (0, 2, 3, 1)).reshape(Cout, KH * KW * Cin)
    wmat = wmat.astype(jnp.float32)
    g2 = gamma.reshape(Cout, 1).astype(jnp.float32)
    b2 = beta.reshape(Cout, 1).astype(jnp.float32)

    kernel = functools.partial(single_conv_kernel,
                               n=N, cin=Cin, cout=Cout, h=H, w=W)

    out2 = pl.pallas_call(
        kernel,
        out_shape=jax.ShapeDtypeStruct((N * Cout, HW), jnp.float32),
        in_specs=[pl.BlockSpec(memory_space=pltpu.MemorySpace.VMEM)] * 4,
        out_specs=pl.BlockSpec(memory_space=pltpu.MemorySpace.VMEM),
        scratch_shapes=[pltpu.VMEM((N * Cin, H + 2 * PAD, W + 2 * PAD),
                                   jnp.float32)],
    )(x2, wmat, g2, b2)

    # Free reshape back to NCHW.
    return out2.reshape(N, Cout, H, W)


# ----------------------------------------------------------------------------
# Pure-JAX reference (same math: bf16 conv operands, f32 accum, batch-stat BN).
# ----------------------------------------------------------------------------
def single_conv_reference(x_nchw, w_oihw, gamma, beta):
    conv = lax.conv_general_dilated(
        x_nchw.astype(jnp.bfloat16), w_oihw.astype(jnp.bfloat16),
        window_strides=(1, 1), padding=((PAD, PAD), (PAD, PAD)),
        dimension_numbers=('NCHW', 'OIHW', 'NCHW'),
        preferred_element_type=jnp.float32)
    mean = jnp.mean(conv, axis=(0, 2, 3), keepdims=True)
    var = jnp.mean((conv - mean) ** 2, axis=(0, 2, 3), keepdims=True)
    y = (conv - mean) * lax.rsqrt(var + BN_EPS) * gamma.reshape(1, -1, 1, 1) \
        + beta.reshape(1, -1, 1, 1)
    return jnp.maximum(y, 0.0)


if __name__ == "__main__":
    key = jax.random.PRNGKey(0)
    k_x, k_w = jax.random.split(key, 2)

    # Small shapes consistent with the module: in_channels=4, out_channels=8.
    N, Cin, Cout, H, W = 2, 4, 8, 16, 16

    x = jax.random.normal(k_x, (N, Cin, H, W), dtype=jnp.float32)

    # Deterministic synthetic parameters (PyTorch-style init ranges).
    fan_in = Cin * KH * KW
    bound = 1.0 / (fan_in ** 0.5)
    w = jax.random.uniform(k_w, (Cout, Cin, KH, KW), jnp.float32, -bound, bound)
    gamma = jnp.ones((Cout,), jnp.float32)    # BatchNorm2d default affine init
    beta = jnp.zeros((Cout,), jnp.float32)
    # TODO(synk): BatchNorm2d running-stat buffer updates (training side effect)
    # are not modeled; the forward output only needs the batch statistics.

    out = jax.block_until_ready(single_conv_forward(x, w, gamma, beta))
    ref = jax.block_until_ready(single_conv_reference(x, w, gamma, beta))

    assert out.shape == (N, Cout, H, W), out.shape
    max_err = float(jnp.max(jnp.abs(out - ref)))
    assert jnp.allclose(out, ref, atol=1e-3, rtol=1e-3), max_err

    print("KERNEL_OK")
</pallas_src>

<mosaic_0001>
module attributes {stable_mosaic.version = 11 : i64} {
  func.func @single_conv_kernel(%arg0: memref<8x256xf32, #tpu.memory_space<vmem>>, %arg1: memref<8x36xf32, #tpu.memory_space<vmem>>, %arg2: memref<8x1xf32, #tpu.memory_space<vmem>>, %arg3: memref<8x1xf32, #tpu.memory_space<vmem>>, %arg4: memref<16x256xf32, #tpu.memory_space<vmem>>, %arg5: memref<8x18x18xf32, #tpu.memory_space<vmem>>) attributes {dimension_semantics = [], scalar_prefetch = 0 : i64, scratch_operands = 1 : i64, tpu.core_type = #tpu.core_type<tc>} {
    %cst = arith.constant 0.000000e+00 : f32
    %0 = vector.broadcast %cst : f32 to vector<8x18x18xf32>
    %c0 = arith.constant 0 : index
    %c0_0 = arith.constant 0 : index
    %c0_1 = arith.constant 0 : index
    %1 = vector.load %arg5[%c0, %c0_0, %c0_1] : memref<8x18x18xf32, #tpu.memory_space<vmem>>, vector<8x18x18xf32>
    tpu.vector_store %arg5[%c0, %c0_0, %c0_1], %0 {strides = array<i32>} : memref<8x18x18xf32, #tpu.memory_space<vmem>>, vector<8x18x18xf32>,
    %c0_2 = arith.constant 0 : index
    %c0_3 = arith.constant 0 : index
    %2 = vector.load %arg0[%c0_2, %c0_3] : memref<8x256xf32, #tpu.memory_space<vmem>>, vector<8x256xf32>
    %3 = vector.shape_cast %2 : vector<8x256xf32> to vector<8x16x16xf32>
    %c0_4 = arith.constant 0 : index
    %c1 = arith.constant 1 : index
    %c1_5 = arith.constant 1 : index
    %4 = vector.load %arg5[%c0_4, %c1, %c1_5] : memref<8x18x18xf32, #tpu.memory_space<vmem>>, vector<8x16x16xf32>
    tpu.vector_store %arg5[%c0_4, %c1, %c1_5], %3 {strides = array<i32>} : memref<8x18x18xf32, #tpu.memory_space<vmem>>, vector<8x16x16xf32>,
    %c0_6 = arith.constant 0 : index
    %c0_7 = arith.constant 0 : index
    %c0_8 = arith.constant 0 : index
    %5 = vector.load %arg5[%c0_6, %c0_7, %c0_8] : memref<8x18x18xf32, #tpu.memory_space<vmem>>, vector<8x18x18xf32>
    %c0_9 = arith.constant 0 : index
    %c0_10 = arith.constant 0 : index
    %6 = vector.load %arg1[%c0_9, %c0_10] : memref<8x36xf32, #tpu.memory_space<vmem>>, vector<8x36xf32>
    %7 = arith.truncf %6 : vector<8x36xf32> to vector<8x36xbf16>
    %8 = vector.extract_strided_slice %5 {offsets = [0, 0, 0], sizes = [4, 18, 18], strides = [1, 1, 1]} : vector<8x18x18xf32> to vector<4x18x18xf32>
    %9 = vector.extract_strided_slice %8 {offsets = [0, 0, 0], sizes = [4, 16, 16], strides = [1, 1, 1]} : vector<4x18x18xf32> to vector<4x16x16xf32>
    %10 = vector.shape_cast %9 : vector<4x16x16xf32> to vector<4x256xf32>
    %11 = vector.extract_strided_slice %8 {offsets = [0, 0, 1], sizes = [4, 16, 16], strides = [1, 1, 1]} : vector<4x18x18xf32> to vector<4x16x16xf32>
    %12 = vector.shape_cast %11 : vector<4x16x16xf32> to vector<4x256xf32>
    %13 = vector.extract_strided_slice %8 {offsets = [0, 0, 2], sizes = [4, 16, 16], strides = [1, 1, 1]} : vector<4x18x18xf32> to vector<4x16x16xf32>
    %14 = vector.shape_cast %13 : vector<4x16x16xf32> to vector<4x256xf32>
    %15 = vector.extract_strided_slice %8 {offsets = [0, 1, 0], sizes = [4, 16, 16], strides = [1, 1, 1]} : vector<4x18x18xf32> to vector<4x16x16xf32>
    %16 = vector.shape_cast %15 : vector<4x16x16xf32> to vector<4x256xf32>
    %17 = vector.extract_strided_slice %8 {offsets = [0, 1, 1], sizes = [4, 16, 16], strides = [1, 1, 1]} : vector<4x18x18xf32> to vector<4x16x16xf32>
    %18 = vector.shape_cast %17 : vector<4x16x16xf32> to vector<4x256xf32>
    %19 = vector.extract_strided_slice %8 {offsets = [0, 1, 2], sizes = [4, 16, 16], strides = [1, 1, 1]} : vector<4x18x18xf32> to vector<4x16x16xf32>
    %20 = vector.shape_cast %19 : vector<4x16x16xf32> to vector<4x256xf32>
    %21 = vector.extract_strided_slice %8 {offsets = [0, 2, 0], sizes = [4, 16, 16], strides = [1, 1, 1]} : vector<4x18x18xf32> to vector<4x16x16xf32>
    %22 = vector.shape_cast %21 : vector<4x16x16xf32> to vector<4x256xf32>
    %23 = vector.extract_strided_slice %8 {offsets = [0, 2, 1], sizes = [4, 16, 16], strides = [1, 1, 1]} : vector<4x18x18xf32> to vector<4x16x16xf32>
    %24 = vector.shape_cast %23 : vector<4x16x16xf32> to vector<4x256xf32>
    %25 = vector.extract_strided_slice %8 {offsets = [0, 2, 2], sizes = [4, 16, 16], strides = [1, 1, 1]} : vector<4x18x18xf32> to vector<4x16x16xf32>
    %26 = vector.shape_cast %25 : vector<4x16x16xf32> to vector<4x256xf32>
    %27 = tpu.concatenate %10, %12, %14, %16, %18, %20, %22, %24, %26 in 0 : vector<4x256xf32>, vector<4x256xf32>, vector<4x256xf32>, vector<4x256xf32>, vector<4x256xf32>, vector<4x256xf32>, vector<4x256xf32>, vector<4x256xf32>, vector<4x256xf32> -> vector<36x256xf32>
    %28 = arith.truncf %27 : vector<36x256xf32> to vector<36x256xbf16>
    %cst_11 = arith.constant dense<0.000000e+00> : vector<8x256xf32>
    %29 = tpu.matmul %7, %28, %cst_11 {dimension_numbers = #tpu.dot_dimension_numbers<[1], [0], [0], [1], [0, 0, 1, 1], [], []>} : vector<8x36xbf16>, vector<36x256xbf16>, vector<8x256xf32> -> vector<8x256xf32>
    %30 = vector.extract_strided_slice %5 {offsets = [4, 0, 0], sizes = [4, 18, 18], strides = [1, 1, 1]} : vector<8x18x18xf32> to vector<4x18x18xf32>
    %31 = vector.extract_strided_slice %30 {offsets = [0, 0, 0], sizes = [4, 16, 16], strides = [1, 1, 1]} : vector<4x18x18xf32> to vector<4x16x16xf32>
    %32 = vector.shape_cast %31 : vector<4x16x16xf32> to vector<4x256xf32>
    %33 = vector.extract_strided_slice %30 {offsets = [0, 0, 1], sizes = [4, 16, 16], strides = [1, 1, 1]} : vector<4x18x18xf32> to vector<4x16x16xf32>
    %34 = vector.shape_cast %33 : vector<4x16x16xf32> to vector<4x256xf32>
    %35 = vector.extract_strided_slice %30 {offsets = [0, 0, 2], sizes = [4, 16, 16], strides = [1, 1, 1]} : vector<4x18x18xf32> to vector<4x16x16xf32>
    %36 = vector.shape_cast %35 : vector<4x16x16xf32> to vector<4x256xf32>
    %37 = vector.extract_strided_slice %30 {offsets = [0, 1, 0], sizes = [4, 16, 16], strides = [1, 1, 1]} : vector<4x18x18xf32> to vector<4x16x16xf32>
    %38 = vector.shape_cast %37 : vector<4x16x16xf32> to vector<4x256xf32>
    %39 = vector.extract_strided_slice %30 {offsets = [0, 1, 1], sizes = [4, 16, 16], strides = [1, 1, 1]} : vector<4x18x18xf32> to vector<4x16x16xf32>
    %40 = vector.shape_cast %39 : vector<4x16x16xf32> to vector<4x256xf32>
    %41 = vector.extract_strided_slice %30 {offsets = [0, 1, 2], sizes = [4, 16, 16], strides = [1, 1, 1]} : vector<4x18x18xf32> to vector<4x16x16xf32>
    %42 = vector.shape_cast %41 : vector<4x16x16xf32> to vector<4x256xf32>
    %43 = vector.extract_strided_slice %30 {offsets = [0, 2, 0], sizes = [4, 16, 16], strides = [1, 1, 1]} : vector<4x18x18xf32> to vector<4x16x16xf32>
    %44 = vector.shape_cast %43 : vector<4x16x16xf32> to vector<4x256xf32>
    %45 = vector.extract_strided_slice %30 {offsets = [0, 2, 1], sizes = [4, 16, 16], strides = [1, 1, 1]} : vector<4x18x18xf32> to vector<4x16x16xf32>
    %46 = vector.shape_cast %45 : vector<4x16x16xf32> to vector<4x256xf32>
    %47 = vector.extract_strided_slice %30 {offsets = [0, 2, 2], sizes = [4, 16, 16], strides = [1, 1, 1]} : vector<4x18x18xf32> to vector<4x16x16xf32>
    %48 = vector.shape_cast %47 : vector<4x16x16xf32> to vector<4x256xf32>
    %49 = tpu.concatenate %32, %34, %36, %38, %40, %42, %44, %46, %48 in 0 : vector<4x256xf32>, vector<4x256xf32>, vector<4x256xf32>, vector<4x256xf32>, vector<4x256xf32>, vector<4x256xf32>, vector<4x256xf32>, vector<4x256xf32>, vector<4x256xf32> -> vector<36x256xf32>
    %50 = arith.truncf %49 : vector<36x256xf32> to vector<36x256xbf16>
    %cst_12 = arith.constant dense<0.000000e+00> : vector<8x256xf32>
    %51 = tpu.matmul %7, %50, %cst_12 {dimension_numbers = #tpu.dot_dimension_numbers<[1], [0], [0], [1], [0, 0, 1, 1], [], []>} : vector<8x36xbf16>, vector<36x256xbf16>, vector<8x256xf32> -> vector<8x256xf32>
    %52 = tpu.concatenate %29, %51 in 0 : vector<8x256xf32>, vector<8x256xf32> -> vector<16x256xf32>
    %cst_13 = arith.constant dense<0.000000e+00> : vector<16xf32>
    %53 = vector.multi_reduction <add>, %52, %cst_13 [1] : vector<16x256xf32> to vector<16xf32>
    %54 = vector.shape_cast %53 : vector<16xf32> to vector<16x1xf32>
    %55 = arith.mulf %52, %52 : vector<16x256xf32>
    %cst_14 = arith.constant dense<0.000000e+00> : vector<16xf32>
    %56 = vector.multi_reduction <add>, %55, %cst_14 [1] : vector<16x256xf32> to vector<16xf32>
    %57 = vector.shape_cast %56 : vector<16xf32> to vector<16x1xf32>
    %58 = vector.extract_strided_slice %54 {offsets = [0, 0], sizes = [8, 1], strides = [1, 1]} : vector<16x1xf32> to vector<8x1xf32>
    %59 = vector.extract_strided_slice %57 {offsets = [0, 0], sizes = [8, 1], strides = [1, 1]} : vector<16x1xf32> to vector<8x1xf32>
    %60 = vector.extract_strided_slice %54 {offsets = [8, 0], sizes = [8, 1], strides = [1, 1]} : vector<16x1xf32> to vector<8x1xf32>
    %61 = arith.addf %58, %60 : vector<8x1xf32>
    %62 = vector.extract_strided_slice %57 {offsets = [8, 0], sizes = [8, 1], strides = [1, 1]} : vector<16x1xf32> to vector<8x1xf32>
    %63 = arith.addf %59, %62 : vector<8x1xf32>
    %cst_15 = arith.constant 0.001953125 : f32
    %64 = vector.broadcast %cst_15 : f32 to vector<8x1xf32>
    %65 = arith.mulf %61, %64 : vector<8x1xf32>
    %cst_16 = arith.constant 0.001953125 : f32
    %66 = vector.broadcast %cst_16 : f32 to vector<8x1xf32>
    %67 = arith.mulf %63, %66 : vector<8x1xf32>
    %68 = arith.mulf %65, %65 : vector<8x1xf32>
    %69 = arith.subf %67, %68 : vector<8x1xf32>
    %cst_17 = arith.constant 0.000000e+00 : f32
    %70 = vector.broadcast %cst_17 : f32 to vector<8x1xf32>
    %71 = arith.maximumf %69, %70 : vector<8x1xf32>
    %c0_18 = arith.constant 0 : index
    %c0_19 = arith.constant 0 : index
    %72 = vector.load %arg2[%c0_18, %c0_19] : memref<8x1xf32, #tpu.memory_space<vmem>>, vector<8x1xf32>
    %cst_20 = arith.constant 9.99999974E-6 : f32
    %73 = vector.broadcast %cst_20 : f32 to vector<8x1xf32>
    %74 = arith.addf %71, %73 : vector<8x1xf32>
    %75 = math.rsqrt %74 : vector<8x1xf32>
    %76 = arith.mulf %72, %75 : vector<8x1xf32>
    %c0_21 = arith.constant 0 : index
    %c0_22 = arith.constant 0 : index
    %77 = vector.load %arg3[%c0_21, %c0_22] : memref<8x1xf32, #tpu.memory_space<vmem>>, vector<8x1xf32>
    %78 = arith.mulf %65, %76 : vector<8x1xf32>
    %79 = arith.subf %77, %78 : vector<8x1xf32>
    %80 = tpu.concatenate %76, %76 in 0 : vector<8x1xf32>, vector<8x1xf32> -> vector<16x1xf32>
    %81 = tpu.concatenate %79, %79 in 0 : vector<8x1xf32>, vector<8x1xf32> -> vector<16x1xf32>
    %82 = vector.broadcast %80 : vector<16x1xf32> to vector<16x256xf32>
    %83 = arith.mulf %52, %82 : vector<16x256xf32>
    %84 = vector.broadcast %81 : vector<16x1xf32> to vector<16x256xf32>
    %85 = arith.addf %83, %84 : vector<16x256xf32>
    %cst_23 = arith.constant 0.000000e+00 : f32
    %86 = vector.broadcast %cst_23 : f32 to vector<16x256xf32>
    %87 = arith.maximumf %85, %86 : vector<16x256xf32>
    %c0_24 = arith.constant 0 : index
    %c0_25 = arith.constant 0 : index
    %88 = vector.load %arg4[%c0_24, %c0_25] : memref<16x256xf32, #tpu.memory_space<vmem>>, vector<16x256xf32>
    tpu.vector_store %arg4[%c0_24, %c0_25], %87 {strides = array<i32>} : memref<16x256xf32, #tpu.memory_space<vmem>>, vector<16x256xf32>,
    return
  }
}

</mosaic_0001>

<bundles_post_ra>
// kernel: tpu_custom_call.1
= control target key start
LH: loop header
LB: loop body
LE: loop exit
PB: predicated region body
PF: predicated region fallthrough
CT: control target
= control target key end

     0   :  { %9 = vsyncpa [#allocation4], 0  ;;  %s9207_s0 = inlined_call_operand.vmem [shape: f32[8,256], index: 0, kind: input, shape index: {}]   ;;  %s9208_s1 = inlined_call_operand.hbm [shape: f32[8,36], index: 1, kind: input, shape index: {}]   ;;  %s9209_s2 = inlined_call_operand.vmem [shape: f32[8,1], index: 2, kind: input, shape index: {}]   ;;  %s9210_s3 = inlined_call_operand.vmem [shape: f32[8,1], index: 3, kind: input, shape index: {}]   ;;  %s9211_s4 = inlined_call_operand.hbm [shape: f32[16,256], index: 4, kind: output, shape index: {}]  }
   0x1   :  { %10 = vsyncpa [#allocation5], 0  ;;  %s18_s17 = sshll.u32 %s9208_s1, 4  ;;  %s5310_s18 = smov [#allocation3]   ;;  %s19_s17 = int_to_ptr.hbm [resolvable:$true] %s18_s17 }
   0x2   :  { %s20_s19 = sshll.u32 %s5310_s18, 4  ;;  %s21_s19 = int_to_ptr.vmem [resolvable:$true] %s20_s19 }
   0x3   :  { %23 = dma.hbm_to_vmem [thread:$0]  %s19_s17, 128, %s21_s19, [#allocation4]  }
   0x4   :  { %5306 = dma.done.wait [#allocation4], 128  }
   0x5   :  { %5307 = vsyncadd [#allocation4], 4294967168  ;;  %v59_v0 = vld [vmem:[%s9207_s0] sm:$0xff]  ;;  %s5311_s22 = smov 80   ;;  %s5312_s23 = smov 112   ;;  %v5367_v1 = vld [vmem:[%s9207_s0 + $0x8] sm:$0xff] }
   0x6   :  { %68 = vrot.lane.b32.xlu1 %v59_v0, %s5311_s22  ;;  %62 = vrot.lane.b32.xlu0 %v59_v0, %s5312_s23  ;;  %s5313_s24 = smov 48   ;;  %s5314_s1 = smov 64   ;;  %v5318_v5 = vmov 1983009808   ;;  %v108_v8 = vrot.slane %v59_v0, 4  ;;  %vm106_vm0 = vcmask 1047556  }
   0x7   :  { %74 = vrot.lane.b32.xlu2 %v59_v0, %s5313_s24  ;;  %s5315_s25 = smov 96   ;;  %s5316_s26 = smov 32   ;;  %v111_v6 = vunpack.c.l.s4 %v5318_v5  ;;  %v5319_v20 = vmov 1934713408   ;;  %v220_v37 = vrot.slane %v5367_v1, 4  ;;  %vm33_vm1 = vcmask 146432  }
   0x8   :  { %s5317_s29 = smov 16   ;;  %v159_v21 = vunpack.c.l.s4 %v5319_v20  ;;  %s5320_s0 = smov 1   ;;  %vm36_vm2 = vcmask 140288   ;;  %vm394_vm3 = vcmask 138248   ;;  %vm1673_vm4 = vcmask 1045504  }
   0x9   :  { %v5384_v10 = vunpack.c.0.s8 %v111_v6  ;;  %s5322_s30 = smov 126   ;;  %s5323_s5 = smov 127   ;;  %vm1050_vm5 = vcmask 1046528   ;;  %vm605_vm6 = vcmask 130048   ;;  %vm607_vm7 = vcmask 261120  }
   0xa   :  { %v5403_v31 = vunpack.c.0.s8 %v159_v21  ;;  %vm609_vm8 = vcmask 392192   ;;  %vm611_vm9 = vcmask 523264   ;;  %vm613_vm10 = vcmask 654336   ;;  %s4363_s11 = sshll.u32 %s9211_s4, 4  ;;  %s5326_s13 = smov 256   ;;  %s4364_s11 = int_to_ptr.hbm [resolvable:$true] %s4363_s11 }
   0xb   :  { %9373 = vst [vmem:[#allocation9_spill] sm:$0xff] %v5384_v10  ;;  %vm615_vm11 = vcmask 785408   ;;  %vm617_vm12 = vcmask 916480   ;;  %vm2320_vm13 = vcmask 1043456   ;;  %vm2339_vm14 = vcmask 1041408  }
   0xc   :  { %9374 = vst [vmem:[#allocation10_spill] sm:$0xff] %v5403_v31  ;;  %vm2335_vm15 = vcmask 293888  }
   0xe   :  { %71 = vrot.lane.b32.xlu1 %v59_v0, %s5314_s1  ;;  %65 = vrot.lane.b32.xlu0 %v59_v0, %s5315_s25 }
   0xf   :  { %77 = vrot.lane.b32.xlu2 %v59_v0, %s5316_s26 }
  0x16   :  { %84 = vrot.lane.b32.xlu1 %v5367_v1, %s5312_s23  ;;  %80 = vrot.lane.b32.xlu0 %v59_v0, %s5317_s29 }
  0x17   :  { %87 = vrot.lane.b32.xlu2 %v5367_v1, %s5315_s25 }
  0x1e   :  { %93 = vrot.lane.b32.xlu1 %v5367_v1, %s5314_s1  ;;  %90 = vrot.lane.b32.xlu0 %v5367_v1, %s5311_s22 }
  0x1f   :  { %96 = vrot.lane.b32.xlu2 %v5367_v1, %s5313_s24 }
  0x26   :  { %102 = vrot.lane.b32.xlu1 %v5367_v1, %s5317_s29  ;;  %99 = vrot.lane.b32.xlu0 %v5367_v1, %s5316_s26 }
  0x61   :  { %v75_v2 = vpop.permute.xlu2 %74 }
  0x62   :  { %v144_v27 = vrot.slane %v75_v2, 4 }
  0x69   :  { %v78_v9 = vpop.permute.xlu2 %77 }
  0x6a   :  { %v130_v28 = vrot.slane %v78_v9, 4 }
  0x71   :  { %v88_v30 = vpop.permute.xlu2 %87 }
  0x72   :  { %v221_v47 = vsel %vm106_vm0, %v88_v30, %v220_v37  ;;  %v218_v54 = vrot.slane %v88_v30, 4 }
  0x73   :  { %v5440_v56 = vperm.slane %v221_v47, %v5384_v10 }
  0x78   :  { %v69_v3 = vpop.permute.xlu1 %68  ;;  %v63_v4 = vpop.permute.xlu0 %62 }
  0x79   :  { %v120_v7 = vrot.slane %v63_v4, 4  ;;  %v118_v13 = vrot.slane %v69_v3, 4  ;;  %v97_v63 = vpop.permute.xlu2 %96 }
  0x7a   :  { %v256_v6 = vrot.slane %v97_v63, 4 }
  0x7b   :  { %v121_v14 = vsel %vm106_vm0, %v69_v3, %v120_v7  ;;  %v119_v24 = vsel %vm106_vm0, %v118_v13, %v63_v4  ;;  %v280_v3 = vrot.slane %v5440_v56, 4 }
  0x7c   :  { %v5393_v22 = vperm.slane %v121_v14, %v5384_v10  ;;  %v5406_v32 = vperm.slane %v119_v24, %v5384_v10 }
  0x7e   :  { %v154_v44 = vrot.slane %v5406_v32, 4 }
  0x80   :  { %v72_v11 = vpop.permute.xlu1 %71  ;;  %v66_v12 = vpop.permute.xlu0 %65 }
  0x81   :  { %v132_v15 = vrot.slane %v72_v11, 4  ;;  %v109_v16 = vsel %vm106_vm0, %v66_v12, %v108_v8  ;;  %v105_v19 = vrot.slane %v66_v12, 4  ;;  %v131_v42 = vsel %vm106_vm0, %v130_v28, %v72_v11 }
  0x82   :  { %v5389_v17 = vperm.slane %v109_v16, %v5384_v10  ;;  %v137_v50 = vperm.slane %v131_v42, %v5384_v10 }
  0x83   :  { %v133_v18 = vsel %vm106_vm0, %v78_v9, %v132_v15  ;;  %v107_v29 = vsel %vm106_vm0, %v105_v19, %v59_v0  ;;  %v219_v0 = vsel %vm106_vm0, %v218_v54, %v5367_v1 }
  0x84   :  { %v168_v23 = vrot.slane %v5389_v17, 4  ;;  %v5398_v25 = vperm.slane %v133_v18, %v5384_v10  ;;  %v5415_v40 = vperm.slane %v107_v29, %v5384_v10  ;;  %v225_v8 = vperm.slane %v219_v0, %v5384_v10 }
  0x86   :  { %v169_v26 = vsel %vm106_vm0, %v5393_v22, %v168_v23  ;;  %v192_v39 = vrot.slane %v5398_v25, 4  ;;  %v155_v52 = vsel %vm106_vm0, %v154_v44, %v5415_v40  ;;  %v268_v20 = vrot.slane %v225_v8, 4 }
  0x87   :  { %v5411_v38 = vperm.slane %v169_v26, %v5403_v31  ;;  %v5446_v62 = vperm.slane %v155_v52, %v5403_v31 }
  0x88   :  { %v85_v33 = vpop.permute.xlu1 %84  ;;  %v81_v34 = vpop.permute.xlu0 %80 }
  0x89   :  { %v142_v35 = vrot.slane %v81_v34, 4  ;;  %v145_v36 = vsel %vm106_vm0, %v81_v34, %v144_v27  ;;  %v216_v49 = vrot.slane %v5411_v38, 4  ;;  %v232_v53 = vrot.slane %v85_v33, 4 }
  0x8a   :  { %v5418_v41 = vperm.slane %v145_v36, %v5384_v10  ;;  %v204_v7 = vrot.slane %v5446_v62, 4 }
  0x8b   :  { %v143_v43 = vsel %vm106_vm0, %v142_v35, %v75_v2 }
  0x8c   :  { %v5424_v45 = vperm.slane %v143_v43, %v5384_v10  ;;  %v193_v46 = vsel %vm106_vm0, %v5418_v41, %v192_v39  ;;  %v190_v34 = vrot.slane %v5418_v41, 4  ;;  %v180_v39 = vrot.slane %v137_v50, 4 }
  0x8d   :  { %v5430_v48 = vperm.slane %v193_v46, %v5403_v31 }
  0x8e   :  { %v178_v51 = vrot.slane %v5424_v45, 4  ;;  %v181_v52 = vsel %vm106_vm0, %v5424_v45, %v180_v39 }
  0x8f   :  { %v217_v55 = vsel %vm106_vm0, %v5430_v48, %v216_v49 }
  0x90   :  { %v94_v57 = vpop.permute.xlu1 %93  ;;  %v91_v58 = vpop.permute.xlu0 %90  ;;  %374 = vrot.lane.b32.xlu1 %v217_v55, %s5320_s0  ;;  %v179_v59 = vsel %vm106_vm0, %v178_v51, %v137_v50 }
  0x91   :  { %v230_v60 = vrot.slane %v91_v58, 4  ;;  %v233_v61 = vsel %vm106_vm0, %v91_v58, %v232_v53  ;;  %v5451_v2 = vperm.slane %v179_v59, %v5403_v31  ;;  %v244_v9 = vrot.slane %v94_v57, 4 }
  0x92   :  { %v5456_v5 = vperm.slane %v233_v61, %v5384_v10  ;;  %v191_v53 = vsel %vm106_vm0, %v190_v34, %v5398_v25  ;;  %v156_v59 = vrot.slane %v5415_v40, 4  ;;  %v166_v25 = vrot.slane %v5393_v22, 4 }
  0x93   :  { %v231_v4 = vsel %vm106_vm0, %v230_v60, %v85_v33  ;;  %v205_v1 = vsel %vm106_vm0, %v5451_v2, %v204_v7  ;;  %v189_v60 = vperm.slane %v181_v52, %v5403_v31  ;;  %v202_v45 = vrot.slane %v5451_v2, 4 }
  0x94   :  { %v237_v11 = vperm.slane %v231_v4, %v5384_v10  ;;  %v281_v12 = vsel %vm106_vm0, %v5456_v5, %v280_v3  ;;  %v197_v0 = vperm.slane %v191_v53, %v5403_v31  ;;  %v278_v3 = vrot.slane %v5456_v5, 4 }
  0x95   :  { %v5472_v27 = vperm.slane %v281_v12, %v5403_v31  ;;  %v157_v40 = vsel %vm106_vm0, %v5406_v32, %v156_v59  ;;  %v167_v4 = vsel %vm106_vm0, %v166_v25, %v5389_v17  ;;  %v206_v2 = vrot.slane %v189_v60, 4 }
  0x96   :  { %v266_v23 = vrot.slane %v237_v11, 4  ;;  %v269_v47 = vsel %vm106_vm0, %v237_v11, %v268_v20  ;;  %v210_v7 = vrot.slane %v197_v0, 4  ;;  %v165_v22 = vperm.slane %v157_v40, %v5403_v31 }
  0x97   :  { %v328_v43 = vrot.slane %v5472_v27, 4  ;;  %v173_v5 = vperm.slane %v167_v4, %v5403_v31  ;;  %v279_v17 = vsel %vm106_vm0, %v278_v3, %v5440_v56 }
  0x98   :  { %v103_v13 = vpop.permute.xlu1 %102  ;;  %v100_v14 = vpop.permute.xlu0 %99  ;;  %350 = vrot.lane.b32.xlu1 %v205_v1, %s5320_s0  ;;  %v267_v44 = vsel %vm106_vm0, %v266_v23, %v225_v8  ;;  %v207_v32 = vsel %vm106_vm0, %v206_v2, %v165_v22  ;;  %v285_v12 = vperm.slane %v279_v17, %v5403_v31 }
  0x99   :  { %v254_v15 = vrot.slane %v103_v13, 4  ;;  %v257_v16 = vsel %vm106_vm0, %v103_v13, %v256_v6  ;;  %v242_v18 = vrot.slane %v100_v14, 4  ;;  %v245_v19 = vsel %vm106_vm0, %v100_v14, %v244_v9 }
  0x9a   :  { %v253_v21 = vperm.slane %v245_v19, %v5384_v10  ;;  %v265_v29 = vperm.slane %v257_v16, %v5384_v10  ;;  %v273_v54 = vperm.slane %v267_v44, %v5403_v31  ;;  %v203_v6 = vsel %vm106_vm0, %v202_v45, %v5446_v62 }
  0x9b   :  { %v255_v24 = vsel %vm106_vm0, %v254_v15, %v97_v63  ;;  %v243_v26 = vsel %vm106_vm0, %v242_v18, %v94_v57  ;;  %v277_v57 = vperm.slane %v269_v47, %v5403_v31  ;;  %v5321_v9 = vmov 0.0  }
  0x9c   :  { %v261_v28 = vperm.slane %v255_v24, %v5384_v10  ;;  %v249_v30 = vperm.slane %v243_v26, %v5384_v10  ;;  %v304_v33 = vrot.slane %v253_v21, 4  ;;  %v302_v8 = vrot.slane %v265_v29, 4  ;;  %57 = vst.msk [vmem:[#allocation2 + $0xb0] sm:$0xff] %vm33_vm1, %v5321_v9 }
  0x9d   :  { %58 = vst.msk [vmem:[#allocation2 + $0xb8] sm:$0x3] %vm36_vm2, %v5321_v9  ;;  %v211_v62 = vsel %vm106_vm0, %v210_v7, %v173_v5  ;;  %v316_v1 = vrot.slane %v273_v54, 4  ;;  %v320_v14 = vrot.slane %v277_v57, 4  ;;  %v324_v15 = vrot.slane %v285_v12, 4 }
  0x9e   :  { %v290_v35 = vrot.slane %v261_v28, 4  ;;  %v292_v36 = vrot.slane %v249_v30, 4  ;;  %v305_v37 = vsel %vm106_vm0, %v265_v29, %v304_v33  ;;  %34 = vst.msk [vmem:[#allocation2] sm:$0xff] %vm33_vm1, %v5321_v9  ;;  %v303_v11 = vsel %vm106_vm0, %v302_v8, %v253_v21 }
  0x9f   :  { %v5480_v42 = vperm.slane %v305_v37, %v5403_v31  ;;  %35 = vst.msk [vmem:[#allocation2 + $0x8] sm:$0xff] %vm33_vm1, %v5321_v9  ;;  %v309_v13 = vperm.slane %v303_v11, %v5403_v31  ;;  %v208_v19 = vrot.slane %v165_v22, 4  ;;  %v212_v21 = vrot.slane %v173_v5, 4 }
  0xa0   :  { %v291_v46 = vsel %vm106_vm0, %v290_v35, %v249_v30  ;;  %v293_v49 = vsel %vm106_vm0, %v261_v28, %v292_v36  ;;  %37 = vst.msk [vmem:[#allocation2 + $0x10] sm:$0x3] %vm36_vm2, %v5321_v9  ;;  %v214_v30 = vrot.slane %v5430_v48, 4 }
  0xa1   :  { %v329_v41 = vsel %vm106_vm0, %v5480_v42, %v328_v43  ;;  %v297_v51 = vperm.slane %v291_v46, %v5403_v31  ;;  %v301_v50 = vperm.slane %v293_v49, %v5403_v31  ;;  %38 = vst.msk [vmem:[#allocation2 + $0x18] sm:$0xff] %vm33_vm1, %v5321_v9  ;;  %v325_v18 = vsel %vm106_vm0, %v309_v13, %v324_v15 }
  0xa2   :  { %376 = vrot.lane.b32.xlu2 %v329_v41, %s5320_s0  ;;  %39 = vst.msk [vmem:[#allocation2 + $0x20] sm:$0xff] %vm33_vm1, %v5321_v9  ;;  %v209_v20 = vsel %vm106_vm0, %v189_v60, %v208_v19  ;;  %v213_v23 = vsel %vm106_vm0, %v197_v0, %v212_v21  ;;  %v322_v24 = vrot.slane %v309_v13, 4  ;;  %v326_v28 = vrot.slane %v5480_v42, 4 }
  0xa3   :  { %v314_v55 = vrot.slane %v297_v51, 4  ;;  %v318_v58 = vrot.slane %v301_v50, 4  ;;  %v317_v56 = vsel %vm106_vm0, %v297_v51, %v316_v1  ;;  %40 = vst.msk [vmem:[#allocation2 + $0x28] sm:$0x3] %vm36_vm2, %v5321_v9  ;;  %v321_v16 = vsel %vm106_vm0, %v301_v50, %v320_v14 }
  0xa4   :  { %41 = vst.msk [vmem:[#allocation2 + $0x30] sm:$0xff] %vm33_vm1, %v5321_v9  ;;  %v323_v26 = vsel %vm106_vm0, %v322_v24, %v285_v12  ;;  %v327_v29 = vsel %vm106_vm0, %v326_v28, %v5472_v27  ;;  %v215_v33 = vsel %vm106_vm0, %v214_v30, %v5411_v38 }
  0xa5   :  { %v315_v61 = vsel %vm106_vm0, %v314_v55, %v273_v54  ;;  %v319_v63 = vsel %vm106_vm0, %v318_v58, %v277_v57  ;;  %42 = vst.msk [vmem:[#allocation2 + $0x38] sm:$0xff] %vm33_vm1, %v5321_v9 }
  0xa6   :  { %348 = vrot.lane.b32.xlu0 %v315_v61, %s5320_s0  ;;  %356 = vrot.lane.b32.xlu1 %v319_v63, %s5320_s0  ;;  %43 = vst.msk [vmem:[#allocation2 + $0x40] sm:$0x3] %vm36_vm2, %v5321_v9 }
  0xa7   :  { %44 = vst.msk [vmem:[#allocation2 + $0x48] sm:$0xff] %vm33_vm1, %v5321_v9 }
  0xa8   :  { %45 = vst.msk [vmem:[#allocation2 + $0x50] sm:$0xff] %vm33_vm1, %v5321_v9 }
  0xa9   :  { %46 = vst.msk [vmem:[#allocation2 + $0x58] sm:$0x3] %vm36_vm2, %v5321_v9 }
  0xaa   :  { %346 = vrot.lane.b32.xlu2 %v203_v6, %s5320_s0  ;;  %47 = vst.msk [vmem:[#allocation2 + $0x60] sm:$0xff] %vm33_vm1, %v5321_v9 }
  0xab   :  { %48 = vst.msk [vmem:[#allocation2 + $0x68] sm:$0xff] %vm33_vm1, %v5321_v9 }
  0xac   :  { %49 = vst.msk [vmem:[#allocation2 + $0x70] sm:$0x3] %vm36_vm2, %v5321_v9 }
  0xad   :  { %50 = vst.msk [vmem:[#allocation2 + $0x78] sm:$0xff] %vm33_vm1, %v5321_v9 }
  0xae   :  { %354 = vrot.lane.b32.xlu0 %v207_v32, %s5320_s0  ;;  %362 = vrot.lane.b32.xlu1 %v211_v62, %s5320_s0  ;;  %51 = vst.msk [vmem:[#allocation2 + $0x80] sm:$0xff] %vm33_vm1, %v5321_v9 }
  0xaf   :  { %52 = vst.msk [vmem:[#allocation2 + $0x88] sm:$0x3] %vm36_vm2, %v5321_v9 }
  0xb0   :  { %53 = vst.msk [vmem:[#allocation2 + $0x90] sm:$0xff] %vm33_vm1, %v5321_v9 }
  0xb1   :  { %54 = vst.msk [vmem:[#allocation2 + $0x98] sm:$0xff] %vm33_vm1, %v5321_v9 }
  0xb2   :  { %352 = vrot.lane.b32.xlu2 %v317_v56, %s5320_s0  ;;  %55 = vst.msk [vmem:[#allocation2 + $0xa0] sm:$0x3] %vm36_vm2, %v5321_v9 }
  0xb3   :  { %56 = vst.msk [vmem:[#allocation2 + $0xa8] sm:$0xff] %vm33_vm1, %v5321_v9 }
  0xb6   :  { %360 = vrot.lane.b32.xlu0 %v321_v16, %s5320_s0  ;;  %368 = vrot.lane.b32.xlu1 %v325_v18, %s5320_s0 }
  0xba   :  { %358 = vrot.lane.b32.xlu2 %v209_v20, %s5320_s0 }
  0xbe   :  { %366 = vrot.lane.b32.xlu0 %v213_v23, %s5320_s0 }
  0xc2   :  { %364 = vrot.lane.b32.xlu2 %v323_v26, %s5320_s0 }
  0xc6   :  { %372 = vrot.lane.b32.xlu0 %v327_v29, %s5320_s0 }
  0xca   :  { %370 = vrot.lane.b32.xlu2 %v215_v33, %s5320_s0 }
  0xfc   :  { %v377_v34 = vpop.permute.xlu2 %376 }
  0xfd   :  { %410 = vst.msk [vmem:[#allocation2 + $0xb1] sm:$0xff] %vm394_vm3, %v377_v34 }
 0x102   :  { %v375_v35 = vpop.permute.xlu1 %374 }
 0x103   :  { %409 = vst.msk [vmem:[#allocation2 + $0xa9] sm:$0xff] %vm394_vm3, %v375_v35 }
 0x104   :  { %v347_v36 = vpop.permute.xlu2 %346 }
 0x105   :  { %395 = vst.msk [vmem:[#allocation2 + $0x1] sm:$0xff] %vm394_vm3, %v347_v36 }
 0x10a   :  { %v351_v27 = vpop.permute.xlu1 %350  ;;  %v5573_v37 = vld [vmem:[#allocation2 + $0xa8] sm:$0xff]  ;;  %v5575_v48 = vld [vmem:[#allocation2 + $0xb0] sm:$0xff] }
 0x10b   :  { %397 = vst.msk [vmem:[#allocation2 + $0x19] sm:$0xff] %vm394_vm3, %v351_v27  ;;  %v4402_v38 = vpack.i.bf16 %v5575_v48, %v5573_v37 }
 0x10c   :  { %v353_v39 = vpop.permute.xlu2 %352  ;;  %v5622_v25 = vld [vmem:[#allocation2] sm:$0xff] }
 0x10d   :  { %398 = vst.msk [vmem:[#allocation2 + $0x21] sm:$0xff] %vm394_vm3, %v353_v39  ;;  %4403 = vrot.lane.b32.xlu0 %v4402_v38, %s5322_s30  ;;  %4398 = vrot.lane.b32.xlu1 %v4402_v38, %s5323_s5  ;;  %v1051_v13 = vrot.slane %v5622_v25, 1  ;;  %v439_v14 = vrot.slane %v5622_v25, 4 }
 0x112   :  { %v5583_v43 = vld [vmem:[#allocation2 + $0x18] sm:$0xff] }
 0x113   :  { %v1679_v51 = vrot.slane %v5583_v43, 2  ;;  %v451_v57 = vrot.slane %v5583_v43, 4 }
 0x114   :  { %v359_v42 = vpop.permute.xlu2 %358  ;;  %v5585_v44 = vld [vmem:[#allocation2 + $0x20] sm:$0xff]  ;;  %v5587_v46 = vld [vmem:[#allocation2 + $0x28] sm:$0x3] }
 0x115   :  { %401 = vst.msk [vmem:[#allocation2 + $0x49] sm:$0xff] %vm394_vm3, %v359_v42  ;;  %v5592_v47 = vpack.i.bf16 %v5585_v44, %v5583_v43  ;;  %v1680_v49 = vrot.slane %v5585_v44, 2  ;;  %v1682_v41 = vrot.slane %v5587_v46, 2  ;;  %v507_v36 = vrot.slane %v5585_v44, 4 }
 0x117   :  { %4413 = vrot.lane.b32.xlu2 %v5592_v47, %s5323_s5  ;;  %v5601_v53 = vsel %vm1673_vm4, %v1679_v51, %v1680_v49  ;;  %v5604_v54 = vsel %vm1673_vm4, %v1680_v49, %v1682_v41 }
 0x118   :  { %v349_v50 = vpop.permute.xlu0 %348  ;;  %v357_v52 = vpop.permute.xlu1 %356  ;;  %v5609_v55 = vpack.i.bf16 %v5604_v54, %v5601_v53 }
 0x119   :  { %396 = vst.msk [vmem:[#allocation2 + $0x9] sm:$0xff] %vm394_vm3, %v349_v50 }
 0x11a   :  { %400 = vst.msk [vmem:[#allocation2 + $0x39] sm:$0xff] %vm394_vm3, %v357_v52 }
 0x11c   :  { %v365_v58 = vpop.permute.xlu2 %364  ;;  %v5612_v59 = vld [vmem:[#allocation2 + $0x48] sm:$0xff] }
 0x11d   :  { %404 = vst.msk [vmem:[#allocation2 + $0x69] sm:$0xff] %vm394_vm3, %v365_v58  ;;  %v452_v60 = vsel %vm106_vm0, %v5612_v59, %v451_v57  ;;  %v449_v61 = vrot.slane %v5612_v59, 4 }
 0x11e   :  { %v460_v34 = vperm.slane %v452_v60, %v5384_v10  ;;  %v1057_v60 = vrot.slane %v5585_v44, 1 }
 0x11f   :  { %v5620_v63 = vsel %vm106_vm0, %v449_v61, %v5583_v43  ;;  %v1059_v61 = vrot.slane %v5587_v46, 1 }
 0x120   :  { %v355_v45 = vpop.permute.xlu0 %354  ;;  %v363_v0 = vpop.permute.xlu1 %362  ;;  %v5624_v3 = vld [vmem:[#allocation2 + $0x8] sm:$0xff]  ;;  %v5634_v2 = vld [vmem:[#allocation2 + $0x10] sm:$0x3]  ;;  %v473_v27 = vrot.slane %v460_v34, 4 }
 0x121   :  { %399 = vst.msk [vmem:[#allocation2 + $0x31] sm:$0xff] %vm394_vm3, %v355_v45  ;;  %v4407_v40 = vpack.i.bf16 %v5624_v3, %v5622_v25  ;;  %v5632_v6 = vld [vmem:[#allocation2 + $0x40] sm:$0x3]  ;;  %v1052_v17 = vrot.slane %v5624_v3, 1  ;;  %v1054_v32 = vrot.slane %v5634_v2, 1  ;;  %v495_v24 = vrot.slane %v5624_v3, 4 }
 0x122   :  { %403 = vst.msk [vmem:[#allocation2 + $0x61] sm:$0xff] %vm394_vm3, %v363_v0  ;;  %v1064_v9 = vrot.slane %v5632_v6, 1 }
 0x123   :  { %4408 = vrot.lane.b32.xlu1 %v4407_v40, %s5323_s5  ;;  %v5662_v18 = vsel %vm1050_vm5, %v1051_v13, %v1052_v17  ;;  %v5665_v19 = vsel %vm1050_vm5, %v1052_v17, %v1054_v32  ;;  %v1056_v13 = vrot.slane %v5583_v43, 1 }
 0x124   :  { %v371_v4 = vpop.permute.xlu2 %370 }
 0x125   :  { %407 = vst.msk [vmem:[#allocation2 + $0x91] sm:$0xff] %vm394_vm3, %v371_v4 }
 0x128   :  { %v361_v7 = vpop.permute.xlu0 %360  ;;  %v369_v8 = vpop.permute.xlu1 %368  ;;  %v5636_v22 = vld [vmem:[#allocation2 + $0x30] sm:$0xff]  ;;  %v5638_v5 = vld [vmem:[#allocation2 + $0x38] sm:$0xff] }
 0x129   :  { %402 = vst.msk [vmem:[#allocation2 + $0x51] sm:$0xff] %vm394_vm3, %v361_v7  ;;  %v4417_v62 = vpack.i.bf16 %v5638_v5, %v5636_v22  ;;  %v1061_v11 = vrot.slane %v5636_v22, 1  ;;  %v1062_v1 = vrot.slane %v5638_v5, 1  ;;  %v440_v20 = vsel %vm106_vm0, %v5636_v22, %v439_v14 }
 0x12a   :  { %406 = vst.msk [vmem:[#allocation2 + $0x81] sm:$0xff] %vm394_vm3, %v369_v8  ;;  %v448_v29 = vperm.slane %v440_v20, %v5384_v10  ;;  %v496_v30 = vsel %vm106_vm0, %v5638_v5, %v495_v24  ;;  %v437_v38 = vrot.slane %v5636_v22, 4  ;;  %v5718_v7 = vperm.slane %v5620_v63, %v5384_v10  ;;  %v5749_v20 = vld [vmem:[#allocation2 + $0x68] sm:$0xff] }
 0x12b   :  { %4418 = vrot.lane.b32.xlu0 %v4417_v62, %s5323_s5  ;;  %4438 = vrot.lane.b32.xlu2 %v4417_v62, %s5322_s30  ;;  %v5652_v12 = vsel %vm1050_vm5, %v1061_v11, %v1062_v1  ;;  %v5655_v56 = vsel %vm1050_vm5, %v1062_v1, %v1064_v9  ;;  %v504_v42 = vperm.slane %v496_v30, %v5384_v10  ;;  %v493_v8 = vrot.slane %v5638_v5, 4 }
 0x12c   :  { %v1135_v15 = vrot.slane %v5655_v56, 4  ;;  %v1079_v16 = vrot.slane %v5652_v12, 4  ;;  %v475_v35 = vrot.slane %v448_v29, 4  ;;  %v474_v41 = vsel %vm106_vm0, %v473_v27, %v448_v29  ;;  %v5760_v30 = vld [vmem:[#allocation2 + $0x90] sm:$0xff] }
 0x12d   :  { %v531_v45 = vrot.slane %v504_v42, 4  ;;  %v5729_v32 = vperm.slane %v474_v41, %v5403_v31  ;;  %v1674_v41 = vrot.slane %v5622_v25, 2 }
 0x12e   :  { %v5671_v21 = vsel %vm106_vm0, %v1135_v15, %v5665_v19  ;;  %v5675_v23 = vsel %vm106_vm0, %v1079_v16, %v5662_v18  ;;  %v476_v39 = vsel %vm106_vm0, %v460_v34, %v475_v35  ;;  %v5747_v16 = vld [vmem:[#allocation2 + $0x60] sm:$0xff] }
 0x12f   :  { %v5725_v9 = vperm.slane %v476_v39, %v5403_v31  ;;  %v4447_v27 = vpack.i.bf16 %v5749_v20, %v5747_v16 }
 0x130   :  { %v367_v26 = vpop.permute.xlu0 %366  ;;  %v5678_v28 = vld [vmem:[#allocation2 + $0x50] sm:$0xff] }
 0x131   :  { %405 = vst.msk [vmem:[#allocation2 + $0x79] sm:$0xff] %vm394_vm3, %v367_v26  ;;  %v4422_v33 = vpack.i.bf16 %v5678_v28, %v5612_v59  ;;  %v508_v49 = vsel %vm106_vm0, %v5678_v28, %v507_v36  ;;  %v505_v46 = vrot.slane %v5678_v28, 4  ;;  %v5771_v36 = vsel %vm1050_vm5, %v1056_v13, %v1057_v60 }
 0x132   :  { %v516_v57 = vperm.slane %v508_v49, %v5384_v10  ;;  %v422_v49 = vld [vmem:[#allocation2 + $0x58] sm:$0x3]  ;;  %v1081_v13 = vrot.slane %v5662_v18, 4 }
 0x133   :  { %4428 = vrot.lane.b32.xlu0 %v4407_v40, %s5322_s30  ;;  %4423 = vrot.lane.b32.xlu1 %v4422_v33, %s5323_s5  ;;  %v438_v40 = vsel %vm106_vm0, %v437_v38, %v5622_v25  ;;  %v506_v15 = vsel %vm106_vm0, %v505_v46, %v5585_v44  ;;  %v5765_v44 = vsel %vm1050_vm5, %v1057_v60, %v1059_v61  ;;  %v1685_v38 = vrot.slane %v5638_v5, 2 }
 0x134   :  { %v529_v0 = vrot.slane %v516_v57, 4  ;;  %v5714_v4 = vperm.slane %v438_v40, %v5384_v10  ;;  %v532_v17 = vsel %vm106_vm0, %v516_v57, %v531_v45  ;;  %v5758_v43 = vperm.slane %v506_v15, %v5384_v10 }
 0x135   :  { %v5733_v63 = vperm.slane %v532_v17, %v5403_v31  ;;  %v5791_v5 = vpack.i.bf16 %v5765_v44, %v5771_v36  ;;  %v1687_v60 = vrot.slane %v5632_v6, 2  ;;  %v1675_v61 = vrot.slane %v5624_v3, 2 }
 0x136   :  { %v530_v62 = vsel %vm106_vm0, %v529_v0, %v504_v42  ;;  %v463_v1 = vrot.slane %v5714_v4, 4  ;;  %v1149_v42 = vrot.slane %v5765_v44, 4  ;;  %v1677_v45 = vrot.slane %v5634_v2, 2 }
 0x137   :  { %v5736_v11 = vperm.slane %v530_v62, %v5403_v31  ;;  %v1093_v25 = vrot.slane %v5771_v36, 4  ;;  %v1684_v0 = vrot.slane %v5636_v22, 2  ;;  %v1772_v40 = vrot.slane %v5604_v54, 4 }
 0x138   :  { %v373_v51 = vpop.permute.xlu0 %372  ;;  %v5696_v50 = vld [vmem:[#allocation2 + $0x78] sm:$0xff]  ;;  %v5698_v52 = vld [vmem:[#allocation2 + $0x80] sm:$0xff]  ;;  %v464_v29 = vsel %vm106_vm0, %v5718_v7, %v463_v1  ;;  %v1067_v46 = vrot.slane %v5678_v28, 1  ;;  %v1069_v17 = vrot.slane %v422_v49, 1  ;;  %v5803_v62 = vsel %vm1673_vm4, %v1685_v38, %v1687_v60 }
 0x139   :  { %408 = vst.msk [vmem:[#allocation2 + $0x99] sm:$0xff] %vm394_vm3, %v373_v51  ;;  %v5704_v58 = vpack.i.bf16 %v5698_v52, %v5696_v50  ;;  %v5783_v51 = vperm.slane %v464_v29, %v5403_v31  ;;  %v1716_v6 = vrot.slane %v5601_v53, 4  ;;  %v1066_v2 = vrot.slane %v5612_v59, 1 }
 0x13a   :  { %v1689_v1 = vrot.slane %v5612_v59, 2  ;;  %v461_v22 = vrot.slane %v5718_v7, 4  ;;  %v5814_v15 = vsel %vm1673_vm4, %v1674_v41, %v1675_v61  ;;  %v5817_v29 = vsel %vm1673_vm4, %v1675_v61, %v1677_v45 }
 0x13b   :  { %4453 = vrot.lane.b32.xlu2 %v5704_v58, %s5323_s5  ;;  %4443 = vrot.lane.b32.xlu0 %v4422_v33, %s5322_s30  ;;  %v1758_v59 = vrot.slane %v5803_v62, 4  ;;  %v5828_v7 = vsel %vm1050_vm5, %v1066_v2, %v1067_v46  ;;  %v1692_v41 = vrot.slane %v422_v49, 2  ;;  %v1704_v61 = vrot.slane %v5814_v15, 4 }
 0x13c   :  { %4433 = vrot.lane.b32.xlu1 %v5592_v47, %s5322_s30  ;;  %v494_v47 = vsel %vm106_vm0, %v493_v8, %v5624_v3  ;;  %v1137_v3 = vrot.slane %v5665_v19, 4  ;;  %v545_v45 = vrot.slane %v5736_v11, 4  ;;  %v1082_v2 = vsel %vm106_vm0, %v5652_v12, %v1081_v13 }
 0x13d   :  { %v5743_v14 = vperm.slane %v494_v47, %v5384_v10  ;;  %v4497_v47 = vpack.i.bf16 %v5665_v19, %v5662_v18  ;;  %v5831_v18 = vsel %vm1050_vm5, %v1067_v46, %v1069_v17  ;;  %v489_v19 = vrot.slane %v5729_v32, 4 }
 0x13e   :  { %v1759_v46 = vsel %vm106_vm0, %v1758_v59, %v5817_v29  ;;  %v517_v59 = vrot.slane %v5758_v43, 4  ;;  %v1090_v26 = vperm.slane %v1082_v2, %v5384_v10  ;;  %v1138_v13 = vsel %vm106_vm0, %v5655_v56, %v1137_v3 }
 0x13f   :  { %v519_v34 = vrot.slane %v5743_v14, 4  ;;  %v5852_v49 = vsel %vm106_vm0, 0.0, %v489_v19 }
 0x140   :  { %v5762_v33 = vld [vmem:[#allocation2 + $0x98] sm:$0xff] }
 0x141   :  { %v4472_v35 = vpack.i.bf16 %v5762_v33, %v5760_v30  ;;  %v520_v39 = vsel %vm106_vm0, %v5758_v43, %v519_v34  ;;  %v5821_v34 = vpack.i.bf16 %v5655_v56, %v5652_v12 }
 0x142   :  { %v5786_v57 = vperm.slane %v520_v39, %v5403_v31  ;;  %v1760_v39 = vrot.slane %v5817_v29, 4 }
 0x143   :  { %4473 = vrot.lane.b32.xlu2 %v4472_v35, %s5322_s30  ;;  %4458 = vrot.lane.b32.xlu0 %v4472_v35, %s5323_s5  ;;  %v5824_v35 = vsel %vm1673_vm4, %v1684_v0, %v1685_v38  ;;  %v1690_v38 = vrot.slane %v5678_v28, 2  ;;  %v1094_v0 = vsel %vm106_vm0, %v5828_v7, %v1093_v25  ;;  %v487_v28 = vrot.slane %v5783_v51, 4 }
 0x144   :  { %4448 = vrot.lane.b32.xlu1 %v4447_v27, %s5323_s5  ;;  %v1702_v60 = vrot.slane %v5824_v35, 4  ;;  %v543_v17 = vrot.slane %v5786_v57, 4  ;;  %v1102_v12 = vperm.slane %v1094_v0, %v5384_v10  ;;  %v5892_v0 = vperm.slane %v1759_v46, %v5384_v10 }
 0x145   :  { %v5861_v25 = vsel %vm1673_vm4, %v1689_v1, %v1690_v38  ;;  %v5870_v8 = vsel %vm106_vm0, 0.0, %v487_v28  ;;  %v1117_v28 = vrot.slane %v1090_v26, 4 }
 0x146   :  { %v1115_v2 = vrot.slane %v1102_v12, 4  ;;  %9375 = vst [vmem:[#allocation11_spill] sm:$0xff] %v5892_v0  ;;  %v1714_v56 = vrot.slane %v5861_v25, 4 }
 0x14b   :  { %4488 = vrot.lane.b32.xlu2 %v5821_v34, %s5323_s5  ;;  %4463 = vrot.lane.b32.xlu0 %v4447_v27, %s5322_s30  ;;  %v1150_v27 = vsel %vm106_vm0, %v5831_v18, %v1149_v42  ;;  %v5864_v42 = vsel %vm1673_vm4, %v1690_v38, %v1692_v41  ;;  %v5884_v38 = vsel %vm106_vm0, %v461_v22, %v5714_v4 }
 0x14c   :  { %4468 = vrot.lane.b32.xlu1 %v5704_v58, %s5322_s30  ;;  %v5855_v58 = vsel %vm106_vm0, 0.0, %v545_v45  ;;  %v5873_v45 = vsel %vm106_vm0, 0.0, %v543_v17  ;;  %v1158_v43 = vperm.slane %v1150_v27, %v5384_v10  ;;  %v1703_v41 = vsel %vm106_vm0, %v1702_v60, %v5814_v15 }
 0x14d   :  { %v1146_v17 = vperm.slane %v1138_v13, %v5384_v10  ;;  %v5897_v4 = vsel %vm106_vm0, %v517_v59, %v5743_v14  ;;  %v1770_v22 = vrot.slane %v5864_v42, 4  ;;  %v1118_v60 = vsel %vm106_vm0, %v1102_v12, %v1117_v28 }
 0x14e   :  { %v1171_v3 = vrot.slane %v1158_v43, 4  ;;  %v5905_v46 = vperm.slane %v1703_v41, %v5384_v10  ;;  %v5908_v13 = vperm.slane %v1118_v60, %v5403_v31  ;;  %v4512_v59 = vpack.i.bf16 %v5831_v18, %v5828_v7 }
 0x14f   :  { %v1173_v27 = vrot.slane %v1146_v17, 4  ;;  %v1091_v41 = vrot.slane %v5828_v7, 4  ;;  %v1715_v28 = vsel %vm106_vm0, %v1714_v56, %v5601_v53  ;;  %v1761_v53 = vsel %vm106_vm0, %v5803_v62, %v1760_v39 }
 0x150   :  { %9376 = vst [vmem:[#allocation12_spill] sm:$0xff] %v5905_v46  ;;  %v1172_v14 = vsel %vm106_vm0, %v1171_v3, %v1146_v17  ;;  %v1717_v17 = vsel %vm106_vm0, %v5861_v25, %v1716_v6  ;;  %v1773_v6 = vsel %vm106_vm0, %v5864_v42, %v1772_v40  ;;  %v5955_v60 = vperm.slane %v1715_v28, %v5384_v10 }
 0x151   :  { %v1174_v1 = vsel %vm106_vm0, %v1158_v43, %v1173_v27  ;;  %v5918_v12 = vperm.slane %v1172_v14, %v5403_v31  ;;  %v1771_v43 = vsel %vm106_vm0, %v1770_v22, %v5604_v54  ;;  %v5952_v22 = vperm.slane %v1773_v6, %v5384_v10 }
 0x152   :  { %v1728_v27 = vrot.slane %v5905_v46, 4  ;;  %v5961_v39 = vperm.slane %v1771_v43, %v5384_v10  ;;  %v1784_v54 = vrot.slane %v5892_v0, 4  ;;  %v491_v40 = vrot.slane %v5725_v9, 4 }
 0x153   :  { %4498 = vrot.lane.b32.xlu2 %v4497_v47, %s5322_s30  ;;  %4478 = vrot.lane.b32.xlu0 %v4497_v47, %s5323_s5  ;;  %v1116_v47 = vsel %vm106_vm0, %v1115_v2, %v1090_v26  ;;  %v1705_v26 = vsel %vm106_vm0, %v5824_v35, %v1704_v61  ;;  %v5926_v2 = vperm.slane %v1174_v1, %v5403_v31  ;;  %v2440_v7 = vrot.slane %v5575_v48, 4 }
 0x154   :  { %4483 = vrot.lane.b32.xlu1 %v5791_v5, %s5323_s5  ;;  %v5911_v19 = vperm.slane %v1116_v47, %v5403_v31  ;;  %v5937_v61 = vperm.slane %v1717_v17, %v5384_v10  ;;  %v5942_v1 = vperm.slane %v1705_v26, %v5384_v10  ;;  %v547_v47 = vrot.slane %v5733_v63, 4 }
 0x155   :  { %v5971_v26 = vperm.slane %v1761_v53, %v5384_v10  ;;  %v1729_v28 = vsel %vm106_vm0, %v5955_v60, %v1728_v27  ;;  %v5978_v17 = vperm.slane %v5675_v23, %v5384_v10  ;;  %v1785_v6 = vsel %vm106_vm0, %v5961_v39, %v1784_v54 }
 0x156   :  { %v1738_v56 = vrot.slane %v5937_v61, 4  ;;  %v5994_v27 = vsel %vm106_vm0, 0.0, %v491_v40  ;;  %v5997_v23 = vsel %vm106_vm0, 0.0, %v547_v47  ;;  %v1092_v40 = vsel %vm106_vm0, %v1091_v41, %v5771_v36 }
 0x157   :  { %9377 = vst [vmem:[#allocation13_spill] sm:$0xff] %v5994_v27  ;;  %v4517_v47 = vpack.i.bf16 %v5817_v29, %v5814_v15  ;;  %v4527_v54 = vpack.i.bf16 %v5803_v62, %v5824_v35  ;;  %v1796_v0 = vrot.slane %v5971_v26, 4 }
 0x158   :  { %v1739_v14 = vsel %vm106_vm0, %v1738_v56, %v5942_v1  ;;  %v5991_v56 = vperm.slane %v1785_v6, %v5403_v31  ;;  %9378 = vst [vmem:[#allocation14_spill] sm:$0xff] %v5997_v23 }
 0x159   :  { %v5981_v43 = vperm.slane %v1739_v14, %v5403_v31  ;;  %v1147_v14 = vrot.slane %v5831_v18, 4 }
 0x15b   :  { %4513 = vrot.lane.b32.xlu2 %v4512_v59, %s5322_s30  ;;  %4493 = vrot.lane.b32.xlu0 %v4512_v59, %s5323_s5  ;;  %v1794_v59 = vrot.slane %v5952_v22, 4  ;;  %v1148_v36 = vsel %vm106_vm0, %v1147_v14, %v5765_v44  ;;  %v4532_v14 = vpack.i.bf16 %v5864_v42, %v5861_v25  ;;  %v2386_v25 = vrot.slane %v5696_v50, 4 }
 0x15c   :  { %4508 = vrot.lane.b32.xlu1 %v5821_v34, %s5322_s30  ;;  %v5984_v34 = vperm.slane %v1729_v28, %v5403_v31  ;;  %v6032_v29 = vperm.slane %v1148_v36, %v5384_v10  ;;  %v2442_v42 = vrot.slane %v5698_v52, 4 }
 0x15d   :  { %v1795_v53 = vsel %vm106_vm0, %v1794_v59, %v5971_v26  ;;  %v6007_v59 = vperm.slane %v5671_v21, %v5384_v10  ;;  %v1105_v21 = vrot.slane %v5978_v17, 4  ;;  %v2387_v3 = vsel %vm106_vm0, %v5573_v37, %v2386_v25 }
 0x15e   :  { %v6001_v28 = vperm.slane %v1795_v53, %v5403_v31  ;;  %v6018_v53 = vperm.slane %v1092_v40, %v5384_v10  ;;  %v2374_v40 = vrot.slane %v5747_v16, 4  ;;  %v2443_v24 = vsel %vm106_vm0, %v5575_v48, %v2442_v42 }
 0x15f   :  { %v1161_v62 = vrot.slane %v6007_v59, 4  ;;  %v2451_v25 = vperm.slane %v2443_v24, %v5384_v10  ;;  %v1159_v23 = vrot.slane %v6032_v29, 4  ;;  %v9384_v26 = vpack.i.bf16 %v5736_v11, %v5729_v32 }
 0x160   :  { %v1106_v15 = vsel %vm106_vm0, %v6018_v53, %v1105_v21  ;;  %v1103_v27 = vrot.slane %v6018_v53, 4 }
 0x161   :  { %v6036_v35 = vperm.slane %v1106_v15, %v5403_v31  ;;  %v1162_v41 = vsel %vm106_vm0, %v6032_v29, %v1161_v62  ;;  %v2428_v15 = vrot.slane %v5762_v33, 4  ;;  %v2430_v62 = vrot.slane %v5749_v20, 4 }
 0x163   :  { %4518 = vrot.lane.b32.xlu2 %v4517_v47, %s5323_s5  ;;  %4503 = vrot.lane.b32.xlu0 %v5791_v5, %s5322_s30  ;;  %9379 = vst [vmem:[#allocation15_spill] sm:$0xff] %v6036_v35  ;;  %v6041_v5 = vperm.slane %v1162_v41, %v5403_v31  ;;  %v1129_v44 = vrot.slane %v6036_v35, 4  ;;  %v2431_v18 = vsel %vm106_vm0, %v5762_v33, %v2430_v62  ;;  %v2372_v62 = vrot.slane %v5760_v30, 4 }
 0x164   :  { %4528 = vrot.lane.b32.xlu1 %v4527_v54, %s5323_s5  ;;  %v2429_v6 = vsel %vm106_vm0, %v2428_v15, %v5749_v20 }
 0x165   :  { %9380 = vst [vmem:[#allocation16_spill] sm:$0xff] %v6041_v5  ;;  %v6049_v21 = vsel %vm106_vm0, 0.0, %v1129_v44  ;;  %v1185_v36 = vrot.slane %v6041_v5, 4  ;;  %v2439_v44 = vperm.slane %v2431_v18, %v5384_v10  ;;  %v2395_v18 = vperm.slane %v2387_v3, %v5384_v10 }
 0x166   :  { %9381 = vst [vmem:[#allocation17_spill] sm:$0xff] %v6049_v21  ;;  %v2435_v21 = vperm.slane %v2429_v6, %v5384_v10  ;;  %v2373_v42 = vsel %vm106_vm0, %v2372_v62, %v5747_v16 }
 0x167   :  { %v6058_v41 = vsel %vm106_vm0, 0.0, %v1185_v36  ;;  %v2375_v36 = vsel %vm106_vm0, %v5760_v30, %v2374_v40  ;;  %v2466_v6 = vrot.slane %v2439_v44, 4  ;;  %v2408_v5 = vrot.slane %v2395_v18, 4 }
 0x168   :  { %9382 = vst [vmem:[#allocation18_spill] sm:$0xff] %v6058_v41  ;;  %v2383_v15 = vperm.slane %v2375_v36, %v5384_v10  ;;  %v2441_v41 = vsel %vm106_vm0, %v2440_v7, %v5698_v52  ;;  %v2454_v7 = vrot.slane %v2435_v21, 4 }
 0x169   :  { %v2467_v24 = vsel %vm106_vm0, %v2451_v25, %v2466_v6 }
 0x16a   :  { %v2410_v35 = vrot.slane %v2383_v15, 4  ;;  %v6132_v32 = vperm.slane %v2467_v24, %v5403_v31 }
 0x16b   :  { %4533 = vrot.lane.b32.xlu2 %v4532_v14, %s5323_s5  ;;  %4523 = vrot.lane.b32.xlu0 %v5609_v55, %s5323_s5 }
 0x16c   :  { %4538 = vrot.lane.b32.xlu1 %v4517_v47, %s5322_s30  ;;  %v2384_v47 = vrot.slane %v5573_v37, 4  ;;  %v2411_v3 = vsel %vm106_vm0, %v2395_v18, %v2410_v35  ;;  %v1797_v35 = vsel %vm106_vm0, %v5952_v22, %v1796_v0  ;;  %v9385_v0 = vpack.i.bf16 %v5786_v57, %v5783_v51 }
 0x16e   :  { %v2385_v40 = vsel %vm106_vm0, %v2384_v47, %v5696_v50  ;;  %v2447_v47 = vperm.slane %v2441_v41, %v5384_v10 }
 0x16f   :  { %v2391_v36 = vperm.slane %v2385_v40, %v5384_v10 }
 0x170   :  { %v2452_v40 = vrot.slane %v2447_v47, 4  ;;  %v2455_v41 = vsel %vm106_vm0, %v2447_v47, %v2454_v7 }
 0x171   :  { %v2396_v46 = vrot.slane %v2391_v36, 4  ;;  %v6143_v51 = vperm.slane %v2455_v41, %v5403_v31  ;;  %v6188_v24 = vpop.permute.xlu2 %4413  ;;  %v1189_v41 = vrot.slane %v5926_v2, 4 }
 0x172   :  { %v2453_v53 = vsel %vm106_vm0, %v2452_v40, %v2435_v21 }
 0x173   :  { %4543 = vrot.lane.b32.xlu2 %v5609_v55, %s5322_s30  ;;  %4548 = vrot.lane.b32.xlu0 %v4527_v54, %s5322_s30  ;;  %v2464_v55 = vrot.slane %v2451_v25, 4  ;;  %v2379_v54 = vperm.slane %v2373_v42, %v5384_v10  ;;  %v6146_v57 = vperm.slane %v2453_v53, %v5403_v31  ;;  %v6150_v25 = vsel %vm106_vm0, %v1103_v27, %v5978_v17  ;;  %v428_v53 = vld [vmem:[#allocation2 + $0x88] sm:$0x3] }
 0x174   :  { %4553 = vrot.lane.b32.xlu1 %v4532_v14, %s5322_s30  ;;  %v1740_v14 = vrot.slane %v5942_v1, 4  ;;  %v9383_v1 = vpack.i.bf16 %v5733_v63, %v5725_v9  ;;  %v6129_v9 = vperm.slane %v2411_v3, %v5403_v31  ;;  %v2409_v63 = vsel %vm106_vm0, %v2408_v5, %v2383_v15 }
 0x175   :  { %v2465_v62 = vsel %vm106_vm0, %v2464_v55, %v2439_v44  ;;  %v2398_v44 = vrot.slane %v2379_v54, 4  ;;  %v2397_v21 = vsel %vm106_vm0, %v2396_v46, %v2379_v54  ;;  %9386 = vst [vmem:[#allocation19_spill] sm:$0xff] %v6146_v57  ;;  %v6154_v5 = vsel %vm106_vm0, %v1159_v23, %v6007_v59 }
 0x176   :  { %v1741_v42 = vsel %vm106_vm0, %v5937_v61, %v1740_v14  ;;  %v6122_v61 = vperm.slane %v1797_v35, %v5403_v31  ;;  %v6136_v11 = vperm.slane %v2465_v62, %v5403_v31  ;;  %v6157_v15 = vperm.slane %v2409_v63, %v5403_v31  ;;  %v431_v62 = vld [vmem:[#allocation2 + $0xa0] sm:$0x3] }
 0x177   :  { %v6119_v29 = vperm.slane %v1741_v42, %v5403_v31  ;;  %v2399_v22 = vsel %vm106_vm0, %v2391_v36, %v2398_v44  ;;  %v4582_v46 = vpack.i.bf16 %v6132_v32, %v6129_v9  ;;  %v6165_v36 = vperm.slane %v2397_v21, %v5403_v31  ;;  %v434_v21 = vld [vmem:[#allocation2 + $0xb8] sm:$0x3] }
 0x178   :  { %v6162_v6 = vperm.slane %v2399_v22, %v5403_v31  ;;  %v4577_v17 = vpack.i.bf16 %v6136_v11, %v6157_v15  ;;  %v6171_v27 = vperm.slane %v5884_v38, %v5403_v31  ;;  %v1812_v59 = vrot.slane %v6122_v61, 4 }
 0x179   :  { %9387 = vst [vmem:[#allocation20_spill] sm:$0xff] %v6165_v36  ;;  %v1756_v23 = vrot.slane %v6119_v29, 4  ;;  %v2476_v7 = vrot.slane %v6146_v57, 4  ;;  %v6180_v55 = vperm.slane %v5897_v4, %v5403_v31  ;;  %v1133_v38 = vrot.slane %v5908_v13, 4 }
 0x17a   :  { %9388 = vst [vmem:[#allocation21_spill] sm:$0xff] %v6171_v27  ;;  %v4572_v47 = vpack.i.bf16 %v6143_v51, %v6162_v6  ;;  %v2994_v54 = vrot.slane %v5575_v48, 1  ;;  %v2420_v3 = vrot.slane %v6165_v36, 4  ;;  %v485_v14 = vrot.slane %v6171_v27, 4 }
 0x17b   :  { %4568 = vrot.lane.b32.xlu2 %v9383_v1, %s5315_s25  ;;  %4563 = vrot.lane.b32.xlu0 %v9384_v26, %s5314_s1  ;;  %9389 = vst [vmem:[#allocation22_spill] sm:$0xff] %v6180_v55  ;;  %v6192_v4 = vsel %vm106_vm0, 0.0, %v1756_v23  ;;  %v6195_v40 = vsel %vm106_vm0, 0.0, %v1812_v59  ;;  %v2993_v42 = vrot.slane %v5573_v37, 1  ;;  %v2979_v48 = vrot.slane %v5749_v20, 1 }
 0x17c   :  { %4558 = vrot.lane.b32.xlu1 %v9385_v0, %s5316_s26  ;;  %v2477_v35 = vsel %vm106_vm0, 0.0, %v2476_v7  ;;  %v541_v1 = vrot.slane %v6180_v55, 4  ;;  %v2988_v26 = vrot.slane %v5760_v30, 1  ;;  %v2978_v44 = vrot.slane %v5747_v16, 1  ;;  %v425_v7 = vld [vmem:[#allocation2 + $0x70] sm:$0x3] }
 0x17d   :  { %v6207_v63 = vsel %vm106_vm0, 0.0, %v1133_v38  ;;  %v2984_v22 = vrot.slane %v5698_v52, 1  ;;  %v2989_v37 = vrot.slane %v5762_v33, 1  ;;  %v2421_v20 = vsel %vm106_vm0, 0.0, %v2420_v3  ;;  %v9407_v0 = vld [vmem:[#allocation12_spill] sm:$0xff] }
 0x17e   :  { %v4587_v30 = vpack.i.bf16 %v2477_v35, %v2421_v20  ;;  %v486_v16 = vsel %vm106_vm0, 0.0, %v485_v14  ;;  %v6215_v23 = vsel %vm106_vm0, 0.0, %v1189_v41  ;;  %v542_v59 = vsel %vm106_vm0, 0.0, %v541_v1 }
 0x17f   :  { %v1131_v33 = vrot.slane %v5911_v19, 4  ;;  %v2996_v38 = vrot.slane %v434_v21, 1  ;;  %v1187_v3 = vrot.slane %v5918_v12, 4  ;;  %v1754_v14 = vrot.slane %v5981_v43, 4 }
 0x180   :  { %v9391_v41 = vpack.i.bf16 %v5855_v58, %v5852_v49  ;;  %v6234_v35 = vsel %vm1050_vm5, %v2988_v26, %v2989_v37  ;;  %v6246_v20 = vsel %vm1050_vm5, %v2993_v42, %v2994_v54  ;;  %v2981_v26 = vrot.slane %v425_v7, 1 }
 0x181   :  { %9392 = vst [vmem:[#allocation23_spill] sm:$0xff] %v6234_v35  ;;  %v6249_v21 = vsel %vm1050_vm5, %v2994_v54, %v2996_v38  ;;  %v6252_v49 = vsel %vm106_vm0, 0.0, %v1187_v3  ;;  %v6255_v58 = vsel %vm106_vm0, 0.0, %v1754_v14  ;;  %v3006_v54 = vrot.slane %v6234_v35, 4 }
 0x182   :  { %9394 = vst [vmem:[#allocation25_spill] sm:$0xff] %v6246_v20  ;;  %v3018_v7 = vrot.slane %v6246_v20, 4  ;;  %v1808_v3 = vrot.slane %v5991_v56, 4  ;;  %v4592_v14 = vpack.i.bf16 %v542_v59, %v486_v16  ;;  %v9401_v59 = vpack.i.bf16 %v5926_v2, %v5908_v13 }
 0x183   :  { %4583 = vrot.lane.b32.xlu2 %v4582_v46, %s5315_s25  ;;  %4578 = vrot.lane.b32.xlu0 %v4577_v17, %s5314_s1  ;;  %v2991_v46 = vrot.slane %v431_v62, 1  ;;  %v2983_v17 = vrot.slane %v5696_v50, 1  ;;  %v9390_v50 = vpack.i.bf16 %v5873_v45, %v5870_v8  ;;  %v1810_v62 = vrot.slane %v6001_v28, 4  ;;  %9395 = vst [vmem:[#allocation26_spill] sm:$0xff] %v6249_v21 }
 0x184   :  { %4573 = vrot.lane.b32.xlu1 %v4572_v47, %s5316_s26  ;;  %v2986_v47 = vrot.slane %v428_v53, 1  ;;  %v6240_v8 = vsel %vm106_vm0, 0.0, %v1131_v33  ;;  %v1752_v45 = vrot.slane %v5984_v34, 4  ;;  %v2424_v13 = vrot.slane %v6157_v15, 4 }
 0x185   :  { %v6237_v1 = vsel %vm1050_vm5, %v2989_v37, %v2991_v46  ;;  %v6243_v53 = vpop.permute.xlu2 %4438  ;;  %v6258_v37 = vsel %vm1050_vm5, %v2983_v17, %v2984_v22  ;;  %v3074_v17 = vrot.slane %v6249_v21, 4 }
 0x186   :  { %9393 = vst [vmem:[#allocation24_spill] sm:$0xff] %v6237_v1  ;;  %v6266_v42 = vsel %vm1050_vm5, %v2984_v22, %v2986_v47  ;;  %v3062_v33 = vrot.slane %v6237_v1, 4  ;;  %v6275_v38 = vsel %vm106_vm0, 0.0, %v1752_v45  ;;  %v6279_v22 = vsel %vm1050_vm5, %v2978_v44, %v2979_v48 }
 0x187   :  { %9396 = vst [vmem:[#allocation27_spill] sm:$0xff] %v6258_v37  ;;  %v6282_v47 = vsel %vm1050_vm5, %v2979_v48, %v2981_v26  ;;  %v9400_v45 = vpack.i.bf16 %v5918_v12, %v5911_v19  ;;  %v3007_v48 = vsel %vm106_vm0, %v3006_v54, %v6279_v22  ;;  %v6306_v26 = vpop.permute.xlu0 %4403  ;;  %v6312_v54 = vpop.permute.xlu1 %4398  ;;  %v9427_v20 = vunpack.i.l.bf16 %v6243_v53 }
 0x188   :  { %9397 = vst [vmem:[#allocation28_spill] sm:$0xff] %v6266_v42  ;;  %v3063_v44 = vsel %vm106_vm0, %v3062_v33, %v6282_v47  ;;  %v3013_v33 = vperm.slane %v3007_v48, %v5384_v10  ;;  %v9402_v48 = vpack.i.bf16 %v5991_v56, %v5984_v34  ;;  %v9408_v56 = vld [vmem:[#allocation11_spill] sm:$0xff] }
 0x189   :  { %9398 = vst [vmem:[#allocation29_spill] sm:$0xff] %v6279_v22 }
 0x18a   :  { %9399 = vst [vmem:[#allocation30_spill] sm:$0xff] %v6282_v47  ;;  %v3032_v16 = vrot.slane %v3013_v33, 4  ;;  %v2426_v47 = vrot.slane %v6129_v9, 4 }
 0x18b   :  { %4588 = vrot.lane.b32.xlu0 %v4587_v30, %s5317_s29  ;;  %4598 = vrot.lane.b32.xlu2 %v9390_v50, %s5313_s24  ;;  %v6263_v30 = vsel %vm106_vm0, 0.0, %v1810_v62  ;;  %v3019_v62 = vsel %vm106_vm0, %v3018_v7, %v6258_v37  ;;  %v6289_v50 = vsel %vm106_vm0, 0.0, %v1808_v3  ;;  %v1726_v3 = vrot.slane %v5955_v60, 4  ;;  %v9404_v60 = vld [vmem:[#allocation13_spill] sm:$0xff] }
 0x18c   :  { %4603 = vrot.lane.b32.xlu1 %v9391_v41, %s5311_s22  ;;  %v3075_v41 = vsel %vm106_vm0, %v3074_v17, %v6266_v42  ;;  %v3025_v12 = vperm.slane %v3019_v62, %v5384_v10  ;;  %v3069_v17 = vperm.slane %v3063_v44, %v5384_v10  ;;  %v2478_v62 = vrot.slane %v6143_v51, 4  ;;  %v9403_v44 = vld [vmem:[#allocation14_spill] sm:$0xff] }
 0x18d   :  { %v3081_v7 = vperm.slane %v3075_v41, %v5384_v10  ;;  %v9405_v46 = vpack.i.bf16 %v9403_v44, %v9404_v60  ;;  %v9406_v51 = vpack.i.bf16 %v6001_v28, %v5981_v43  ;;  %v1727_v34 = vsel %vm106_vm0, %v1726_v3, %v9407_v0 }
 0x18e   :  { %v3030_v2 = vrot.slane %v3025_v12, 4  ;;  %v3088_v41 = vrot.slane %v3069_v17, 4  ;;  %v6341_v44 = vsel %vm106_vm0, %v3025_v12, %v3032_v16  ;;  %v2479_v0 = vsel %vm106_vm0, 0.0, %v2478_v62 }
 0x18f   :  { %9409 = vst [vmem:[#allocation14_spill] sm:$0xff] %v6341_v44  ;;  %v9221_v12 = vunpack.i.h.bf16 %v6188_v24  ;;  %v6377_v62 = vperm.slane %v6154_v5, %v5403_v31  ;;  %v4401_v60 = vunpack.i.h.bf16 %v6312_v54  ;;  %v9417_v5 = vld [vmem:[#allocation16_spill] sm:$0xff] }
 0x190   :  { %v3031_v15 = vsel %vm106_vm0, %v3030_v2, %v3013_v33  ;;  %v9220_v2 = vunpack.i.l.bf16 %v6188_v24 }
 0x191   :  { %v6356_v3 = vperm.slane %v3031_v15, %v5403_v31  ;;  %9416 = vst [vmem:[#allocation34_spill] sm:$0xff] %v6377_v62 }
 0x193   :  { %4618 = vrot.lane.b32.xlu2 %v9400_v45, %s5314_s1  ;;  %4593 = vrot.lane.b32.xlu0 %v4592_v14, %s5317_s29  ;;  %v1782_v14 = vrot.slane %v5961_v39, 4  ;;  %v3086_v45 = vrot.slane %v3081_v7, 4  ;;  %v2422_v39 = vrot.slane %v6162_v6, 4  ;;  %v6344_v6 = vsel %vm106_vm0, %v3081_v7, %v3088_v41  ;;  %9411 = vst [vmem:[#allocation12_spill] sm:$0xff] %v6356_v3 }
 0x194   :  { %4623 = vrot.lane.b32.xlu1 %v9401_v59, %s5315_s25  ;;  %v2480_v59 = vrot.slane %v6136_v11, 4  ;;  %9410 = vst [vmem:[#allocation13_spill] sm:$0xff] %v6344_v6  ;;  %v9225_v41 = vunpack.i.l.bf16 %v6306_v26 }
 0x195   :  { %v6308_v19 = vpop.permute.xlu2 %4453  ;;  %v3087_v11 = vsel %vm106_vm0, %v3086_v45, %v3069_v17  ;;  %v2425_v17 = vsel %vm106_vm0, 0.0, %v2424_v13  ;;  %v6351_v43 = vpop.permute.xlu1 %4408  ;;  %v2423_v7 = vsel %vm106_vm0, 0.0, %v2422_v39  ;;  %v9222_v45 = vunpack.i.h.bf16 %v6306_v26 }
 0x196   :  { %v2481_v28 = vsel %vm106_vm0, 0.0, %v2480_v59  ;;  %v6359_v16 = vperm.slane %v3087_v11, %v5403_v31  ;;  %v6373_v59 = vperm.slane %v6150_v25, %v5403_v31  ;;  %v4400_v39 = vunpack.i.l.bf16 %v6312_v54 }
 0x197   :  { %v4642_v15 = vpack.i.bf16 %v2479_v0, %v2423_v7  ;;  %v4647_v11 = vpack.i.bf16 %v2481_v28, %v2425_v17  ;;  %v6386_v25 = vrot.slane %v9221_v12, 4  ;;  %v6397_v17 = vrot.slane %v9220_v2, 4 }
 0x198   :  { %9412 = vst [vmem:[#allocation11_spill] sm:$0xff] %v6359_v16  ;;  %v6401_v28 = vrot.slane %v9222_v45, 4  ;;  %v1127_v0 = vrot.slane %v6373_v59, 4  ;;  %v1183_v7 = vrot.slane %v6377_v62, 4  ;;  %v2482_v12 = vrot.slane %v6132_v32, 4 }
 0x199   :  { %9415 = vst [vmem:[#allocation33_spill] sm:$0xff] %v6373_v59  ;;  %v4456_v45 = vunpack.i.h.bf16 %v6308_v19 }
 0x19a   :  { %v1184_v1 = vsel %vm106_vm0, 0.0, %v1183_v7  ;;  %v2483_v6 = vsel %vm106_vm0, 0.0, %v2482_v12 }
 0x19b   :  { %4628 = vrot.lane.b32.xlu2 %v9402_v48, %s5316_s26  ;;  %4608 = vrot.lane.b32.xlu0 %v9405_v46, %s5312_s23  ;;  %v1783_v48 = vsel %vm106_vm0, %v1782_v14, %v9408_v56  ;;  %v6364_v14 = vperm.slane %v1727_v34, %v5403_v31  ;;  %v3110_v34 = vrot.slane %v6359_v16, 4  ;;  %v9418_v56 = vld [vmem:[#allocation15_spill] sm:$0xff] }
 0x19c   :  { %4633 = vrot.lane.b32.xlu1 %v9406_v51, %s5314_s1  ;;  %v6367_v13 = vperm.slane %v1783_v48, %v5403_v31  ;;  %v3054_v51 = vrot.slane %v6356_v3, 4  ;;  %v9419_v48 = vpack.i.bf16 %v9417_v5, %v9418_v56  ;;  %v2654_v5 = vrot.slane %v4401_v60, 4 }
 0x19d   :  { %v6346_v46 = vpop.permute.xlu0 %4418  ;;  %v6348_v33 = vpop.permute.xlu2 %4473  ;;  %9413 = vst [vmem:[#allocation31_spill] sm:$0xff] %v6364_v14  ;;  %v1750_v52 = vrot.slane %v6364_v14, 4  ;;  %v2598_v56 = vrot.slane %v4400_v39, 4  ;;  %v3111_v3 = vsel %vm106_vm0, 0.0, %v3110_v34  ;;  %v4410_v34 = vunpack.i.l.bf16 %v6351_v43 }
 0x19e   :  { %9414 = vst [vmem:[#allocation32_spill] sm:$0xff] %v6367_v13  ;;  %v1806_v54 = vrot.slane %v6367_v13, 4  ;;  %v3055_v16 = vsel %vm106_vm0, 0.0, %v3054_v51  ;;  %v4411_v51 = vunpack.i.h.bf16 %v6351_v43  ;;  %v4421_v32 = vunpack.i.h.bf16 %v6346_v46 }
 0x19f   :  { %v1751_v27 = vsel %vm106_vm0, 0.0, %v1750_v52  ;;  %v4657_v21 = vpack.i.bf16 %v3111_v3, %v3055_v16  ;;  %v2655_v52 = vsel %vm106_vm0, %v2654_v5, %v4456_v45  ;;  %v2427_v3 = vsel %vm106_vm0, 0.0, %v2426_v47  ;;  %v9423_v5 = vld [vmem:[#allocation18_spill] sm:$0xff] }
 0x1a0   :  { %v1807_v55 = vsel %vm106_vm0, 0.0, %v1806_v54  ;;  %v2656_v54 = vrot.slane %v4456_v45, 4  ;;  %v9421_v16 = vunpack.i.h.bf16 %v6243_v53  ;;  %v9422_v45 = vunpack.i.l.bf16 %v6243_v53 }
 0x1a1   :  { %v4682_v43 = vpack.i.bf16 %v1807_v55, %v1751_v27  ;;  %v6450_v35 = vperm.slane %v2655_v52, %v5384_v10  ;;  %v660_v27 = vrot.slane %v4410_v34, 4  ;;  %v9448_v57 = vunpack.i.l.bf16 %v6348_v33 }
 0x1a2   :  { %v920_v12 = vrot.slane %v9421_v16, 4  ;;  %v864_v7 = vrot.slane %v9422_v45, 4  ;;  %v9239_v45 = vunpack.i.h.bf16 %v6348_v33 }
 0x1a3   :  { %4643 = vrot.lane.b32.xlu2 %v4642_v15, %s5313_s24  ;;  %4613 = vrot.lane.b32.xlu0 %v9419_v48, %s5316_s26  ;;  %v6408_v15 = vrot.slane %v9225_v41, 4  ;;  %v4420_v41 = vunpack.i.l.bf16 %v6346_v46  ;;  %v9424_v46 = vld [vmem:[#allocation17_spill] sm:$0xff] }
 0x1a4   :  { %4648 = vrot.lane.b32.xlu1 %v4647_v11, %s5311_s22  ;;  %v4455_v11 = vunpack.i.l.bf16 %v6308_v19  ;;  %v1128_v19 = vsel %vm106_vm0, 0.0, %v1127_v0  ;;  %v9420_v0 = vpack.i.bf16 %v6122_v61, %v6119_v29  ;;  %v716_v61 = vrot.slane %v4411_v51, 4 }
 0x1a5   :  { %v6410_v48 = vpop.permute.xlu2 %4488  ;;  %v6412_v2 = vpop.permute.xlu0 %4428  ;;  %v658_v42 = vrot.slane %v4420_v41, 4 }
 0x1a6   :  { %v6417_v18 = vpop.permute.xlu1 %4423  ;;  %v2599_v9 = vsel %vm106_vm0, %v2598_v56, %v4455_v11  ;;  %v2600_v44 = vrot.slane %v4455_v11, 4  ;;  %v9425_v56 = vpack.i.bf16 %v9423_v5, %v9424_v46  ;;  %v4652_v11 = vpack.i.bf16 %v2483_v6, %v2427_v3 }
 0x1a7   :  { %v6453_v29 = vperm.slane %v2599_v9, %v5384_v10  ;;  %v659_v52 = vsel %vm106_vm0, %v658_v42, %v4410_v34  ;;  %v661_v9 = vsel %vm106_vm0, %v4420_v41, %v660_v27  ;;  %v717_v3 = vsel %vm106_vm0, %v4421_v32, %v716_v61 }
 0x1a8   :  { %v2601_v16 = vsel %vm106_vm0, %v4400_v39, %v2600_v44  ;;  %v4426_v5 = vunpack.i.h.bf16 %v6417_v18  ;;  %v4425_v46 = vunpack.i.l.bf16 %v6417_v18  ;;  %v4430_v42 = vunpack.i.l.bf16 %v6412_v2 }
 0x1a9   :  { %v6479_v41 = vperm.slane %v2601_v16, %v5384_v10  ;;  %v6483_v18 = vperm.slane %v661_v9, %v5384_v10  ;;  %v6486_v34 = vperm.slane %v717_v3, %v5384_v10  ;;  %v6489_v61 = vperm.slane %v659_v52, %v5384_v10 }
 0x1aa   :  { %v729_v16 = vsel %vm106_vm0, %v4426_v5, %v6386_v25  ;;  %v673_v9 = vsel %vm106_vm0, %v4425_v46, %v6397_v17  ;;  %v726_v17 = vrot.slane %v4426_v5, 4  ;;  %v9429_v5 = vunpack.i.h.bf16 %v6410_v48 }
 0x1ab   :  { %4658 = vrot.lane.b32.xlu2 %v4657_v21, %s5317_s29  ;;  %4638 = vrot.lane.b32.xlu0 %v9420_v0, %s5315_s25  ;;  %v4662_v21 = vpack.i.bf16 %v1184_v1, %v1128_v19  ;;  %v2657_v0 = vsel %vm106_vm0, %v4401_v60, %v2656_v54  ;;  %v9238_v1 = vunpack.i.l.bf16 %v6348_v33  ;;  %v714_v19 = vrot.slane %v4421_v32, 4 }
 0x1ac   :  { %4668 = vrot.lane.b32.xlu1 %v9425_v56, %s5313_s24  ;;  %v6473_v39 = vperm.slane %v2657_v0, %v5384_v10  ;;  %v4431_v56 = vunpack.i.h.bf16 %v6412_v2  ;;  %v6494_v0 = vrot.slane %v9239_v45, 4 }
 0x1ad   :  { %v6455_v55 = vpop.permute.xlu0 %4443  ;;  %v6457_v47 = vpop.permute.xlu2 %4498  ;;  %v715_v27 = vsel %vm106_vm0, %v714_v19, %v4411_v51  ;;  %v6498_v2 = vrot.slane %v9238_v1, 4  ;;  %v865_v1 = vsel %vm106_vm0, %v864_v7, %v4430_v42 }
 0x1ae   :  { %v6463_v6 = vpop.permute.xlu1 %4433  ;;  %v921_v3 = vsel %vm106_vm0, %v920_v12, %v4431_v56  ;;  %v922_v54 = vrot.slane %v4431_v56, 4  ;;  %v4446_v45 = vunpack.i.h.bf16 %v6455_v55  ;;  %v696_v12 = vrot.slane %v6483_v18, 4 }
 0x1af   :  { %v9241_v60 = vunpack.i.h.bf16 %v6463_v6  ;;  %v9240_v44 = vunpack.i.l.bf16 %v6463_v6  ;;  %v752_v56 = vrot.slane %v6486_v34, 4  ;;  %v6528_v19 = vperm.slane %v921_v3, %v5384_v10 }
 0x1b0   :  { %v6542_v3 = vperm.slane %v715_v27, %v5384_v10 }
 0x1b1   :  { %v934_v52 = vrot.slane %v9241_v60, 4  ;;  %v878_v51 = vrot.slane %v9240_v44, 4  ;;  %v681_v60 = vperm.slane %v673_v9, %v5384_v10  ;;  %v670_v9 = vrot.slane %v4425_v46, 4 }
 0x1b2   :  { %9428 = vst [vmem:[#allocation16_spill] sm:$0xff] %v6542_v3 }
 0x1b3   :  { %4663 = vrot.lane.b32.xlu2 %v4662_v21, %s5317_s29  ;;  %v866_v21 = vrot.slane %v4430_v42, 4  ;;  %4653 = vrot.lane.b32.xlu0 %v4652_v11, %s5312_s23  ;;  %v737_v11 = vperm.slane %v729_v16, %v5384_v10  ;;  %v935_v7 = vsel %vm106_vm0, %v4446_v45, %v934_v52  ;;  %v6539_v16 = vperm.slane %v865_v1, %v5384_v10 }
 0x1b4   :  { %4683 = vrot.lane.b32.xlu1 %v4682_v43, %s5317_s29  ;;  %v4445_v43 = vunpack.i.l.bf16 %v6455_v55  ;;  %v9426_v55 = vunpack.i.h.bf16 %v6243_v53  ;;  %v6546_v52 = vrot.slane %v9429_v5, 4  ;;  %v6553_v53 = vperm.slane %v935_v7, %v5384_v10 }
 0x1b5   :  { %v6513_v25 = vpop.permute.xlu0 %4458  ;;  %v6515_v32 = vpop.permute.xlu2 %4513  ;;  %v867_v37 = vsel %vm106_vm0, %v9427_v20, %v866_v21  ;;  %v9431_v1 = vpack.i.bf16 %v6215_v23, %v6207_v63  ;;  %v697_v46 = vsel %vm106_vm0, %v681_v60, %v696_v12  ;;  %v753_v27 = vsel %vm106_vm0, %v737_v11, %v752_v56 }
 0x1b6   :  { %v6521_v44 = vpop.permute.xlu1 %4448  ;;  %v879_v42 = vsel %vm106_vm0, %v4445_v43, %v878_v51  ;;  %v923_v22 = vsel %vm106_vm0, %v9426_v55, %v922_v54  ;;  %v9430_v51 = vunpack.i.l.bf16 %v6410_v48  ;;  %v932_v54 = vrot.slane %v4446_v45, 4 }
 0x1b7   :  { %v6556_v20 = vperm.slane %v879_v42, %v5384_v10  ;;  %v6565_v21 = vperm.slane %v923_v22, %v5384_v10  ;;  %v6569_v7 = vperm.slane %v867_v37, %v5384_v10  ;;  %v9432_v42 = vunpack.i.h.bf16 %v6188_v24 }
 0x1b8   :  { %v6550_v13 = vrot.slane %v9430_v51, 4  ;;  %v9433_v63 = vpack.i.bf16 %v6195_v40, %v6192_v4  ;;  %v750_v12 = vrot.slane %v737_v11, 4  ;;  %v9434_v22 = vunpack.i.l.bf16 %v6188_v24 }
 0x1b9   :  { %v727_v55 = vsel %vm106_vm0, %v726_v17, %v9432_v42  ;;  %v876_v5 = vrot.slane %v4445_v43, 4  ;;  %v9435_v37 = vpack.i.bf16 %v6252_v49, %v6240_v8  ;;  %v9436_v4 = vunpack.i.h.bf16 %v6463_v6 }
 0x1ba   :  { %v671_v56 = vsel %vm106_vm0, %v670_v9, %v9434_v22  ;;  %v6596_v24 = vperm.slane %v697_v46, %v5403_v31  ;;  %v6599_v43 = vperm.slane %v753_v27, %v5403_v31  ;;  %v4461_v8 = vunpack.i.h.bf16 %v6513_v25 }
 0x1bb   :  { %4678 = vrot.lane.b32.xlu2 %v9431_v1, %s5312_s23  ;;  %4673 = vrot.lane.b32.xlu0 %v9435_v37, %s5311_s22  ;;  %v694_v1 = vrot.slane %v681_v60, 4  ;;  %v933_v40 = vsel %vm106_vm0, %v932_v54, %v9436_v4  ;;  %v4450_v49 = vunpack.i.l.bf16 %v6521_v44  ;;  %v900_v9 = vrot.slane %v6556_v20, 4 }
 0x1bc   :  { %4698 = vrot.lane.b32.xlu1 %v9433_v63, %s5312_s23  ;;  %9437 = vst [vmem:[#allocation15_spill] sm:$0xff] %v6596_v24  ;;  %v956_v60 = vrot.slane %v6553_v53, 4  ;;  %v6606_v42 = vperm.slane %v727_v55, %v5384_v10  ;;  %v6609_v54 = vperm.slane %v671_v56, %v5384_v10  ;;  %v4460_v46 = vunpack.i.l.bf16 %v6513_v25 }
 0x1bd   :  { %v6586_v51 = vpop.permute.xlu0 %4463  ;;  %v6588_v17 = vpop.permute.xlu2 %4518  ;;  %9438 = vst [vmem:[#allocation18_spill] sm:$0xff] %v6599_v43  ;;  %v684_v63 = vrot.slane %v6489_v61, 4  ;;  %v9441_v27 = vunpack.i.l.bf16 %v6463_v6  ;;  %v9249_v37 = vunpack.i.h.bf16 %v6457_v47  ;;  %v4451_v45 = vunpack.i.h.bf16 %v6521_v44 }
 0x1be   :  { %v6593_v11 = vpop.permute.xlu1 %4468  ;;  %9439 = vst [vmem:[#allocation17_spill] sm:$0xff] %v6606_v42  ;;  %v6620_v55 = vperm.slane %v933_v40, %v5384_v10  ;;  %v4712_v56 = vpack.i.bf16 %v6599_v43, %v6596_v24  ;;  %v695_v25 = vsel %vm106_vm0, %v694_v1, %v6483_v18  ;;  %v751_v6 = vsel %vm106_vm0, %v750_v12, %v6486_v34 }
 0x1bf   :  { %9440 = vst [vmem:[#allocation35_spill] sm:$0xff] %v6609_v54  ;;  %v877_v22 = vsel %vm106_vm0, %v876_v5, %v9441_v27  ;;  %v2642_v23 = vrot.slane %v4461_v8, 4  ;;  %v2588_v5 = vrot.slane %v4450_v49, 4  ;;  %v9442_v27 = vpack.i.bf16 %v6263_v30, %v6255_v58 }
 0x1c0   :  { %v901_v44 = vsel %vm106_vm0, %v900_v9, %v6569_v7  ;;  %v957_v40 = vsel %vm106_vm0, %v956_v60, %v6565_v21  ;;  %v2586_v1 = vrot.slane %v4460_v46, 4  ;;  %v740_v34 = vrot.slane %v6542_v3, 4 }
 0x1c1   :  { %v6642_v12 = vrot.slane %v9249_v37, 4  ;;  %v2644_v58 = vrot.slane %v4451_v45, 4  ;;  %v9443_v30 = vpack.i.bf16 %v6289_v50, %v6275_v38  ;;  %v6659_v4 = vperm.slane %v877_v22, %v5384_v10 }
 0x1c2   :  { %v9444_v18 = vunpack.i.l.bf16 %v6457_v47  ;;  %v6668_v50 = vperm.slane %v901_v44, %v5403_v31  ;;  %v6671_v38 = vperm.slane %v957_v40, %v5403_v31  ;;  %v4466_v22 = vunpack.i.h.bf16 %v6586_v51 }
 0x1c3   :  { %4693 = vrot.lane.b32.xlu2 %v9442_v27, %s5311_s22  ;;  %4688 = vrot.lane.b32.xlu0 %v9443_v30, %s5313_s24  ;;  %v6653_v27 = vperm.slane %v695_v25, %v5403_v31  ;;  %v2589_v30 = vsel %vm106_vm0, %v4460_v46, %v2588_v5  ;;  %v2587_v59 = vsel %vm106_vm0, %v2586_v1, %v4450_v49  ;;  %v4471_v62 = vunpack.i.h.bf16 %v6593_v11 }
 0x1c4   :  { %4713 = vrot.lane.b32.xlu1 %v4712_v56, %s5315_s25  ;;  %v6656_v56 = vperm.slane %v751_v6, %v5403_v31  ;;  %v6663_v37 = vrot.slane %v9444_v18, 4  ;;  %9445 = vst [vmem:[#allocation36_spill] sm:$0xff] %v6668_v50  ;;  %v2643_v6 = vsel %vm106_vm0, %v2642_v23, %v4451_v45  ;;  %v4465_v18 = vunpack.i.l.bf16 %v6586_v51 }
 0x1c5   :  { %v6648_v9 = vpop.permute.xlu2 %4533  ;;  %v6650_v60 = vpop.permute.xlu0 %4478  ;;  %9446 = vst [vmem:[#allocation37_spill] sm:$0xff] %v6671_v38  ;;  %v685_v44 = vsel %vm106_vm0, %v6609_v54, %v684_v63  ;;  %v2645_v40 = vsel %vm106_vm0, %v4461_v8, %v2644_v58  ;;  %v9254_v36 = vunpack.i.h.bf16 %v6515_v32  ;;  %v9255_v25 = vunpack.i.l.bf16 %v6515_v32 }
 0x1c6   :  { %v6665_v14 = vpop.permute.xlu1 %4483  ;;  %v4707_v45 = vpack.i.bf16 %v6656_v56, %v6653_v27  ;;  %v6688_v23 = vperm.slane %v2643_v6, %v5384_v10  ;;  %v6691_v49 = vperm.slane %v2589_v30, %v5384_v10  ;;  %v4722_v51 = vpack.i.bf16 %v6671_v38, %v6668_v50 }
 0x1c7   :  { %v6696_v46 = vperm.slane %v685_v44, %v5403_v31  ;;  %v6699_v8 = vperm.slane %v2587_v59, %v5384_v10  ;;  %v2849_v63 = vsel %vm106_vm0, %v6494_v0, %v4466_v22  ;;  %v2850_v5 = vrot.slane %v4466_v22, 4 }
 0x1c8   :  { %v741_v1 = vsel %vm106_vm0, %v6606_v42, %v740_v34  ;;  %v2793_v58 = vsel %vm106_vm0, %v6498_v2, %v4465_v18  ;;  %v2794_v6 = vrot.slane %v4465_v18, 4  ;;  %v2861_v30 = vsel %vm106_vm0, %v6401_v28, %v4471_v62 }
 0x1c9   :  { %v6712_v59 = vperm.slane %v741_v1, %v5403_v31  ;;  %v6717_v22 = vrot.slane %v9254_v36, 4  ;;  %v2862_v44 = vrot.slane %v4471_v62, 4  ;;  %v4470_v34 = vunpack.i.l.bf16 %v6593_v11 }
 0x1ca   :  { %v6725_v28 = vperm.slane %v2645_v40, %v5384_v10  ;;  %v6729_v18 = vrot.slane %v9255_v25, 4  ;;  %v2624_v62 = vrot.slane %v6691_v49, 4  ;;  %v9447_v11 = vunpack.i.h.bf16 %v6348_v33 }
 0x1cb   :  { %4708 = vrot.lane.b32.xlu2 %v4707_v45, %s5314_s1  ;;  %v6740_v36 = vperm.slane %v2849_v63, %v5384_v10  ;;  %v6743_v40 = vperm.slane %v2793_v58, %v5384_v10  ;;  %v6746_v25 = vperm.slane %v2861_v30, %v5384_v10  ;;  %v2795_v43 = vsel %vm106_vm0, %v9448_v57, %v2794_v6 }
 0x1cc   :  { %4723 = vrot.lane.b32.xlu1 %v4722_v51, %s5314_s1  ;;  %v4702_v51 = vpack.i.bf16 %v6712_v59, %v6696_v46  ;;  %v2851_v0 = vsel %vm106_vm0, %v9447_v11, %v2850_v5  ;;  %v9261_v24 = vunpack.i.h.bf16 %v6588_v17  ;;  %v9449_v63 = vunpack.i.h.bf16 %v6306_v26 }
 0x1cd   :  { %v6720_v45 = vpop.permute.xlu2 %4543  ;;  %v6722_v2 = vpop.permute.xlu0 %4493  ;;  %v2805_v58 = vsel %vm106_vm0, %v6408_v15, %v4470_v34  ;;  %v2806_v30 = vrot.slane %v4470_v34, 4  ;;  %v6762_v38 = vperm.slane %v2851_v0, %v5384_v10  ;;  %v4481_v33 = vunpack.i.h.bf16 %v6650_v60 }
 0x1ce   :  { %v6733_v1 = vpop.permute.xlu1 %4508  ;;  %4703 = vrot.lane.b32.xlu0 %v4702_v51, %s5316_s26  ;;  %v2863_v5 = vsel %vm106_vm0, %v9449_v63, %v2862_v44  ;;  %v2625_v57 = vsel %vm106_vm0, %v6479_v41, %v2624_v62  ;;  %v2680_v6 = vrot.slane %v6725_v28, 4  ;;  %v6770_v44 = vperm.slane %v2795_v43, %v5384_v10 }
 0x1cf   :  { %v6775_v63 = vperm.slane %v2863_v5, %v5384_v10  ;;  %v6778_v0 = vperm.slane %v2805_v58, %v5384_v10  ;;  %v6782_v62 = vrot.slane %v9261_v24, 4  ;;  %v4480_v50 = vunpack.i.l.bf16 %v6650_v60 }
 0x1d0   :  { %v9450_v51 = vunpack.i.l.bf16 %v6306_v26  ;;  %v6791_v5 = vperm.slane %v2625_v57, %v5403_v31  ;;  %v1342_v24 = vsel %vm106_vm0, %v6546_v52, %v4481_v33  ;;  %v1343_v42 = vrot.slane %v4481_v33, 4 }
 0x1d1   :  { %v2681_v26 = vsel %vm106_vm0, %v6473_v39, %v2680_v6  ;;  %v9453_v60 = vrot.slane %v6539_v16, 4  ;;  %v9456_v15 = vrot.slane %v6528_v19, 4  ;;  %v902_v33 = vrot.slane %v6569_v7, 4 }
 0x1d2   :  { %v2807_v43 = vsel %vm106_vm0, %v9450_v51, %v2806_v30  ;;  %9451 = vst [vmem:[#allocation38_spill] sm:$0xff] %v6791_v5  ;;  %v6808_v57 = vperm.slane %v2681_v26, %v5403_v31  ;;  %v1286_v6 = vsel %vm106_vm0, %v6550_v13, %v4480_v50  ;;  %v958_v26 = vrot.slane %v6565_v21, 4 }
 0x1d3   :  { %v891_v30 = vsel %vm106_vm0, %v6659_v4, %v9453_v60  ;;  %v947_v52 = vsel %vm106_vm0, %v6620_v55, %v9456_v15  ;;  %v4486_v3 = vunpack.i.h.bf16 %v6665_v14  ;;  %v903_v15 = vsel %vm106_vm0, %v6556_v20, %v902_v33 }
 0x1d4   :  { %9454 = vst [vmem:[#allocation40_spill] sm:$0xff] %v6808_v57  ;;  %v6811_v34 = vperm.slane %v891_v30, %v5403_v31  ;;  %v6821_v60 = vperm.slane %v947_v52, %v5403_v31  ;;  %v4742_v54 = vpack.i.bf16 %v6808_v57, %v6791_v5  ;;  %v6831_v7 = vperm.slane %v1342_v24, %v5384_v10 }
 0x1d5   :  { %v6793_v11 = vpop.permute.xlu0 %4503  ;;  %v6795_v58 = vpop.permute.xlu2 %4568  ;;  %v959_v21 = vsel %vm106_vm0, %v6553_v53, %v958_v26  ;;  %v9460_v52 = vunpack.i.l.bf16 %v6588_v17  ;;  %v9461_v57 = vunpack.i.h.bf16 %v6410_v48  ;;  %v6848_v24 = vperm.slane %v1286_v6, %v5384_v10 }
 0x1d6   :  { %9452 = vst [vmem:[#allocation39_spill] sm:$0xff] %v6795_v58  ;;  %v6805_v51 = vpop.permute.xlu1 %4528  ;;  %v1287_v58 = vrot.slane %v4480_v50, 4  ;;  %v4717_v13 = vpack.i.bf16 %v6821_v60, %v6811_v34  ;;  %v6836_v50 = vperm.slane %v903_v15, %v5403_v31  ;;  %4743 = vrot.lane.b32.xlu1 %v4742_v54, %s5315_s25  ;;  %v6852_v33 = vperm.slane %v959_v21, %v5403_v31 }
 0x1d7   :  { %9455 = vst [vmem:[#allocation41_spill] sm:$0xff] %v6811_v34  ;;  %v6842_v30 = vrot.slane %v9460_v52, 4  ;;  %v1344_v20 = vsel %vm106_vm0, %v9461_v57, %v1343_v42  ;;  %v6855_v15 = vperm.slane %v2807_v43, %v5384_v10  ;;  %v9464_v26 = vunpack.i.h.bf16 %v6648_v9 }
 0x1d8   :  { %9457 = vst [vmem:[#allocation42_spill] sm:$0xff] %v6821_v60  ;;  %v9465_v5 = vunpack.i.l.bf16 %v6410_v48  ;;  %4718 = vrot.lane.b32.xlu2 %v4717_v13, %s5316_s26  ;;  %v9466_v54 = vunpack.i.l.bf16 %v6648_v9  ;;  %v4510_v6 = vunpack.i.l.bf16 %v6733_v1  ;;  %v4496_v43 = vunpack.i.h.bf16 %v6722_v2 }
 0x1d9   :  { %9458 = vst [vmem:[#allocation43_spill] sm:$0xff] %v6831_v7  ;;  %v6860_v52 = vrot.slane %v9464_v26, 4  ;;  %v4727_v21 = vpack.i.bf16 %v6852_v33, %v6836_v50  ;;  %v1355_v48 = vrot.slane %v4486_v3, 4  ;;  %v6883_v13 = vperm.slane %v1344_v20, %v5384_v10 }
 0x1da   :  { %9459 = vst [vmem:[#allocation44_spill] sm:$0xff] %v6836_v50  ;;  %v1288_v42 = vsel %vm106_vm0, %v9465_v5, %v1287_v58  ;;  %v6868_v57 = vrot.slane %v9466_v54, 4  ;;  %v9468_v5 = vunpack.i.l.bf16 %v6665_v14  ;;  %v4511_v50 = vunpack.i.h.bf16 %v6733_v1 }
 0x1db   :  { %9462 = vst [vmem:[#allocation45_spill] sm:$0xff] %v6848_v24  ;;  %v6889_v34 = vperm.slane %v1288_v42, %v5384_v10  ;;  %4728 = vrot.lane.b32.xlu0 %v4727_v21, %s5315_s25  ;;  %v4495_v20 = vunpack.i.l.bf16 %v6722_v2  ;;  %v2884_v54 = vrot.slane %v6775_v63, 4  ;;  %v1494_v42 = vsel %vm106_vm0, %v4510_v6, %v6663_v37 }
 0x1dc   :  { %9463 = vst [vmem:[#allocation46_spill] sm:$0xff] %v6852_v33  ;;  %v6880_v58 = vrot.slane %v9468_v5, 4  ;;  %v1353_v7 = vrot.slane %v4496_v43, 4  ;;  %v1356_v33 = vsel %vm106_vm0, %v4496_v43, %v1355_v48  ;;  %v2622_v1 = vrot.slane %v6479_v41, 4 }
 0x1dd   :  { %v6874_v53 = vpop.permute.xlu0 %4523  ;;  %v6876_v26 = vpop.permute.xlu2 %4583  ;;  %9469 = vst [vmem:[#allocation48_spill] sm:$0xff] %v6883_v13  ;;  %v2828_v13 = vrot.slane %v6855_v15, 4  ;;  %v1491_v24 = vrot.slane %v4510_v6, 4  ;;  %v2885_v5 = vsel %vm106_vm0, %v2884_v54, %v6762_v38  ;;  %v2678_v2 = vrot.slane %v6473_v39, 4 }
 0x1de   :  { %9467 = vst [vmem:[#allocation47_spill] sm:$0xff] %v6876_v26  ;;  %v6886_v60 = vpop.permute.xlu1 %4538  ;;  %v1547_v26 = vrot.slane %v4511_v50, 4  ;;  %v6912_v37 = vperm.slane %v2885_v5, %v5403_v31  ;;  %v2623_v43 = vsel %vm106_vm0, %v2622_v1, %v6691_v49  ;;  %v6917_v41 = vperm.slane %v1494_v42, %v5384_v10 }
 0x1df   :  { %9470 = vst [vmem:[#allocation49_spill] sm:$0xff] %v6889_v34  ;;  %v2829_v21 = vsel %vm106_vm0, %v2828_v13, %v6770_v44  ;;  %v1550_v6 = vsel %vm106_vm0, %v4511_v50, %v6642_v12  ;;  %v6922_v48 = vperm.slane %v2623_v43, %v5403_v31  ;;  %v2679_v39 = vsel %vm106_vm0, %v2678_v2, %v6725_v28 }
 0x1e0   :  { %v6909_v34 = vperm.slane %v2829_v21, %v5403_v31  ;;  %9472 = vst [vmem:[#allocation51_spill] sm:$0xff] %v6912_v37  ;;  %v6929_v54 = vperm.slane %v2679_v39, %v5403_v31  ;;  %v9475_v49 = vrot.slane %v6699_v8, 4  ;;  %v9476_v42 = vrot.slane %v6688_v23, 4 }
 0x1e1   :  { %9473 = vst [vmem:[#allocation52_spill] sm:$0xff] %v6922_v48  ;;  %v9478_v28 = vunpack.i.l.bf16 %v6457_v47  ;;  %v1354_v2 = vsel %vm106_vm0, %v1353_v7, %v4486_v3  ;;  %v9483_v7 = vunpack.i.l.bf16 %v6720_v45 }
 0x1e2   :  { %9471 = vst [vmem:[#allocation50_spill] sm:$0xff] %v6909_v34  ;;  %v4752_v13 = vpack.i.bf16 %v6912_v37, %v6909_v34  ;;  %v2613_v5 = vsel %vm106_vm0, %v6453_v29, %v9475_v49  ;;  %v2669_v12 = vsel %vm106_vm0, %v6450_v35, %v9476_v42  ;;  %v9481_v42 = vunpack.i.h.bf16 %v6457_v47 }
 0x1e3   :  { %9474 = vst [vmem:[#allocation53_spill] sm:$0xff] %v6929_v54  ;;  %v1492_v21 = vsel %vm106_vm0, %v1491_v24, %v9478_v28  ;;  %v6948_v43 = vperm.slane %v2613_v5, %v5403_v31  ;;  %v6951_v39 = vperm.slane %v2669_v12, %v5403_v31  ;;  %v9482_v34 = vunpack.i.h.bf16 %v6720_v45 }
 0x1e4   :  { %v1548_v37 = vsel %vm106_vm0, %v1547_v26, %v9481_v42  ;;  %4753 = vrot.lane.b32.xlu1 %v4752_v13, %s5314_s1  ;;  %v4737_v3 = vpack.i.bf16 %v6929_v54, %v6922_v48  ;;  %v6970_v5 = vrot.slane %v9483_v7, 4  ;;  %v4531_v47 = vunpack.i.h.bf16 %v6805_v51 }
 0x1e5   :  { %v6939_v50 = vpop.permute.xlu0 %4548  ;;  %v6941_v1 = vpop.permute.xlu2 %4598  ;;  %9479 = vst [vmem:[#allocation55_spill] sm:$0xff] %v6948_v43  ;;  %v6963_v24 = vrot.slane %v9482_v34, 4  ;;  %v4530_v26 = vunpack.i.l.bf16 %v6805_v51  ;;  %v6977_v12 = vperm.slane %v1492_v21, %v5384_v10  ;;  %v6980_v34 = vperm.slane %v1354_v2, %v5384_v10 }
 0x1e6   :  { %9477 = vst [vmem:[#allocation54_spill] sm:$0xff] %v6941_v1  ;;  %v6953_v49 = vpop.permute.xlu1 %4553  ;;  %v6959_v1 = vperm.slane %v1550_v6, %v5384_v10  ;;  %v4732_v6 = vpack.i.bf16 %v6951_v39, %v6948_v43  ;;  %v6983_v13 = vperm.slane %v1356_v33, %v5384_v10  ;;  %v1297_v28 = vrot.slane %v4495_v20, 4  ;;  %4738 = vrot.lane.b32.xlu2 %v4737_v3, %s5314_s1 }
 0x1e7   :  { %9480 = vst [vmem:[#allocation56_spill] sm:$0xff] %v6951_v39  ;;  %v6988_v7 = vperm.slane %v1548_v37, %v5384_v10  ;;  %v9486_v51 = vrot.slane %v6778_v0, 4  ;;  %v9487_v2 = vrot.slane %v6746_v25, 4  ;;  %v4506_v3 = vunpack.i.h.bf16 %v6793_v11 }
 0x1e8   :  { %9484 = vst [vmem:[#allocation57_spill] sm:$0xff] %v6980_v34  ;;  %4733 = vrot.lane.b32.xlu0 %v4732_v6, %s5316_s26  ;;  %v1300_v6 = vsel %vm106_vm0, %v4495_v20, %v6880_v58  ;;  %v1964_v43 = vrot.slane %v4531_v47, 4  ;;  %v4505_v54 = vunpack.i.l.bf16 %v6793_v11  ;;  %v9490_v39 = vrot.slane %v6743_v40, 4 }
 0x1e9   :  { %9485 = vst [vmem:[#allocation58_spill] sm:$0xff] %v6988_v7  ;;  %v2817_v21 = vsel %vm106_vm0, %v9486_v51, %v6743_v40  ;;  %v2873_v33 = vsel %vm106_vm0, %v9487_v2, %v6740_v36  ;;  %v1908_v51 = vrot.slane %v4530_v26, 4  ;;  %v9491_v34 = vrot.slane %v6740_v36, 4 }
 0x1ea   :  { %v7002_v42 = vperm.slane %v2817_v21, %v5403_v31  ;;  %v7005_v37 = vperm.slane %v2873_v33, %v5403_v31  ;;  %v2819_v21 = vsel %vm106_vm0, %v6778_v0, %v9490_v39  ;;  %v2830_v20 = vrot.slane %v6770_v44, 4 }
 0x1eb   :  { %v2875_v33 = vsel %vm106_vm0, %v6746_v25, %v9491_v34  ;;  %v7023_v58 = vperm.slane %v2819_v21, %v5403_v31  ;;  %v2886_v40 = vrot.slane %v6762_v38, 4  ;;  %v1911_v36 = vsel %vm106_vm0, %v4530_v26, %v6842_v30 }
 0x1ec   :  { %9488 = vst [vmem:[#allocation59_spill] sm:$0xff] %v7002_v42  ;;  %v2840_v48 = vrot.slane %v7002_v42, 4  ;;  %v2896_v2 = vrot.slane %v7005_v37, 4  ;;  %v7026_v11 = vperm.slane %v2875_v33, %v5403_v31  ;;  %v1561_v25 = vrot.slane %v4506_v3, 4 }
 0x1ed   :  { %9489 = vst [vmem:[#allocation60_spill] sm:$0xff] %v7005_v37  ;;  %v7020_v7 = vpop.permute.xlu0 %4563  ;;  %v7032_v0 = vpop.permute.xlu2 %4618  ;;  %v2831_v44 = vsel %vm106_vm0, %v6855_v15, %v2830_v20  ;;  %v2887_v38 = vsel %vm106_vm0, %v6775_v63, %v2886_v40  ;;  %v7058_v15 = vperm.slane %v1911_v36, %v5384_v10  ;;  %v1967_v63 = vsel %vm106_vm0, %v4531_v47, %v6782_v62 }
 0x1ee   :  { %9492 = vst [vmem:[#allocation61_spill] sm:$0xff] %v7020_v7  ;;  %v7030_v42 = vpop.permute.xlu1 %4558  ;;  %v2841_v39 = vsel %vm106_vm0, 0.0, %v2840_v48  ;;  %v2897_v34 = vsel %vm106_vm0, 0.0, %v2896_v2  ;;  %v4747_v33 = vpack.i.bf16 %v7026_v11, %v7023_v58  ;;  %v7045_v7 = vperm.slane %v1300_v6, %v5384_v10 }
 0x1ef   :  { %9493 = vst [vmem:[#allocation62_spill] sm:$0xff] %v7030_v42  ;;  %v4767_v21 = vpack.i.bf16 %v2897_v34, %v2841_v39  ;;  %v1505_v42 = vrot.slane %v4505_v54, 4  ;;  %v7048_v30 = vperm.slane %v2831_v44, %v5403_v31  ;;  %v7051_v48 = vperm.slane %v2887_v38, %v5403_v31 }
 0x1f0   :  { %v9494_v2 = vunpack.i.l.bf16 %v6665_v14  ;;  %4748 = vrot.lane.b32.xlu2 %v4747_v33, %s5316_s26  ;;  %v9495_v6 = vunpack.i.l.bf16 %v6588_v17  ;;  %v9496_v40 = vunpack.i.h.bf16 %v6588_v17  ;;  %v9497_v62 = vunpack.i.h.bf16 %v6515_v32 }
 0x1f1   :  { %4768 = vrot.lane.b32.xlu1 %v4767_v21, %s5317_s29  ;;  %v4757_v36 = vpack.i.bf16 %v7051_v48, %v7048_v30  ;;  %v1504_v34 = vsel %vm106_vm0, %v6729_v18, %v4505_v54  ;;  %v9291_v21 = vunpack.i.h.bf16 %v6886_v60  ;;  %v4525_v33 = vunpack.i.l.bf16 %v6874_v53 }
 0x1f2   :  { %v1298_v39 = vsel %vm106_vm0, %v1297_v28, %v9494_v2  ;;  %v1909_v20 = vsel %vm106_vm0, %v1908_v51, %v9495_v6  ;;  %v1965_v14 = vsel %vm106_vm0, %v1964_v43, %v9496_v40  ;;  %v1560_v28 = vsel %vm106_vm0, %v6717_v22, %v4506_v3 }
 0x1f3   :  { %v1562_v47 = vsel %vm106_vm0, %v9497_v62, %v1561_v25  ;;  %v4526_v51 = vunpack.i.h.bf16 %v6874_v53  ;;  %v7082_v17 = vperm.slane %v1298_v39, %v5384_v10  ;;  %v9498_v22 = vunpack.i.l.bf16 %v6515_v32  ;;  %4758 = vrot.lane.b32.xlu0 %v4757_v36, %s5315_s25 }
 0x1f4   :  { %v7093_v18 = vperm.slane %v1909_v20, %v5384_v10  ;;  %v7097_v44 = vperm.slane %v1965_v14, %v5384_v10  ;;  %v7100_v38 = vperm.slane %v1967_v63, %v5384_v10  ;;  %v7108_v53 = vperm.slane %v1562_v47, %v5384_v10 }
 0x1f5   :  { %v1506_v3 = vsel %vm106_vm0, %v9498_v22, %v1505_v42  ;;  %v7090_v25 = vpop.permute.xlu0 %4578  ;;  %v7105_v42 = vperm.slane %v1560_v28, %v5384_v10  ;;  %v7111_v2 = vperm.slane %v1504_v34, %v5384_v10  ;;  %v9292_v39 = vunpack.i.l.bf16 %v6886_v60  ;;  %v7124_v14 = vpop.permute.xlu2 %4628 }
 0x1f6   :  { %9499 = vst [vmem:[#allocation63_spill] sm:$0xff] %v7093_v18  ;;  %v7102_v32 = vpop.permute.xlu1 %4573  ;;  %v7115_v6 = vperm.slane %v1506_v3, %v5384_v10  ;;  %v7119_v63 = vrot.slane %v9291_v21, 4  ;;  %v1977_v20 = vsel %vm106_vm0, %v6860_v52, %v4526_v51  ;;  %v708_v40 = vrot.slane %v6696_v46, 4 }
 0x1f7   :  { %v1978_v28 = vrot.slane %v4526_v51, 4  ;;  %v1922_v36 = vrot.slane %v4525_v33, 4  ;;  %v764_v62 = vrot.slane %v6712_v59, 4  ;;  %v9500_v47 = vrot.slane %v6453_v29, 4 }
 0x1f8   :  { %v709_v22 = vsel %vm106_vm0, 0.0, %v708_v40  ;;  %v9502_v52 = vrot.slane %v6450_v35, 4  ;;  %v710_v51 = vrot.slane %v6653_v27, 4  ;;  %v7142_v59 = vrot.slane %v9292_v39, 4 }
 0x1f9   :  { %v2611_v34 = vsel %vm106_vm0, %v9500_v47, %v6699_v8  ;;  %v765_v29 = vsel %vm106_vm0, 0.0, %v764_v62  ;;  %v766_v40 = vrot.slane %v6656_v56, 4  ;;  %v1921_v47 = vsel %vm106_vm0, %v6868_v57, %v4525_v33 }
 0x1fa   :  { %v7133_v3 = vperm.slane %v2611_v34, %v5403_v31  ;;  %v2667_v46 = vsel %vm106_vm0, %v9502_v52, %v6688_v23  ;;  %v4777_v34 = vpack.i.bf16 %v765_v29, %v709_v22  ;;  %v711_v23 = vsel %vm106_vm0, 0.0, %v710_v51 }
 0x1fb   :  { %v7146_v8 = vperm.slane %v2667_v46, %v5403_v31  ;;  %v9504_v27 = vunpack.i.h.bf16 %v6648_v9  ;;  %v7157_v54 = vperm.slane %v1977_v20, %v5384_v10  ;;  %v767_v46 = vsel %vm106_vm0, 0.0, %v766_v40 }
 0x1fc   :  { %9501 = vst [vmem:[#allocation64_spill] sm:$0xff] %v7133_v3  ;;  %v2634_v35 = vrot.slane %v7133_v3, 4  ;;  %v9505_v57 = vunpack.i.l.bf16 %v6648_v9  ;;  %v9295_v22 = vunpack.i.h.bf16 %v6953_v49  ;;  %4778 = vrot.lane.b32.xlu1 %v4777_v34, %s5313_s24  ;;  %v9507_v40 = vrot.slane %v6659_v4, 4 }
 0x1fd   :  { %9503 = vst [vmem:[#allocation65_spill] sm:$0xff] %v7146_v8  ;;  %v1979_v52 = vsel %vm106_vm0, %v9504_v27, %v1978_v28  ;;  %v2690_v62 = vrot.slane %v7146_v8, 4  ;;  %v7161_v56 = vpop.permute.xlu0 %4588  ;;  %v4782_v28 = vpack.i.bf16 %v767_v46, %v711_v23  ;;  %v9508_v9 = vrot.slane %v6620_v55, 4  ;;  %v9515_v46 = vld [vmem:[#allocation17_spill] sm:$0xff] }
 0x1fe   :  { %v1923_v33 = vsel %vm106_vm0, %v9505_v57, %v1922_v36  ;;  %v2635_v51 = vsel %vm106_vm0, 0.0, %v2634_v35  ;;  %v7169_v29 = vpop.permute.xlu1 %4603  ;;  %v889_v27 = vsel %vm106_vm0, %v9507_v40, %v6539_v16  ;;  %v9509_v57 = vld [vmem:[#allocation35_spill] sm:$0xff]  ;;  %v9297_v55 = vunpack.i.l.bf16 %v6953_v49 }
 0x1ff   :  { %9506 = vst [vmem:[#allocation66_spill] sm:$0xff] %v7169_v29  ;;  %v2691_v20 = vsel %vm106_vm0, 0.0, %v2690_v62  ;;  %v945_v36 = vsel %vm106_vm0, %v9508_v9, %v6528_v19  ;;  %v9510_v34 = vrot.slane %v9509_v57, 4  ;;  %4783 = vrot.lane.b32.xlu0 %v4782_v28, %s5311_s22  ;;  %v7186_v62 = vperm.slane %v889_v27, %v5403_v31  ;;  %v9514_v19 = vld [vmem:[#allocation16_spill] sm:$0xff] }
 0x200   :  { %v4762_v23 = vpack.i.bf16 %v2691_v20, %v2635_v51  ;;  %v7189_v4 = vperm.slane %v945_v36, %v5403_v31  ;;  %v9516_v40 = vrot.slane %v9515_v46, 4  ;;  %v9518_v20 = vld [vmem:[#allocation42_spill] sm:$0xff]  ;;  %v7211_v46 = vperm.slane %v1979_v52, %v5384_v10 }
 0x201   :  { %v683_v35 = vsel %vm106_vm0, %v9510_v34, %v6489_v61  ;;  %9511 = vst [vmem:[#allocation35_spill] sm:$0xff] %v7186_v62  ;;  %v9517_v61 = vld [vmem:[#allocation41_spill] sm:$0xff]  ;;  %v970_v28 = vrot.slane %v9518_v20, 4  ;;  %v912_v27 = vrot.slane %v7186_v62, 4  ;;  %v7226_v52 = vrot.slane %v9295_v22, 4  ;;  %v9523_v62 = vld [vmem:[#allocation15_spill] sm:$0xff] }
 0x202   :  { %9512 = vst [vmem:[#allocation67_spill] sm:$0xff] %v7189_v4  ;;  %v7192_v16 = vperm.slane %v683_v35, %v5403_v31  ;;  %v739_v9 = vsel %vm106_vm0, %v9516_v40, %v9514_v19  ;;  %v914_v51 = vrot.slane %v9517_v61, 4  ;;  %4763 = vrot.lane.b32.xlu2 %v4762_v23, %s5317_s29  ;;  %v968_v36 = vrot.slane %v7189_v4, 4  ;;  %v7208_v35 = vpop.permute.xlu2 %4643 }
 0x203   :  { %v7206_v34 = vperm.slane %v739_v9, %v5403_v31  ;;  %v7214_v19 = vperm.slane %v1921_v47, %v5384_v10  ;;  %v971_v23 = vsel %vm106_vm0, 0.0, %v970_v28  ;;  %v7219_v61 = vperm.slane %v1923_v33, %v5384_v10 }
 0x204   :  { %9513 = vst [vmem:[#allocation68_spill] sm:$0xff] %v7192_v16  ;;  %v706_v57 = vrot.slane %v7192_v16, 4  ;;  %v915_v40 = vsel %vm106_vm0, 0.0, %v914_v51  ;;  %v913_v20 = vsel %vm106_vm0, 0.0, %v912_v27  ;;  %v969_v9 = vsel %vm106_vm0, 0.0, %v968_v36  ;;  %v9521_v27 = vld [vmem:[#allocation44_spill] sm:$0xff] }
 0x205   :  { %9519 = vst [vmem:[#allocation16_spill] sm:$0xff] %v7206_v34  ;;  %v762_v21 = vrot.slane %v7206_v34, 4  ;;  %v2126_v47 = vrot.slane %v9297_v55, 4  ;;  %v4792_v39 = vpack.i.bf16 %v969_v9, %v913_v20  ;;  %v7231_v28 = vpop.permute.xlu0 %4593  ;;  %v4797_v26 = vpack.i.bf16 %v971_v23, %v915_v40  ;;  %v9522_v36 = vld [vmem:[#allocation46_spill] sm:$0xff]  ;;  %v9526_v23 = vld [vmem:[#allocation48_spill] sm:$0xff] }
 0x206   :  { %v707_v51 = vsel %vm106_vm0, 0.0, %v706_v57  ;;  %9520 = vst [vmem:[#allocation17_spill] sm:$0xff] %v7231_v28  ;;  %v918_v43 = vrot.slane %v9521_v27, 4  ;;  %v974_v29 = vrot.slane %v9522_v36, 4  ;;  %v7236_v37 = vpop.permute.xlu1 %4623  ;;  %v712_v55 = vrot.slane %v9523_v62, 4  ;;  %v9524_v20 = vld [vmem:[#allocation18_spill] sm:$0xff] }
 0x207   :  { %v763_v33 = vsel %vm106_vm0, 0.0, %v762_v21  ;;  %4793 = vrot.lane.b32.xlu1 %v4792_v39, %s5317_s29  ;;  %v768_v9 = vrot.slane %v9524_v20, 4  ;;  %v9525_v57 = vld [vmem:[#allocation49_spill] sm:$0xff]  ;;  %4798 = vrot.lane.b32.xlu0 %v4797_v26, %s5313_s24  ;;  %v1379_v27 = vrot.slane %v9526_v23, 4  ;;  %v4576_v36 = vunpack.i.h.bf16 %v7102_v32  ;;  %v9527_v20 = vld [vmem:[#allocation19_spill] sm:$0xff] }
 0x208   :  { %v1323_v4 = vrot.slane %v9525_v57, 4  ;;  %v4772_v28 = vpack.i.bf16 %v763_v33, %v707_v51  ;;  %v919_v21 = vsel %vm106_vm0, 0.0, %v918_v43  ;;  %v975_v40 = vsel %vm106_vm0, 0.0, %v974_v29 }
 0x209   :  { %v4575_v22 = vunpack.i.l.bf16 %v7102_v32  ;;  %v4807_v62 = vpack.i.bf16 %v975_v40, %v919_v21  ;;  %v1380_v26 = vsel %vm106_vm0, %v6983_v13, %v1379_v27  ;;  %v4591_v43 = vunpack.i.h.bf16 %v7161_v56 }
 0x20a   :  { %v1324_v39 = vsel %vm106_vm0, %v7045_v7, %v1323_v4  ;;  %4773 = vrot.lane.b32.xlu2 %v4772_v28, %s5317_s29  ;;  %v713_v29 = vsel %vm106_vm0, 0.0, %v712_v55  ;;  %v769_v33 = vsel %vm106_vm0, 0.0, %v768_v9  ;;  %v7261_v32 = vperm.slane %v1380_v26, %v5403_v31  ;;  %v7267_v40 = vpop.permute.xlu2 %4658  ;;  %v9529_v55 = vld [vmem:[#allocation20_spill] sm:$0xff] }
 0x20b   :  { %v7253_v51 = vperm.slane %v1324_v39, %v5403_v31  ;;  %v4590_v4 = vunpack.i.l.bf16 %v7161_v56  ;;  %v2547_v28 = vsel %vm605_vm6, %v9527_v20, %v4591_v43  ;;  %v4646_v21 = vunpack.i.h.bf16 %v7208_v35  ;;  %9528 = vst [vmem:[#allocation41_spill] sm:$0xff] %v7267_v40 }
 0x20c   :  { %v2548_v39 = vsel %vm607_vm7, %v2547_v28, %v4576_v36  ;;  %v4645_v26 = vunpack.i.l.bf16 %v7208_v35  ;;  %v9531_v40 = vrot.slane %v7045_v7, 4  ;;  %v9532_v34 = vrot.slane %v6983_v13, 4 }
 0x20d   :  { %v4822_v27 = vpack.i.bf16 %v7261_v32, %v7253_v51  ;;  %v2540_v9 = vsel %vm605_vm6, %v9529_v55, %v4590_v4  ;;  %v7275_v56 = vpop.permute.xlu0 %4608  ;;  %v7279_v20 = vsel %vm609_vm8, %v2548_v39, %v4646_v21  ;;  %v9533_v35 = vunpack.i.l.bf16 %v6953_v49 }
 0x20e   :  { %9530 = vst [vmem:[#allocation42_spill] sm:$0xff] %v7275_v56  ;;  %v2541_v43 = vsel %vm607_vm7, %v2540_v9, %v4575_v22  ;;  %v1322_v16 = vsel %vm106_vm0, %v9531_v40, %v9525_v57  ;;  %v1378_v4 = vsel %vm106_vm0, %v9532_v34, %v9526_v23  ;;  %v7289_v36 = vpop.permute.xlu1 %4633  ;;  %v9534_v28 = vunpack.i.h.bf16 %v6953_v49  ;;  %v9539_v9 = vld [vmem:[#allocation37_spill] sm:$0xff] }
 0x20f   :  { %v2129_v22 = vsel %vm106_vm0, %v9533_v35, %v6970_v5  ;;  %v4551_v7 = vunpack.i.h.bf16 %v6939_v50  ;;  %4808 = vrot.lane.b32.xlu1 %v4807_v62, %s5312_s23  ;;  %v7304_v13 = vsel %vm609_vm8, %v2541_v43, %v4645_v26  ;;  %v9535_v34 = vunpack.i.l.bf16 %v6939_v50  ;;  %4823 = vrot.lane.b32.xlu0 %v4822_v27, %s5315_s25  ;;  %v9538_v62 = vld [vmem:[#allocation36_spill] sm:$0xff]  ;;  %v9549_v56 = vld [vmem:[#allocation57_spill] sm:$0xff] }
 0x210   :  { %v7299_v21 = vsel %vm106_vm0, %v9534_v28, %v6963_v24  ;;  %v4787_v23 = vpack.i.bf16 %v769_v33, %v713_v29  ;;  %v1527_v5 = vrot.slane %v7115_v6, 4  ;;  %v1583_v49 = vrot.slane %v7108_v53, 4 }
 0x211   :  { %v2114_v57 = vrot.slane %v9535_v34, 4  ;;  %v7312_v24 = vperm.slane %v1322_v16, %v5403_v31  ;;  %v7315_v40 = vperm.slane %v1378_v4, %v5403_v31  ;;  %v916_v55 = vrot.slane %v9538_v62, 4 }
 0x212   :  { %v972_v39 = vrot.slane %v9539_v9, 4  ;;  %v9540_v26 = vunpack.i.l.bf16 %v6720_v45  ;;  %v7323_v33 = vperm.slane %v2129_v22, %v5384_v10  ;;  %4788 = vrot.lane.b32.xlu2 %v4787_v23, %s5312_s23  ;;  %v1528_v16 = vsel %vm106_vm0, %v1527_v5, %v6917_v41  ;;  %v7367_v3 = vpop.permute.xlu2 %4663 }
 0x213   :  { %9536 = vst [vmem:[#allocation44_spill] sm:$0xff] %v7312_v24  ;;  %v1584_v27 = vsel %vm106_vm0, %v1583_v49, %v6959_v1  ;;  %v2170_v43 = vrot.slane %v4551_v7, 4  ;;  %v2173_v4 = vsel %vm106_vm0, %v4551_v7, %v7119_v63  ;;  %v7333_v35 = vperm.slane %v1528_v16, %v5403_v31  ;;  %v9544_v49 = vld [vmem:[#allocation58_spill] sm:$0xff]  ;;  %v9545_v16 = vld [vmem:[#allocation45_spill] sm:$0xff] }
 0x214   :  { %9537 = vst [vmem:[#allocation46_spill] sm:$0xff] %v7315_v40  ;;  %v2127_v29 = vsel %vm106_vm0, %v2126_v47, %v9540_v26  ;;  %v7336_v47 = vperm.slane %v1584_v27, %v5403_v31  ;;  %v9543_v22 = vunpack.i.l.bf16 %v6886_v60  ;;  %v2117_v23 = vsel %vm106_vm0, %v9535_v34, %v7142_v59  ;;  %v9547_v34 = vld [vmem:[#allocation43_spill] sm:$0xff] }
 0x215   :  { %9541 = vst [vmem:[#allocation15_spill] sm:$0xff] %v7333_v35  ;;  %v1517_v5 = vrot.slane %v6977_v12, 4  ;;  %v1573_v62 = vrot.slane %v9544_v49, 4  ;;  %v4817_v63 = vpack.i.bf16 %v7315_v40, %v7312_v24  ;;  %v917_v7 = vsel %vm106_vm0, 0.0, %v916_v55 }
 0x216   :  { %9542 = vst [vmem:[#allocation18_spill] sm:$0xff] %v7336_v47  ;;  %v2115_v28 = vsel %vm106_vm0, %v2114_v57, %v9543_v22  ;;  %v973_v9 = vsel %vm106_vm0, 0.0, %v972_v39  ;;  %v4832_v26 = vpack.i.bf16 %v7336_v47, %v7333_v35  ;;  %v7353_v57 = vpop.permute.xlu0 %4613  ;;  %v9546_v27 = vrot.slane %v9545_v16, 4  ;;  %v7369_v8 = vpop.permute.xlu1 %4648 }
 0x217   :  { %v1518_v50 = vsel %vm106_vm0, %v7111_v2, %v1517_v5  ;;  %v1574_v59 = vsel %vm106_vm0, %v7105_v42, %v1573_v62  ;;  %v9548_v55 = vrot.slane %v9547_v34, 4  ;;  %v9550_v47 = vunpack.i.h.bf16 %v6720_v45  ;;  %4818 = vrot.lane.b32.xlu1 %v4817_v63, %s5314_s1 }
 0x218   :  { %v1312_v22 = vsel %vm106_vm0, %v7082_v17, %v9546_v27  ;;  %v9551_v62 = vunpack.i.h.bf16 %v6886_v60  ;;  %v7379_v27 = vperm.slane %v2173_v4, %v5384_v10  ;;  %v7382_v40 = vperm.slane %v2117_v23, %v5384_v10  ;;  %4833 = vrot.lane.b32.xlu0 %v4832_v26, %s5314_s1 }
 0x219   :  { %v1368_v39 = vsel %vm106_vm0, %v9549_v56, %v9548_v55  ;;  %v2183_v5 = vsel %vm106_vm0, %v7226_v52, %v9550_v47  ;;  %v7386_v55 = vperm.slane %v2115_v28, %v5384_v10  ;;  %v4802_v24 = vpack.i.bf16 %v973_v9, %v917_v7 }
 0x21a   :  { %v2171_v35 = vsel %vm106_vm0, %v2170_v43, %v9551_v62  ;;  %v7390_v45 = vperm.slane %v1518_v50, %v5403_v31  ;;  %v1944_v60 = vrot.slane %v7219_v61, 4  ;;  %v7394_v52 = vperm.slane %v1574_v59, %v5403_v31 }
 0x21b   :  { %9552 = vst [vmem:[#allocation49_spill] sm:$0xff] %v7386_v55  ;;  %v7397_v43 = vperm.slane %v1312_v22, %v5403_v31  ;;  %v7400_v4 = vperm.slane %v1368_v39, %v5403_v31  ;;  %v2000_v47 = vrot.slane %v7211_v46, 4  ;;  %v7404_v28 = vperm.slane %v2127_v29, %v5384_v10  ;;  %4803 = vrot.lane.b32.xlu2 %v4802_v24, %s5311_s22 }
 0x21c   :  { %9553 = vst [vmem:[#allocation48_spill] sm:$0xff] %v7390_v45  ;;  %v7407_v23 = vperm.slane %v2183_v5, %v5384_v10  ;;  %v7410_v63 = vperm.slane %v2171_v35, %v5384_v10  ;;  %v1945_v7 = vsel %vm106_vm0, %v1944_v60, %v7058_v15  ;;  %v2208_v9 = vrot.slane %v7379_v27, 4 }
 0x21d   :  { %9554 = vst [vmem:[#allocation19_spill] sm:$0xff] %v7394_v52  ;;  %v2152_v26 = vrot.slane %v7382_v40, 4  ;;  %v7418_v50 = vperm.slane %v1945_v7, %v5403_v31  ;;  %v2001_v29 = vsel %vm106_vm0, %v2000_v47, %v7100_v38  ;;  %v4581_v59 = vunpack.i.h.bf16 %v7090_v25 }
 0x21e   :  { %v4580_v35 = vunpack.i.l.bf16 %v7090_v25  ;;  %v7425_v22 = vperm.slane %v2001_v29, %v5403_v31  ;;  %v1934_v24 = vrot.slane %v7093_v18, 4  ;;  %v4827_v39 = vpack.i.bf16 %v7394_v52, %v7390_v45  ;;  %v7434_v47 = vpop.permute.xlu0 %4638 }
 0x21f   :  { %9555 = vst [vmem:[#allocation20_spill] sm:$0xff] %v7418_v50  ;;  %v4812_v5 = vpack.i.bf16 %v7400_v4, %v7397_v43  ;;  %v1990_v62 = vrot.slane %v7097_v44, 4  ;;  %v2140_v60 = vrot.slane %v7386_v55, 4  ;;  %v4666_v7 = vunpack.i.h.bf16 %v7367_v3 }
 0x220   :  { %9556 = vst [vmem:[#allocation36_spill] sm:$0xff] %v7425_v22  ;;  %v4847_v25 = vpack.i.bf16 %v7425_v22, %v7418_v50  ;;  %v4665_v29 = vunpack.i.l.bf16 %v7367_v3  ;;  %v1935_v18 = vsel %vm106_vm0, %v7214_v19, %v1934_v24  ;;  %4828 = vrot.lane.b32.xlu1 %v4827_v39, %s5316_s26  ;;  %v9558_v45 = vrot.slane %v6917_v41, 4  ;;  %v4669_v50 = vpop.permute.xlu1 %4668 }
 0x221   :  { %9557 = vst [vmem:[#allocation37_spill] sm:$0xff] %v7434_v47  ;;  %v1991_v52 = vsel %vm106_vm0, %v7157_v54, %v1990_v62  ;;  %v2141_v55 = vsel %vm106_vm0, %v7404_v28, %v2140_v60  ;;  %v2196_v22 = vrot.slane %v7410_v63, 4  ;;  %v7454_v3 = vperm.slane %v1935_v18, %v5403_v31 }
 0x222   :  { %v1530_v47 = vsel %vm106_vm0, %v7115_v6, %v9558_v45  ;;  %4848 = vrot.lane.b32.xlu0 %v4847_v25, %s5314_s1  ;;  %v7457_v24 = vperm.slane %v1991_v52, %v5403_v31  ;;  %v9559_v39 = vrot.slane %v6959_v1, 4  ;;  %v7463_v6 = vpop.permute.xlu2 %4678  ;;  %v7466_v45 = vperm.slane %v2141_v55, %v5403_v31 }
 0x223   :  { %v2197_v62 = vsel %vm106_vm0, %v7407_v23, %v2196_v22  ;;  %v4651_v18 = vunpack.i.h.bf16 %v7369_v8  ;;  %v4650_v60 = vunpack.i.l.bf16 %v7369_v8  ;;  %4813 = vrot.lane.b32.xlu2 %v4812_v5, %s5316_s26  ;;  %v2550_v55 = vsel %vm611_vm9, %v7279_v20, %v4581_v59  ;;  %v9562_v59 = vld [vmem:[#allocation34_spill] sm:$0xff] }
 0x224   :  { %v1586_v41 = vsel %vm106_vm0, %v7108_v53, %v9559_v39  ;;  %v7474_v1 = vperm.slane %v2197_v62, %v5403_v31  ;;  %v2543_v53 = vsel %vm611_vm9, %v7304_v13, %v4580_v35  ;;  %v7481_v52 = vperm.slane %v1530_v47, %v5403_v31  ;;  %v9563_v39 = vld [vmem:[#allocation33_spill] sm:$0xff] }
 0x225   :  { %v7484_v22 = vperm.slane %v1586_v41, %v5403_v31  ;;  %v7487_v8 = vsel %vm613_vm10, %v2543_v53, %v4650_v60  ;;  %v7490_v5 = vsel %vm613_vm10, %v2550_v55, %v4651_v18  ;;  %v2002_v25 = vrot.slane %v7100_v38, 4  ;;  %v9565_v55 = vld [vmem:[#allocation53_spill] sm:$0xff] }
 0x226   :  { %9560 = vst [vmem:[#allocation58_spill] sm:$0xff] %v7487_v8  ;;  %v2193_v13 = vperm.slane %v7299_v21, %v5384_v10  ;;  %v4616_v35 = vunpack.i.h.bf16 %v7353_v57  ;;  %v4615_v20 = vunpack.i.l.bf16 %v7353_v57  ;;  %v1254_v47 = vsel %vm605_vm6, %v9562_v59, %v4666_v7 }
 0x227   :  { %9561 = vst [vmem:[#allocation45_spill] sm:$0xff] %v7490_v5  ;;  %v1247_v41 = vsel %vm605_vm6, %v9563_v39, %v4665_v29  ;;  %v4842_v62 = vpack.i.bf16 %v7457_v24, %v7454_v3  ;;  %v2153_v18 = vsel %vm106_vm0, %v7323_v33, %v2152_v26  ;;  %v4857_v38 = vpack.i.bf16 %v7474_v1, %v7466_v45  ;;  %v9564_v29 = vld [vmem:[#allocation52_spill] sm:$0xff]  ;;  %v7515_v26 = vpop.permute.xlu0 %4653 }
 0x228   :  { %v1255_v21 = vsel %vm607_vm7, %v1254_v47, %v4616_v35  ;;  %v1248_v60 = vsel %vm607_vm7, %v1247_v41, %v4615_v20  ;;  %v2209_v57 = vsel %vm106_vm0, %v2193_v13, %v2208_v9  ;;  %v4837_v7 = vpack.i.bf16 %v7484_v22, %v7481_v52  ;;  %9566 = vst [vmem:[#allocation43_spill] sm:$0xff] %v7515_v26 }
 0x229   :  { %4843 = vrot.lane.b32.xlu1 %v4842_v62, %s5316_s26  ;;  %v2638_v53 = vrot.slane %v9564_v29, 4  ;;  %v2694_v59 = vrot.slane %v9565_v55, 4  ;;  %v4671_v39 = vunpack.i.h.bf16 %v4669_v50  ;;  %v7519_v35 = vperm.slane %v2153_v18, %v5403_v31  ;;  %v7533_v18 = vpop.permute.xlu1 %4683 }
 0x22a   :  { %4858 = vrot.lane.b32.xlu0 %v4857_v38, %s5316_s26  ;;  %v9567_v20 = vrot.slane %v7058_v15, 4  ;;  %v2003_v47 = vsel %vm106_vm0, %v7211_v46, %v2002_v25  ;;  %v4670_v41 = vunpack.i.l.bf16 %v4669_v50  ;;  %v7528_v62 = vperm.slane %v2209_v57, %v5403_v31 }
 0x22b   :  { %v2639_v29 = vsel %vm106_vm0, 0.0, %v2638_v53  ;;  %v2695_v55 = vsel %vm106_vm0, 0.0, %v2694_v59  ;;  %v1256_v38 = vsel %vm609_vm8, %v1255_v21, %v4671_v39  ;;  %4838 = vrot.lane.b32.xlu2 %v4837_v7, %s5315_s25  ;;  %v2150_v46 = vrot.slane %v7323_v33, 4  ;;  %v9568_v59 = vld [vmem:[#allocation55_spill] sm:$0xff] }
 0x22c   :  { %v1947_v9 = vsel %vm106_vm0, %v7219_v61, %v9567_v20  ;;  %v4877_v15 = vpack.i.bf16 %v2695_v55, %v2639_v29  ;;  %v1249_v61 = vsel %vm609_vm8, %v1248_v60, %v4670_v41  ;;  %v7537_v20 = vpop.permute.xlu2 %4693  ;;  %v7544_v25 = vperm.slane %v2003_v47, %v5403_v31  ;;  %v9569_v41 = vld [vmem:[#allocation56_spill] sm:$0xff] }
 0x22d   :  { %v7541_v50 = vperm.slane %v1947_v9, %v5403_v31  ;;  %v2842_v57 = vrot.slane %v7023_v58, 4  ;;  %v2898_v21 = vrot.slane %v7026_v11, 4  ;;  %v1365_v53 = vrot.slane %v9549_v56, 4 }
 0x22e   :  { %v2206_v7 = vrot.slane %v2193_v13, 4  ;;  %v4867_v60 = vpack.i.bf16 %v7528_v62, %v7519_v35  ;;  %v2636_v39 = vrot.slane %v9568_v59, 4  ;;  %v2692_v33 = vrot.slane %v9569_v41, 4 }
 0x22f   :  { %v2843_v9 = vsel %vm106_vm0, 0.0, %v2842_v57  ;;  %v2899_v29 = vsel %vm106_vm0, 0.0, %v2898_v21  ;;  %v1309_v47 = vrot.slane %v7082_v17, 4  ;;  %v1571_v58 = vrot.slane %v7105_v42, 4  ;;  %v4674_v17 = vpop.permute.xlu0 %4673 }
 0x230   :  { %v1515_v11 = vrot.slane %v7111_v2, 4  ;;  %v4887_v56 = vpack.i.bf16 %v2899_v29, %v2843_v9  ;;  %v4621_v13 = vunpack.i.h.bf16 %v7032_v0  ;;  %v4852_v55 = vpack.i.bf16 %v7544_v25, %v7541_v50 }
 0x231   :  { %4868 = vrot.lane.b32.xlu1 %v4867_v60, %s5315_s25  ;;  %v2151_v57 = vsel %vm106_vm0, %v2150_v46, %v7382_v40  ;;  %v2846_v21 = vrot.slane %v7048_v30, 4  ;;  %v4620_v42 = vunpack.i.l.bf16 %v7032_v0  ;;  %v4631_v2 = vunpack.i.h.bf16 %v7124_v14 }
 0x232   :  { %4878 = vrot.lane.b32.xlu0 %v4877_v15, %s5311_s22  ;;  %v2207_v60 = vsel %vm106_vm0, %v2206_v7, %v7379_v27  ;;  %v2902_v59 = vrot.slane %v7051_v48, 4  ;;  %v4630_v41 = vunpack.i.l.bf16 %v7124_v14  ;;  %v2637_v15 = vsel %vm106_vm0, 0.0, %v2636_v39  ;;  %v7582_v48 = vpop.permute.xlu1 %4698 }
 0x233   :  { %4853 = vrot.lane.b32.xlu2 %v4852_v55, %s5315_s25  ;;  %v2693_v40 = vsel %vm106_vm0, 0.0, %v2692_v33  ;;  %v2847_v30 = vsel %vm106_vm0, 0.0, %v2846_v21  ;;  %v4626_v46 = vunpack.i.h.bf16 %v7236_v37  ;;  %v4625_v0 = vunpack.i.l.bf16 %v7236_v37 }
 0x234   :  { %v7579_v9 = vperm.slane %v2151_v57, %v5403_v31  ;;  %v2903_v27 = vsel %vm106_vm0, 0.0, %v2902_v59  ;;  %v7585_v14 = vperm.slane %v2207_v60, %v5403_v31  ;;  %v4686_v7 = vunpack.i.h.bf16 %v7533_v18  ;;  %v7589_v33 = vpop.permute.xlu2 %4708 }
 0x235   :  { %v4685_v39 = vunpack.i.l.bf16 %v7533_v18  ;;  %v4897_v29 = vpack.i.bf16 %v2903_v27, %v2847_v30  ;;  %v4872_v55 = vpack.i.bf16 %v2693_v40, %v2637_v15  ;;  %v4676_v21 = vunpack.i.h.bf16 %v4674_v17 }
 0x236   :  { %v4675_v37 = vunpack.i.l.bf16 %v4674_v17  ;;  %v1250_v57 = vsel %vm611_vm9, %v1249_v61, %v4620_v42  ;;  %v1335_v5 = vrot.slane %v7397_v43, 4  ;;  %v1391_v59 = vrot.slane %v7400_v4, 4  ;;  %v9570_v4 = vld [vmem:[#allocation31_spill] sm:$0xff]  ;;  %v9571_v42 = vld [vmem:[#allocation38_spill] sm:$0xff] }
 0x237   :  { %v1257_v60 = vsel %vm611_vm9, %v1256_v38, %v4621_v13  ;;  %v1310_v15 = vsel %vm106_vm0, %v1309_v47, %v9545_v16  ;;  %v1366_v17 = vsel %vm106_vm0, %v1365_v53, %v9547_v34  ;;  %v4862_v43 = vpack.i.bf16 %v7585_v14, %v7579_v9  ;;  %v9572_v16 = vld [vmem:[#allocation40_spill] sm:$0xff]  ;;  %v4689_v27 = vpop.permute.xlu0 %4688 }
 0x238   :  { %v1251_v8 = vsel %vm613_vm10, %v1250_v57, %v4675_v37  ;;  %v1258_v18 = vsel %vm613_vm10, %v1257_v60, %v4676_v21  ;;  %v1870_v38 = vsel %vm605_vm6, %v9570_v4, %v4685_v39  ;;  %v2640_v40 = vrot.slane %v9571_v42, 4 }
 0x239   :  { %4873 = vrot.lane.b32.xlu1 %v4872_v55, %s5313_s24  ;;  %v7608_v61 = vsel %vm615_vm11, %v1251_v8, %v4625_v0  ;;  %v7611_v13 = vsel %vm615_vm11, %v1258_v18, %v4626_v46  ;;  %v2696_v47 = vrot.slane %v9572_v16, 4  ;;  %v1516_v34 = vsel %vm106_vm0, %v1515_v11, %v6977_v12 }
 0x23a   :  { %4888 = vrot.lane.b32.xlu0 %v4887_v56, %s5313_s24  ;;  %v1572_v53 = vsel %vm106_vm0, %v1571_v58, %v9544_v49  ;;  %v9573_v56 = vld [vmem:[#allocation32_spill] sm:$0xff]  ;;  %v1336_v8 = vsel %vm106_vm0, 0.0, %v1335_v5  ;;  %v7624_v46 = vperm.slane %v1310_v15, %v5403_v31  ;;  %v7627_v0 = vperm.slane %v1366_v17, %v5403_v31  ;;  %v7640_v55 = vpop.permute.xlu1 %4713 }
 0x23b   :  { %4863 = vrot.lane.b32.xlu2 %v4862_v43, %s5314_s1  ;;  %v1877_v30 = vsel %vm605_vm6, %v9573_v56, %v4686_v7  ;;  %v1392_v39 = vsel %vm106_vm0, 0.0, %v1391_v59  ;;  %v7631_v12 = vperm.slane %v1516_v34, %v5403_v31  ;;  %v7634_v49 = vperm.slane %v1572_v53, %v5403_v31 }
 0x23c   :  { %v1871_v58 = vsel %vm607_vm7, %v1870_v38, %v4630_v41  ;;  %v4636_v11 = vunpack.i.h.bf16 %v7289_v36  ;;  %v2641_v5 = vsel %vm106_vm0, 0.0, %v2640_v40  ;;  %v2697_v7 = vsel %vm106_vm0, 0.0, %v2696_v47  ;;  %v7643_v59 = vpop.permute.xlu2 %4718  ;;  %v9574_v40 = vld [vmem:[#allocation50_spill] sm:$0xff]  ;;  %v9575_v47 = vld [vmem:[#allocation51_spill] sm:$0xff] }
 0x23d   :  { %v1878_v21 = vsel %vm607_vm7, %v1877_v30, %v4631_v2  ;;  %v4691_v37 = vunpack.i.h.bf16 %v4689_v27  ;;  %v4907_v57 = vpack.i.bf16 %v1392_v39, %v1336_v8  ;;  %v1333_v60 = vrot.slane %v7624_v46, 4 }
 0x23e   :  { %v1389_v18 = vrot.slane %v7627_v0, 4  ;;  %v4690_v15 = vunpack.i.l.bf16 %v4689_v27  ;;  %v4635_v41 = vunpack.i.l.bf16 %v7289_v36  ;;  %v1539_v17 = vrot.slane %v7631_v12, 4 }
 0x23f   :  { %v1595_v43 = vrot.slane %v7634_v49, 4  ;;  %v1879_v4 = vsel %vm609_vm8, %v1878_v21, %v4691_v37  ;;  %v4882_v2 = vpack.i.bf16 %v2697_v7, %v2641_v5  ;;  %v2844_v16 = vrot.slane %v9574_v40, 4 }
 0x240   :  { %v7654_v38 = vsel %vm611_vm9, %v1879_v4, %v4636_v11  ;;  %v1872_v42 = vsel %vm609_vm8, %v1871_v58, %v4690_v15  ;;  %v2900_v36 = vrot.slane %v9575_v47, 4  ;;  %v1334_v34 = vsel %vm106_vm0, 0.0, %v1333_v60  ;;  %v9576_v15 = vld [vmem:[#allocation63_spill] sm:$0xff] }
 0x241   :  { %4898 = vrot.lane.b32.xlu1 %v4897_v29, %s5312_s23  ;;  %v7660_v29 = vsel %vm611_vm9, %v1872_v42, %v4635_v41  ;;  %v1390_v53 = vsel %vm106_vm0, 0.0, %v1389_v18  ;;  %v1540_v56 = vsel %vm106_vm0, 0.0, %v1539_v17  ;;  %v1596_v30 = vsel %vm106_vm0, 0.0, %v1595_v43  ;;  %v7681_v18 = vpop.permute.xlu0 %4703  ;;  %v9577_v41 = vld [vmem:[#allocation44_spill] sm:$0xff] }
 0x242   :  { %4908 = vrot.lane.b32.xlu0 %v4907_v57, %s5313_s24  ;;  %v1988_v8 = vrot.slane %v7157_v54, 4  ;;  %v1932_v27 = vrot.slane %v7214_v19, 4  ;;  %v4902_v39 = vpack.i.bf16 %v1390_v53, %v1334_v34  ;;  %v2845_v58 = vsel %vm106_vm0, 0.0, %v2844_v16  ;;  %v7676_v60 = vpop.permute.xlu1 %4723  ;;  %v9579_v53 = vld [vmem:[#allocation15_spill] sm:$0xff] }
 0x243   :  { %4883 = vrot.lane.b32.xlu2 %v4882_v2, %s5312_s23  ;;  %v2901_v11 = vsel %vm106_vm0, 0.0, %v2900_v36  ;;  %v4922_v5 = vpack.i.bf16 %v1596_v30, %v1540_v56  ;;  %v1339_v7 = vrot.slane %v7253_v51, 4  ;;  %v1395_v21 = vrot.slane %v7261_v32, 4  ;;  %v9580_v30 = vld [vmem:[#allocation18_spill] sm:$0xff] }
 0x244   :  { %v1545_v37 = vrot.slane %v7481_v52, 4  ;;  %v1601_v57 = vrot.slane %v7484_v22, 4  ;;  %v4892_v54 = vpack.i.bf16 %v2901_v11, %v2845_v58  ;;  %v7679_v19 = vpop.permute.xlu2 %4738  ;;  %v1933_v51 = vsel %vm106_vm0, %v1932_v27, %v9576_v15  ;;  %v9578_v52 = vld [vmem:[#allocation46_spill] sm:$0xff]  ;;  %v9581_v11 = vld [vmem:[#allocation48_spill] sm:$0xff] }
 0x245   :  { %v1989_v32 = vsel %vm106_vm0, %v1988_v8, %v7097_v44  ;;  %v1337_v17 = vrot.slane %v9577_v41, 4  ;;  %v1393_v43 = vrot.slane %v9578_v52, 4  ;;  %v1340_v22 = vsel %vm106_vm0, 0.0, %v1339_v7  ;;  %v9582_v7 = vld [vmem:[#allocation19_spill] sm:$0xff] }
 0x246   :  { %v1396_v4 = vsel %vm106_vm0, 0.0, %v1395_v21  ;;  %v1546_v2 = vsel %vm106_vm0, 0.0, %v1545_v37  ;;  %v1602_v42 = vsel %vm106_vm0, 0.0, %v1601_v57  ;;  %v7695_v40 = vperm.slane %v1933_v51, %v5403_v31 }
 0x247   :  { %v7698_v16 = vperm.slane %v1989_v32, %v5403_v31  ;;  %v4917_v44 = vpack.i.bf16 %v1396_v4, %v1340_v22  ;;  %v1338_v47 = vsel %vm106_vm0, 0.0, %v1337_v17  ;;  %v1394_v36 = vsel %vm106_vm0, 0.0, %v1393_v43  ;;  %v9584_v22 = vld [vmem:[#allocation20_spill] sm:$0xff] }
 0x248   :  { %v4937_v34 = vpack.i.bf16 %v1602_v42, %v1546_v2  ;;  %v1543_v56 = vrot.slane %v9579_v53, 4  ;;  %v1599_v8 = vrot.slane %v9580_v30, 4  ;;  %v1956_v27 = vrot.slane %v7695_v40, 4  ;;  %v9585_v2 = vld [vmem:[#allocation36_spill] sm:$0xff] }
 0x249   :  { %4903 = vrot.lane.b32.xlu1 %v4902_v39, %s5317_s29  ;;  %v2012_v39 = vrot.slane %v7698_v16, 4  ;;  %v4912_v58 = vpack.i.bf16 %v1394_v36, %v1338_v47  ;;  %v1597_v21 = vrot.slane %v9582_v7, 4  ;;  %v2168_v57 = vrot.slane %v7519_v35, 4 }
 0x24a   :  { %4923 = vrot.lane.b32.xlu0 %v4922_v5, %s5317_s29  ;;  %v1541_v5 = vrot.slane %v9581_v11, 4  ;;  %v7710_v37 = vpop.permute.xlu1 %4743  ;;  %v1544_v51 = vsel %vm106_vm0, 0.0, %v1543_v56  ;;  %v1600_v32 = vsel %vm106_vm0, 0.0, %v1599_v8  ;;  %v2138_v17 = vrot.slane %v7404_v28, 4  ;;  %v9586_v11 = vld [vmem:[#allocation49_spill] sm:$0xff] }
 0x24b   :  { %4893 = vrot.lane.b32.xlu2 %v4892_v54, %s5311_s22  ;;  %9583 = vst [vmem:[#allocation57_spill] sm:$0xff] %v7710_v37  ;;  %v2224_v54 = vrot.slane %v7528_v62, 4  ;;  %v1957_v52 = vsel %vm106_vm0, 0.0, %v1956_v27  ;;  %v2013_v43 = vsel %vm106_vm0, 0.0, %v2012_v39  ;;  %v7725_v35 = vsel %vm106_vm0, 0.0, %v2168_v57 }
 0x24c   :  { %v7715_v15 = vpop.permute.xlu2 %4748  ;;  %v2194_v62 = vrot.slane %v7407_v23, 4  ;;  %v1960_v4 = vrot.slane %v9584_v22, 4  ;;  %v2016_v42 = vrot.slane %v9585_v2, 4  ;;  %v4932_v47 = vpack.i.bf16 %v1600_v32, %v1544_v51 }
 0x24d   :  { %v7719_v41 = vpop.permute.xlu0 %4728  ;;  %v1542_v36 = vsel %vm106_vm0, 0.0, %v1541_v5  ;;  %v1598_v28 = vsel %vm106_vm0, 0.0, %v1597_v21  ;;  %v4942_v53 = vpack.i.bf16 %v2013_v43, %v1957_v52  ;;  %v1958_v56 = vrot.slane %v7454_v3, 4 }
 0x24e   :  { %v1962_v23 = vrot.slane %v7541_v50, 4  ;;  %v2018_v30 = vrot.slane %v7544_v25, 4  ;;  %v4927_v8 = vpack.i.bf16 %v1598_v28, %v1542_v36  ;;  %v1961_v27 = vsel %vm106_vm0, 0.0, %v1960_v4  ;;  %v9587_v25 = vld [vmem:[#allocation27_spill] sm:$0xff]  ;;  %v9588_v36 = vld [vmem:[#allocation65_spill] sm:$0xff]  ;;  %v9589_v28 = vld [vmem:[#allocation64_spill] sm:$0xff] }
 0x24f   :  { %v2017_v39 = vsel %vm106_vm0, 0.0, %v2016_v42  ;;  %v2139_v5 = vsel %vm106_vm0, %v2138_v17, %v9586_v11  ;;  %v2195_v3 = vsel %vm106_vm0, %v2194_v62, %v7410_v63  ;;  %v1959_v50 = vsel %vm106_vm0, 0.0, %v1958_v56 }
 0x250   :  { %v3020_v7 = vrot.slane %v9587_v25, 4  ;;  %v4952_v21 = vpack.i.bf16 %v2017_v39, %v1961_v27  ;;  %v1963_v57 = vsel %vm106_vm0, 0.0, %v1962_v23  ;;  %v2220_v63 = vrot.slane %v7474_v1, 4  ;;  %v9590_v27 = vld [vmem:[#allocation25_spill] sm:$0xff] }
 0x251   :  { %4918 = vrot.lane.b32.xlu1 %v4917_v44, %s5312_s23  ;;  %v7731_v44 = vsel %vm106_vm0, 0.0, %v2224_v54  ;;  %v2019_v54 = vsel %vm106_vm0, 0.0, %v2018_v30  ;;  %v7760_v43 = vperm.slane %v2139_v5, %v5403_v31  ;;  %v7763_v62 = vperm.slane %v2195_v3, %v5403_v31  ;;  %v9591_v5 = vld [vmem:[#allocation29_spill] sm:$0xff] }
 0x252   :  { %4938 = vrot.lane.b32.xlu0 %v4937_v34, %s5312_s23  ;;  %v4982_v34 = vpack.i.bf16 %v7731_v44, %v7725_v35  ;;  %v2166_v1 = vrot.slane %v7579_v9, 4  ;;  %v2222_v56 = vrot.slane %v7585_v14, 4  ;;  %v3021_v39 = vsel %vm106_vm0, %v9590_v27, %v3020_v7 }
 0x253   :  { %4913 = vrot.lane.b32.xlu2 %v4912_v58, %s5311_s22  ;;  %v2014_v58 = vrot.slane %v7457_v24, 4  ;;  %v2164_v24 = vrot.slane %v7466_v45, 4  ;;  %v2221_v11 = vsel %vm106_vm0, 0.0, %v2220_v63  ;;  %v2162_v9 = vrot.slane %v7760_v43, 4 }
 0x254   :  { %v2218_v14 = vrot.slane %v7763_v62, 4  ;;  %v3008_v3 = vrot.slane %v9591_v5, 4 }
 0x255   :  { %v2015_v17 = vsel %vm106_vm0, 0.0, %v2014_v58  ;;  %v2165_v58 = vsel %vm106_vm0, 0.0, %v2164_v24  ;;  %v3029_v24 = vperm.slane %v3021_v39, %v5384_v10  ;;  %v2163_v63 = vsel %vm106_vm0, 0.0, %v2162_v9 }
 0x256   :  { %v7754_v51 = vpop.permute.xlu1 %4753  ;;  %v4947_v23 = vpack.i.bf16 %v2015_v17, %v1959_v50  ;;  %v2167_v50 = vsel %vm106_vm0, 0.0, %v2166_v1  ;;  %v9595_v1 = vld [vmem:[#allocation68_spill] sm:$0xff] }
 0x257   :  { %v3042_v9 = vrot.slane %v3029_v24, 4 }
 0x259   :  { %4933 = vrot.lane.b32.xlu1 %v4932_v47, %s5311_s22  ;;  %v4957_v47 = vpack.i.bf16 %v2019_v54, %v1963_v57  ;;  %v4967_v54 = vpack.i.bf16 %v2221_v11, %v2165_v58 }
 0x25a   :  { %4943 = vrot.lane.b32.xlu0 %v4942_v53, %s5317_s29  ;;  %v4734_v52 = vpop.permute.xlu0 %4733 }
 0x25b   :  { %4928 = vrot.lane.b32.xlu2 %v4927_v8, %s5313_s24  ;;  %v4736_v2 = vunpack.i.h.bf16 %v4734_v52  ;;  %v4735_v42 = vunpack.i.l.bf16 %v4734_v52 }
 0x25c   :  { %v4764_v32 = vpop.permute.xlu2 %4763 }
 0x25d   :  { %v4766_v22 = vunpack.i.h.bf16 %v4764_v32  ;;  %v4765_v4 = vunpack.i.l.bf16 %v4764_v32  ;;  %v9592_v32 = vld [vmem:[#allocation23_spill] sm:$0xff] }
 0x25e   :  { %v3009_v7 = vsel %vm106_vm0, %v9592_v32, %v3008_v3  ;;  %v9597_v3 = vld [vmem:[#allocation13_spill] sm:$0xff] }
 0x25f   :  { %v2761_v45 = vsel %vm605_vm6, %v9588_v36, %v4766_v22  ;;  %v2754_v53 = vsel %vm605_vm6, %v9589_v28, %v4765_v4  ;;  %v2219_v22 = vsel %vm106_vm0, 0.0, %v2218_v14  ;;  %v4706_v4 = vunpack.i.h.bf16 %v7681_v18  ;;  %v9593_v36 = vld [vmem:[#allocation14_spill] sm:$0xff]  ;;  %v9594_v28 = vld [vmem:[#allocation16_spill] sm:$0xff] }
 0x260   :  { %v7774_v30 = vsel %vm607_vm7, %v2761_v45, %v4736_v2  ;;  %v7777_v8 = vsel %vm607_vm7, %v2754_v53, %v4735_v42  ;;  %v4705_v2 = vunpack.i.l.bf16 %v7681_v18  ;;  %v3041_v45 = vperm.slane %v9593_v36, %v5403_v31  ;;  %v5247_v36 = vld [vmem:[#allocation2 + $0xb0] sm:$0xff] }
 0x261   :  { %4953 = vrot.lane.b32.xlu1 %v4952_v21, %s5311_s22  ;;  %v2223_v21 = vsel %vm106_vm0, 0.0, %v2222_v56  ;;  %v4962_v39 = vpack.i.bf16 %v2219_v22, %v2163_v63 }
 0x262   :  { %4958 = vrot.lane.b32.xlu0 %v4957_v47, %s5312_s23  ;;  %v4972_v42 = vpack.i.bf16 %v2223_v21, %v2167_v50  ;;  %v3056_v14 = vrot.slane %v3041_v45, 4  ;;  %v7814_v50 = vperm.slane %v9597_v3, %v5403_v31 }
 0x263   :  { %4948 = vrot.lane.b32.xlu2 %v4947_v23, %s5313_s24  ;;  %v7796_v47 = vpop.permute.xlu1 %4768  ;;  %v3017_v23 = vperm.slane %v3009_v7, %v5384_v10  ;;  %v4740_v10 = vunpack.i.l.bf16 %v7679_v19 }
 0x264   :  { %v4774_v57 = vpop.permute.xlu2 %4773  ;;  %9598 = vst [vmem:[#allocation33_spill] sm:$0xff] %v7814_v50  ;;  %v4977_v7 = vpack.i.bf16 %v7814_v50, %v3041_v45  ;;  %v5256_v50 = vld [vmem:[#allocation2 + $0x68] sm:$0xff] }
 0x265   :  { %v4776_v17 = vunpack.i.h.bf16 %v4774_v57  ;;  %v4775_v52 = vunpack.i.l.bf16 %v4774_v57  ;;  %v7807_v18 = vpop.permute.xlu0 %4758  ;;  %v3043_v21 = vsel %vm106_vm0, %v3042_v9, %v3017_v23  ;;  %v3601_v26 = vrot.slane %v5256_v50, 2 }
 0x266   :  { %9596 = vst [vmem:[#allocation34_spill] sm:$0xff] %v7807_v18  ;;  %v5255_v18 = vld [vmem:[#allocation2 + $0x60] sm:$0xff] }
 0x267   :  { %v833_v53 = vsel %vm605_vm6, %v9594_v28, %v4776_v17  ;;  %v826_v56 = vsel %vm605_vm6, %v9595_v1, %v4775_v52  ;;  %v3044_v17 = vrot.slane %v3017_v23, 4  ;;  %v3049_v52 = vperm.slane %v3043_v21, %v5403_v31 }
 0x268   :  { %v827_v58 = vsel %vm607_vm7, %v826_v56, %v4705_v2  ;;  %v834_v11 = vsel %vm607_vm7, %v833_v53, %v4706_v4  ;;  %v5246_v2 = vld [vmem:[#allocation2 + $0xa8] sm:$0xff]  ;;  %v3616_v28 = vrot.slane %v5247_v36, 2  ;;  %v4711_v53 = vunpack.i.h.bf16 %v7589_v33 }
 0x269   :  { %4968 = vrot.lane.b32.xlu1 %v4967_v54, %s5313_s24  ;;  %v3057_v54 = vsel %vm106_vm0, 0.0, %v3056_v14  ;;  %v4710_v1 = vunpack.i.l.bf16 %v7589_v33  ;;  %v3045_v56 = vsel %vm106_vm0, %v3029_v24, %v3044_v17  ;;  %v3058_v23 = vrot.slane %v3049_v52, 4  ;;  %v5248_v17 = vld [vmem:[#allocation2 + $0xb8] sm:$0x3] }
 0x26a   :  { %4973 = vrot.lane.b32.xlu0 %v4972_v42, %s5311_s22  ;;  %v3615_v42 = vrot.slane %v5246_v2, 2  ;;  %v4716_v21 = vunpack.i.h.bf16 %v7640_v55  ;;  %v3053_v24 = vperm.slane %v3045_v56, %v5403_v31  ;;  %v3600_v37 = vrot.slane %v5255_v18, 2 }
 0x26b   :  { %4963 = vrot.lane.b32.xlu2 %v4962_v39, %s5317_s29 }
 0x26c   :  { %v7817_v57 = vpop.permute.xlu2 %4788 }
 0x26e   :  { %v4779_v63 = vpop.permute.xlu1 %4778 }
 0x26f   :  { %v4781_v22 = vunpack.i.h.bf16 %v4779_v63  ;;  %v4780_v4 = vunpack.i.l.bf16 %v4779_v63  ;;  %v3059_v63 = vsel %vm106_vm0, 0.0, %v3058_v23  ;;  %v4721_v23 = vunpack.i.h.bf16 %v7643_v59 }
 0x271   :  { %3127 = vrot.lane.b32.xlu1 %v3057_v54, %s5313_s24  ;;  %v4784_v45 = vpop.permute.xlu0 %4783  ;;  %v828_v39 = vsel %vm609_vm8, %v827_v58, %v4780_v4  ;;  %v835_v9 = vsel %vm609_vm8, %v834_v11, %v4781_v22  ;;  %v4715_v54 = vunpack.i.l.bf16 %v7640_v55  ;;  %v3618_v55 = vrot.slane %v5248_v17, 2  ;;  %v5249_v17 = vld [vmem:[#allocation2 + $0x98] sm:$0xff] }
 0x272   :  { %4978 = vrot.lane.b32.xlu0 %v4977_v7, %s5316_s26  ;;  %v4786_v14 = vunpack.i.h.bf16 %v4784_v45  ;;  %v4785_v3 = vunpack.i.l.bf16 %v4784_v45  ;;  %v829_v7 = vsel %vm611_vm9, %v828_v39, %v4710_v1  ;;  %v836_v35 = vsel %vm611_vm9, %v835_v9, %v4711_v53  ;;  %v9601_v45 = vld [vmem:[#allocation26_spill] sm:$0xff] }
 0x273   :  { %4983 = vrot.lane.b32.xlu2 %v4982_v34, %s5312_s23  ;;  %v7852_v22 = vsel %vm1673_vm4, %v3615_v42, %v3616_v28  ;;  %v7855_v4 = vsel %vm1673_vm4, %v3616_v28, %v3618_v55  ;;  %v7860_v56 = vpack.i.bf16 %v9601_v45, %v9590_v27  ;;  %v4720_v39 = vunpack.i.l.bf16 %v7643_v59  ;;  %v9602_v28 = vld [vmem:[#allocation67_spill] sm:$0xff] }
 0x274   :  { %v830_v44 = vsel %vm613_vm10, %v829_v7, %v4785_v3  ;;  %v837_v34 = vsel %vm613_vm10, %v836_v35, %v4786_v14  ;;  %9599 = vst [vmem:[#allocation52_spill] sm:$0xff] %v7852_v22  ;;  %v3060_v9 = vrot.slane %v3053_v24, 4  ;;  %v4987_v42 = vpack.i.bf16 %v7855_v4, %v7852_v22  ;;  %v9603_v3 = vld [vmem:[#allocation35_spill] sm:$0xff] }
 0x275   :  { %v7835_v33 = vpop.permute.xlu2 %4803  ;;  %v7843_v58 = vsel %vm615_vm11, %v830_v44, %v4715_v54  ;;  %v7846_v11 = vsel %vm615_vm11, %v837_v34, %v4716_v21  ;;  %9600 = vst [vmem:[#allocation53_spill] sm:$0xff] %v7855_v4  ;;  %v4726_v27 = vunpack.i.h.bf16 %v7676_v60  ;;  %v4725_v35 = vunpack.i.l.bf16 %v7676_v60  ;;  %v5251_v60 = vld [vmem:[#allocation2 + $0x78] sm:$0xff] }
 0x276   :  { %v3611_v55 = vrot.slane %v5249_v17, 2 }
 0x279   :  { %3139 = vrot.lane.b32.xlu1 %v3053_v24, %s5315_s25  ;;  %v4794_v2 = vpop.permute.xlu1 %4793  ;;  %v4799_v1 = vpop.permute.xlu0 %4798 }
 0x27a   :  { %3135 = vrot.lane.b32.xlu0 %v3059_v63, %s5311_s22  ;;  %v4796_v36 = vunpack.i.h.bf16 %v4794_v2  ;;  %v4795_v53 = vunpack.i.l.bf16 %v4794_v2  ;;  %v4801_v54 = vunpack.i.h.bf16 %v4799_v1  ;;  %v4800_v7 = vunpack.i.l.bf16 %v4799_v1  ;;  %v5250_v63 = vld [vmem:[#allocation2 + $0xa0] sm:$0x3] }
 0x27b   :  { %3131 = vrot.lane.b32.xlu2 %v3049_v52, %s5314_s1  ;;  %v3613_v2 = vrot.slane %v5250_v63, 2  ;;  %v3605_v1 = vrot.slane %v5251_v60, 2  ;;  %v4771_v63 = vunpack.i.h.bf16 %v7796_v47  ;;  %v4770_v60 = vunpack.i.l.bf16 %v7796_v47 }
 0x27c   :  { %v1039_v14 = vsel %vm605_vm6, %v9602_v28, %v4796_v36  ;;  %v1032_v52 = vsel %vm605_vm6, %v9603_v3, %v4795_v53  ;;  %v5253_v28 = vld [vmem:[#allocation2 + $0x90] sm:$0xff]  ;;  %v3061_v3 = vsel %vm106_vm0, 0.0, %v3060_v9  ;;  %v4750_v47 = vunpack.i.l.bf16 %v7715_v15 }
 0x27d   :  { %v7870_v21 = vpop.permute.xlu2 %4813  ;;  %v1033_v59 = vsel %vm607_vm7, %v1032_v52, %v4720_v39  ;;  %v1040_v44 = vsel %vm607_vm7, %v1039_v14, %v4721_v23  ;;  %v5252_v23 = vld [vmem:[#allocation2 + $0x80] sm:$0xff]  ;;  %v3610_v14 = vrot.slane %v5253_v28, 2 }
 0x27e   :  { %v1041_v34 = vsel %vm609_vm8, %v1040_v44, %v4801_v54  ;;  %v1034_v24 = vsel %vm609_vm8, %v1033_v59, %v4800_v7  ;;  %v3606_v39 = vrot.slane %v5252_v23, 2  ;;  %v5254_v54 = vld [vmem:[#allocation2 + $0x88] sm:$0x3]  ;;  %v7897_v59 = vsel %vm1673_vm4, %v3611_v55, %v3613_v2 }
 0x27f   :  { %v7879_v36 = vsel %vm611_vm9, %v1041_v34, %v4726_v27  ;;  %v7882_v53 = vsel %vm611_vm9, %v1034_v24, %v4725_v35  ;;  %v3608_v7 = vrot.slane %v5254_v54, 2  ;;  %v7894_v35 = vsel %vm1673_vm4, %v3610_v14, %v3611_v55  ;;  %9605 = vst [vmem:[#allocation56_spill] sm:$0xff] %v7897_v59  ;;  %v9610_v54 = vld [vmem:[#allocation24_spill] sm:$0xff] }
 0x280   :  { %9604 = vst [vmem:[#allocation55_spill] sm:$0xff] %v7894_v35  ;;  %v7900_v44 = vsel %vm1673_vm4, %v3605_v1, %v3606_v39  ;;  %v5007_v24 = vpack.i.bf16 %v7897_v59, %v7894_v35  ;;  %v9608_v1 = vld [vmem:[#allocation60_spill] sm:$0xff]  ;;  %v4751_v14 = vunpack.i.h.bf16 %v7715_v15  ;;  %v5257_v15 = vld [vmem:[#allocation2 + $0x70] sm:$0x3] }
 0x281   :  { %4993 = vrot.lane.b32.xlu1 %v7860_v56, %s5322_s30  ;;  %v7888_v52 = vpop.permute.xlu1 %4808  ;;  %v7891_v27 = vpop.permute.xlu0 %4823  ;;  %9606 = vst [vmem:[#allocation31_spill] sm:$0xff] %v7900_v44  ;;  %v7903_v34 = vsel %vm1673_vm4, %v3606_v39, %v3608_v7  ;;  %v2967_v23 = vsel %vm605_vm6, %v9608_v1, %v4771_v63  ;;  %v9609_v39 = vld [vmem:[#allocation59_spill] sm:$0xff]  ;;  %v5022_v7 = vpack.i.bf16 %v9610_v54, %v9592_v32  ;;  %v3603_v1 = vrot.slane %v5257_v15, 2 }
 0x282   :  { %4988 = vrot.lane.b32.xlu0 %v4987_v42, %s5322_s30  ;;  %9607 = vst [vmem:[#allocation38_spill] sm:$0xff] %v7903_v34  ;;  %v5002_v17 = vpack.i.bf16 %v7903_v34, %v7900_v44  ;;  %v2960_v28 = vsel %vm605_vm6, %v9609_v39, %v4770_v60  ;;  %v2968_v60 = vsel %vm607_vm7, %v2967_v23, %v4751_v14 }
 0x283   :  { %3143 = vrot.lane.b32.xlu2 %v3061_v3, %s5312_s23  ;;  %v2961_v63 = vsel %vm607_vm7, %v2960_v28, %v4750_v47  ;;  %v7946_v18 = vsel %vm1673_vm4, %v3601_v26, %v3603_v1  ;;  %v9617_v1 = vld [vmem:[#allocation17_spill] sm:$0xff] }
 0x284   :  { %9613 = vst [vmem:[#allocation32_spill] sm:$0xff] %v7946_v18  ;;  %v4595_v54 = vunpack.i.l.bf16 %v9617_v1 }
 0x285   :  { %v7905_v9 = vpop.permute.xlu2 %4838 }
 0x289   :  { %5008 = vrot.lane.b32.xlu1 %v5007_v24, %s5322_s30  ;;  %v7915_v55 = vpop.permute.xlu1 %4818 }
 0x28a   :  { %5003 = vrot.lane.b32.xlu0 %v5002_v17, %s5322_s30  ;;  %v7918_v2 = vpop.permute.xlu0 %4833 }
 0x28b   :  { %4998 = vrot.lane.b32.xlu2 %v4987_v42, %s5323_s5  ;;  %v9611_v42 = vld [vmem:[#allocation28_spill] sm:$0xff] }
 0x28c   :  { %v5017_v45 = vpack.i.bf16 %v9611_v42, %v9587_v25  ;;  %v7943_v25 = vsel %vm1673_vm4, %v3600_v37, %v3601_v26  ;;  %v9615_v26 = vld [vmem:[#allocation30_spill] sm:$0xff] }
 0x28d   :  { %v7926_v3 = vpop.permute.xlu2 %4853  ;;  %9612 = vst [vmem:[#allocation40_spill] sm:$0xff] %v7943_v25  ;;  %v5037_v23 = vpack.i.bf16 %v7946_v18, %v7943_v25  ;;  %v5052_v14 = vpack.i.bf16 %v9615_v26, %v9591_v5  ;;  %v9618_v42 = vld [vmem:[#allocation22_spill] sm:$0xff]  ;;  %v9619_v26 = vld [vmem:[#allocation21_spill] sm:$0xff] }
 0x291   :  { %5023 = vrot.lane.b32.xlu1 %v5022_v7, %s5322_s30 }
 0x292   :  { %5018 = vrot.lane.b32.xlu0 %v5017_v45, %s5322_s30  ;;  %v7936_v39 = vpop.permute.xlu1 %4828 }
 0x293   :  { %5013 = vrot.lane.b32.xlu2 %v7860_v56, %s5323_s5  ;;  %v4830_v59 = vunpack.i.l.bf16 %v7936_v39 }
 0x294   :  { %v7940_v32 = vpop.permute.xlu0 %4848 }
 0x295   :  { %v7948_v50 = vpop.permute.xlu2 %4863  ;;  %v4850_v35 = vunpack.i.l.bf16 %v7940_v32 }
 0x299   :  { %5038 = vrot.lane.b32.xlu1 %v5037_v23, %s5322_s30 }
 0x29a   :  { %5033 = vrot.lane.b32.xlu0 %v5007_v24, %s5323_s5 }
 0x29b   :  { %v7954_v28 = vpop.permute.xlu1 %4843  ;;  %5028 = vrot.lane.b32.xlu2 %v5002_v17, %s5323_s5  ;;  %v4596_v17 = vunpack.i.h.bf16 %v9617_v1 }
 0x29c   :  { %v7957_v56 = vpop.permute.xlu0 %4858 }
 0x29d   :  { %v7959_v37 = vpop.permute.xlu2 %4883  ;;  %v619_v5 = vsel %vm605_vm6, %v9618_v42, %v4596_v17 }
 0x29e   :  { %9614 = vst [vmem:[#allocation50_spill] sm:$0xff] %v7959_v37 }
 0x2a1   :  { %5053 = vrot.lane.b32.xlu1 %v5052_v14, %s5322_s30 }
 0x2a2   :  { %5048 = vrot.lane.b32.xlu0 %v5022_v7, %s5323_s5  ;;  %v606_v7 = vsel %vm605_vm6, %v9619_v26, %v4595_v54 }
 0x2a3   :  { %v7965_v47 = vpop.permute.xlu1 %4868  ;;  %5043 = vrot.lane.b32.xlu2 %v5017_v45, %s5323_s5 }
 0x2a4   :  { %v4879_v24 = vpop.permute.xlu0 %4878 }
 0x2a5   :  { %v7968_v15 = vpop.permute.xlu2 %4893  ;;  %v4881_v34 = vunpack.i.h.bf16 %v4879_v24 }
 0x2a6   :  { %9616 = vst [vmem:[#allocation51_spill] sm:$0xff] %v7968_v15  ;;  %v4741_v15 = vunpack.i.h.bf16 %v7679_v19 }
 0x2aa   :  { %5063 = vrot.lane.b32.xlu0 %v5052_v14, %s5323_s5  ;;  %v4880_v14 = vunpack.i.l.bf16 %v4879_v24 }
 0x2ab   :  { %v4874_v37 = vpop.permute.xlu1 %4873  ;;  %5058 = vrot.lane.b32.xlu2 %v5037_v23, %s5323_s5  ;;  %v4756_v23 = vunpack.i.h.bf16 %v7754_v51 }
 0x2ac   :  { %v4876_v31 = vunpack.i.h.bf16 %v4874_v37  ;;  %v4875_v45 = vunpack.i.l.bf16 %v4874_v37  ;;  %v4889_v18 = vpop.permute.xlu0 %4888  ;;  %v4755_v37 = vunpack.i.l.bf16 %v7754_v51 }
 0x2ad   :  { %v4891_v25 = vunpack.i.h.bf16 %v4889_v18  ;;  %v4890_v1 = vunpack.i.l.bf16 %v4889_v18  ;;  %v7984_v54 = vpop.permute.xlu2 %4913 }
 0x2ae   :  { %v2756_v44 = vsel %vm609_vm8, %v7777_v8, %v4875_v45  ;;  %v2763_v42 = vsel %vm609_vm8, %v7774_v30, %v4876_v31  ;;  %v9622_v30 = vld [vmem:[#allocation62_spill] sm:$0xff] }
 0x2af   :  { %v2757_v26 = vsel %vm611_vm9, %v2756_v44, %v4740_v10  ;;  %v2764_v19 = vsel %vm611_vm9, %v2763_v42, %v4741_v15  ;;  %v2969_v8 = vsel %vm609_vm8, %v2968_v60, %v4891_v25  ;;  %v2962_v31 = vsel %vm609_vm8, %v2961_v63, %v4890_v1  ;;  %v9627_v25 = vld [vmem:[#allocation54_spill] sm:$0xff] }
 0x2b0   :  { %v7991_v18 = vsel %vm613_vm10, %v2757_v26, %v4880_v14  ;;  %v7994_v24 = vsel %vm613_vm10, %v2764_v19, %v4881_v34  ;;  %v4561_v17 = vunpack.i.h.bf16 %v9622_v30  ;;  %v4560_v45 = vunpack.i.l.bf16 %v9622_v30  ;;  %v9626_v14 = vld [vmem:[#allocation39_spill] sm:$0xff]  ;;  %v9628_v26 = vld [vmem:[#allocation61_spill] sm:$0xff] }
 0x2b1   :  { %9620 = vst [vmem:[#allocation63_spill] sm:$0xff] %v7991_v18  ;;  %v8001_v51 = vsel %vm611_vm9, %v2969_v8, %v4756_v23  ;;  %v8004_v10 = vsel %vm611_vm9, %v2962_v31, %v4755_v37  ;;  %v4601_v63 = vunpack.i.h.bf16 %v9627_v25  ;;  %v4600_v1 = vunpack.i.l.bf16 %v9627_v25  ;;  %v9629_v8 = vld [vmem:[#allocation66_spill] sm:$0xff] }
 0x2b2   :  { %9621 = vst [vmem:[#allocation44_spill] sm:$0xff] %v7994_v24  ;;  %v620_v44 = vsel %vm607_vm7, %v619_v5, %v4561_v17  ;;  %v608_v15 = vsel %vm607_vm7, %v606_v7, %v4560_v45  ;;  %v9630_v17 = vld [vmem:[#allocation42_spill] sm:$0xff]  ;;  %v9631_v7 = vld [vmem:[#allocation37_spill] sm:$0xff]  ;;  %v4816_v24 = vunpack.i.h.bf16 %v7870_v21  ;;  %v4831_v19 = vunpack.i.h.bf16 %v7936_v39 }
 0x2b3   :  { %9623 = vst [vmem:[#allocation46_spill] sm:$0xff] %v8001_v51  ;;  %v8008_v34 = vpop.permute.xlu1 %4898  ;;  %v8021_v31 = vsel %vm609_vm8, %v620_v44, %v4601_v63  ;;  %v8024_v30 = vsel %vm609_vm8, %v608_v15, %v4600_v1  ;;  %v4815_v44 = vunpack.i.l.bf16 %v7870_v21  ;;  %v4836_v63 = vunpack.i.h.bf16 %v7918_v2 }
 0x2b4   :  { %9624 = vst [vmem:[#allocation15_spill] sm:$0xff] %v8004_v10  ;;  %v8013_v42 = vpop.permute.xlu0 %4908  ;;  %v4835_v1 = vunpack.i.l.bf16 %v7918_v2 }
 0x2b5   :  { %9625 = vst [vmem:[#allocation18_spill] sm:$0xff] %v8008_v34  ;;  %v4929_v25 = vpop.permute.xlu2 %4928  ;;  %v4820_v34 = vunpack.i.l.bf16 %v7915_v55 }
 0x2b6   :  { %v4931_v37 = vunpack.i.h.bf16 %v4929_v25  ;;  %v4930_v4 = vunpack.i.l.bf16 %v4929_v25 }
 0x2bb   :  { %v4904_v5 = vpop.permute.xlu1 %4903 }
 0x2bc   :  { %v4905_v60 = vunpack.i.l.bf16 %v4904_v5  ;;  %v4924_v18 = vpop.permute.xlu0 %4923  ;;  %v4906_v10 = vunpack.i.h.bf16 %v4904_v5  ;;  %v4851_v5 = vunpack.i.h.bf16 %v7940_v32 }
 0x2bd   :  { %v4926_v21 = vunpack.i.h.bf16 %v4924_v18  ;;  %v4925_v51 = vunpack.i.l.bf16 %v4924_v18  ;;  %v8055_v45 = vpop.permute.xlu2 %4948 }
 0x2be   :  { %v1453_v18 = vsel %vm605_vm6, %v7624_v46, %v4905_v60  ;;  %v1460_v25 = vsel %vm605_vm6, %v7627_v0, %v4906_v10  ;;  %v4910_v0 = vunpack.i.l.bf16 %v8013_v42  ;;  %v4950_v10 = vunpack.i.l.bf16 %v8055_v45 }
 0x2bf   :  { %v1666_v15 = vsel %vm605_vm6, %v7634_v49, %v4926_v21  ;;  %v1659_v2 = vsel %vm605_vm6, %v7631_v12, %v4925_v51  ;;  %v1454_v12 = vsel %vm607_vm7, %v1453_v18, %v4815_v44  ;;  %v4916_v44 = vunpack.i.h.bf16 %v7984_v54 }
 0x2c0   :  { %v1667_v23 = vsel %vm607_vm7, %v1666_v15, %v4831_v19  ;;  %v1660_v22 = vsel %vm607_vm7, %v1659_v2, %v4830_v59  ;;  %v4846_v59 = vunpack.i.h.bf16 %v7954_v28  ;;  %v4845_v15 = vunpack.i.l.bf16 %v7954_v28 }
 0x2c1   :  { %v1661_v46 = vsel %vm609_vm8, %v1660_v22, %v4930_v4  ;;  %v1668_v49 = vsel %vm609_vm8, %v1667_v23, %v4931_v37  ;;  %v4861_v2 = vunpack.i.h.bf16 %v7957_v56  ;;  %v4860_v4 = vunpack.i.l.bf16 %v7957_v56 }
 0x2c2   :  { %v1662_v21 = vsel %vm611_vm9, %v1661_v46, %v4835_v1  ;;  %v1669_v19 = vsel %vm611_vm9, %v1668_v49, %v4836_v63  ;;  %v1461_v37 = vsel %vm607_vm7, %v1460_v25, %v4816_v24  ;;  %v4915_v63 = vunpack.i.l.bf16 %v7984_v54 }
 0x2c3   :  { %v4919_v51 = vpop.permute.xlu1 %4918  ;;  %v4911_v1 = vunpack.i.h.bf16 %v8013_v42  ;;  %v1455_v28 = vsel %vm609_vm8, %v1454_v12, %v4910_v0  ;;  %v4951_v46 = vunpack.i.h.bf16 %v8055_v45 }
 0x2c4   :  { %v4939_v22 = vpop.permute.xlu0 %4938  ;;  %v4921_v23 = vunpack.i.h.bf16 %v4919_v51  ;;  %v4920_v24 = vunpack.i.l.bf16 %v4919_v51  ;;  %v1456_v12 = vsel %vm611_vm9, %v1455_v28, %v4820_v34  ;;  %v9634_v34 = vunpack.i.l.bf16 %v9631_v7 }
 0x2c5   :  { %v4964_v18 = vpop.permute.xlu2 %4963  ;;  %v1462_v56 = vsel %vm609_vm8, %v1461_v37, %v4911_v1  ;;  %v4941_v42 = vunpack.i.h.bf16 %v4939_v22  ;;  %v4940_v0 = vunpack.i.l.bf16 %v4939_v22  ;;  %v9632_v37 = vunpack.i.l.bf16 %v7537_v20 }
 0x2c6   :  { %v4966_v49 = vunpack.i.h.bf16 %v4964_v18  ;;  %v4965_v39 = vunpack.i.l.bf16 %v4964_v18  ;;  %v1457_v18 = vsel %vm613_vm10, %v1456_v12, %v4915_v63 }
 0x2c7   :  { %v1874_v45 = vsel %vm613_vm10, %v7660_v29, %v9632_v37  ;;  %v9636_v29 = vunpack.i.l.bf16 %v7582_v48 }
 0x2c8   :  { %v2289_v25 = vsel %vm605_vm6, %v7763_v62, %v4966_v49  ;;  %v2282_v54 = vsel %vm605_vm6, %v7760_v43, %v4965_v39  ;;  %v9633_v43 = vunpack.i.l.bf16 %v7891_v27  ;;  %v1875_v22 = vsel %vm615_vm11, %v1874_v45, %v9634_v34 }
 0x2c9   :  { %v8100_v60 = vsel %vm607_vm7, %v2282_v54, %v4860_v4  ;;  %v8108_v62 = vsel %vm607_vm7, %v2289_v25, %v4861_v2  ;;  %v9635_v4 = vunpack.i.h.bf16 %v7915_v55  ;;  %v8122_v2 = vsel %vm617_vm12, %v1875_v22, %v9636_v29 }
 0x2ca   :  { %v1458_v39 = vsel %vm615_vm11, %v1457_v18, %v9633_v43  ;;  %v9637_v18 = vunpack.i.h.bf16 %v7537_v20  ;;  %v9639_v34 = vunpack.i.h.bf16 %v9631_v7 }
 0x2cb   :  { %v4934_v51 = vpop.permute.xlu1 %4933  ;;  %v1463_v63 = vsel %vm611_vm9, %v1462_v56, %v9635_v4  ;;  %v1459_v4 = vsel %vm617_vm12, %v1458_v39, %v4920_v24 }
 0x2cc   :  { %v4936_v1 = vunpack.i.h.bf16 %v4934_v51  ;;  %v4935_v28 = vunpack.i.l.bf16 %v4934_v51  ;;  %v4944_v49 = vpop.permute.xlu0 %4943  ;;  %v1464_v12 = vsel %vm613_vm10, %v1463_v63, %v4916_v44  ;;  %v1881_v55 = vsel %vm613_vm10, %v7654_v38, %v9637_v18 }
 0x2cd   :  { %v4946_v25 = vunpack.i.h.bf16 %v4944_v49  ;;  %v4945_v54 = vunpack.i.l.bf16 %v4944_v49  ;;  %v8131_v45 = vpop.permute.xlu2 %4983  ;;  %v9638_v51 = vunpack.i.h.bf16 %v7891_v27  ;;  %v1882_v22 = vsel %vm615_vm11, %v1881_v55, %v9639_v34 }
 0x2ce   :  { %v1663_v56 = vsel %vm613_vm10, %v1662_v21, %v4935_v28  ;;  %v1670_v37 = vsel %vm613_vm10, %v1669_v19, %v4936_v1  ;;  %v9640_v44 = vunpack.i.l.bf16 %v7905_v9  ;;  %v9641_v38 = vunpack.i.h.bf16 %v7905_v9 }
 0x2cf   :  { %v1465_v43 = vsel %vm615_vm11, %v1464_v12, %v9638_v51  ;;  %v4986_v19 = vunpack.i.h.bf16 %v8131_v45  ;;  %v2083_v27 = vsel %vm605_vm6, %v7698_v16, %v4946_v25  ;;  %v2076_v7 = vsel %vm605_vm6, %v7695_v40, %v4945_v54 }
 0x2d0   :  { %v1664_v20 = vsel %vm615_vm11, %v1663_v56, %v9640_v44  ;;  %v1671_v21 = vsel %vm615_vm11, %v1670_v37, %v9641_v38  ;;  %v1466_v1 = vsel %vm617_vm12, %v1465_v43, %v4921_v23  ;;  %v2084_v28 = vsel %vm607_vm7, %v2083_v27, %v4846_v59 }
 0x2d1   :  { %v1665_v63 = vsel %vm617_vm12, %v1664_v20, %v4940_v0  ;;  %v2077_v9 = vsel %vm607_vm7, %v2076_v7, %v4845_v15  ;;  %v1672_v29 = vsel %vm617_vm12, %v1671_v21, %v4941_v42  ;;  %v2085_v24 = vsel %vm609_vm8, %v2084_v28, %v4951_v46 }
 0x2d2   :  { %v2310_v49 = vrot.slane %v1665_v63, 4  ;;  %v2078_v12 = vsel %vm609_vm8, %v2077_v9, %v4950_v10  ;;  %v9642_v16 = vunpack.i.h.bf16 %v7582_v48  ;;  %v2311_v40 = vrot.slane %v1672_v29, 4 }
 0x2d3   :  { %v4954_v25 = vpop.permute.xlu1 %4953  ;;  %v2079_v23 = vsel %vm611_vm9, %v2078_v12, %v4850_v35  ;;  %v2086_v59 = vsel %vm611_vm9, %v2085_v24, %v4851_v5  ;;  %v9643_v10 = vunpack.i.l.bf16 %v9628_v26  ;;  %v9644_v35 = vunpack.i.l.bf16 %v9629_v8 }
 0x2d4   :  { %v1883_v39 = vsel %vm617_vm12, %v1882_v22, %v9642_v16  ;;  %v8168_v15 = vsel %vm2320_vm13, %v1459_v4, %v2310_v49  ;;  %v4956_v46 = vunpack.i.h.bf16 %v4954_v25  ;;  %v4955_v42 = vunpack.i.l.bf16 %v4954_v25  ;;  %v4959_v0 = vpop.permute.xlu0 %4958 }
 0x2d5   :  { %v612_v48 = vsel %vm611_vm9, %v8024_v30, %v9643_v10  ;;  %v8175_v54 = vsel %vm2320_vm13, %v1466_v1, %v2311_v40  ;;  %v4961_v18 = vunpack.i.h.bf16 %v4959_v0  ;;  %v4960_v5 = vunpack.i.l.bf16 %v4959_v0  ;;  %v8189_v34 = vpop.permute.xlu2 %3131 }
 0x2d6   :  { %v614_v32 = vsel %vm613_vm10, %v612_v48, %v9644_v35  ;;  %v9645_v55 = vunpack.i.l.bf16 %v9626_v14  ;;  %v9646_v37 = vunpack.i.l.bf16 %v7817_v57  ;;  %v2080_v51 = vsel %vm613_vm10, %v2079_v23, %v4955_v42 }
 0x2d7   :  { %v2087_v43 = vsel %vm613_vm10, %v2086_v59, %v4956_v46  ;;  %v9647_v22 = vunpack.i.l.bf16 %v9630_v17  ;;  %v9648_v20 = vunpack.i.l.bf16 %v7835_v33  ;;  %v9649_v21 = vunpack.i.l.bf16 %v7926_v3 }
 0x2d8   :  { %v616_v56 = vsel %vm615_vm11, %v614_v32, %v9645_v55  ;;  %v832_v30 = vsel %vm617_vm12, %v7843_v58, %v9646_v37  ;;  %v9650_v58 = vunpack.i.h.bf16 %v7926_v3  ;;  %v9651_v7 = vunpack.i.l.bf16 %v7719_v41 }
 0x2d9   :  { %v618_v44 = vsel %vm617_vm12, %v616_v56, %v9647_v22  ;;  %v1036_v38 = vsel %vm613_vm10, %v7882_v53, %v9648_v20  ;;  %v2081_v4 = vsel %vm615_vm11, %v2080_v51, %v9649_v21  ;;  %v9652_v1 = vunpack.i.l.bf16 %v7463_v6 }
 0x2da   :  { %v2088_v27 = vsel %vm615_vm11, %v2087_v43, %v9650_v58  ;;  %v1037_v63 = vsel %vm615_vm11, %v1036_v38, %v9651_v7  ;;  %v2082_v9 = vsel %vm617_vm12, %v2081_v4, %v4960_v5  ;;  %v9653_v49 = vunpack.i.l.bf16 %v7888_v52  ;;  %v9665_v4 = vld [vmem:[#allocation41_spill] sm:$0xff] }
 0x2db   :  { %v1253_v28 = vsel %vm617_vm12, %v7608_v61, %v9652_v1  ;;  %v2089_v53 = vsel %vm617_vm12, %v2088_v27, %v4961_v18  ;;  %v2298_v3 = vrot.slane %v832_v30, 4  ;;  %v2316_v12 = vrot.slane %v2082_v9, 4 }
 0x2dc   :  { %v1038_v29 = vsel %vm617_vm12, %v1037_v63, %v9653_v49  ;;  %v2317_v24 = vrot.slane %v2089_v53, 4  ;;  %v2304_v16 = vrot.slane %v1253_v28, 4  ;;  %v9654_v40 = vunpack.i.h.bf16 %v9628_v26  ;;  %v4969_v26 = vpop.permute.xlu1 %4968 }
 0x2dd   :  { %v2321_v23 = vsel %vm2320_vm13, %v618_v44, %v2298_v3  ;;  %v9655_v61 = vunpack.i.h.bf16 %v9629_v8  ;;  %v9656_v10 = vunpack.i.h.bf16 %v7817_v57  ;;  %v9657_v46 = vunpack.i.h.bf16 %v7835_v33  ;;  %v3144_v43 = vpop.permute.xlu2 %3143 }
 0x2de   :  { %v622_v25 = vsel %vm611_vm9, %v8021_v31, %v9654_v40  ;;  %v2327_v31 = vsel %vm2320_vm13, %v8122_v2, %v2316_v12  ;;  %v2328_v0 = vsel %vm2320_vm13, %v1883_v39, %v2317_v24  ;;  %v2323_v8 = vsel %vm2320_vm13, %v1038_v29, %v2304_v16  ;;  %v9669_v40 = vld [vmem:[#allocation12_spill] sm:$0xff] }
 0x2df   :  { %v623_v59 = vsel %vm613_vm10, %v622_v25, %v9655_v61  ;;  %v839_v48 = vsel %vm617_vm12, %v7846_v11, %v9656_v10  ;;  %v1043_v42 = vsel %vm613_vm10, %v7879_v36, %v9657_v46  ;;  %v9658_v35 = vunpack.i.h.bf16 %v9626_v14  ;;  %v4974_v11 = vpop.permute.xlu0 %4973 }
 0x2e0   :  { %v4971_v32 = vunpack.i.h.bf16 %v4969_v26  ;;  %v4970_v18 = vunpack.i.l.bf16 %v4969_v26  ;;  %v2331_v33 = vpack.c.bf16 %v2327_v31, %v8168_v15  ;;  %v2332_v5 = vpack.c.bf16 %v2328_v0, %v8175_v54 }
 0x2e1   :  { %v624_v57 = vsel %vm615_vm11, %v623_v59, %v9658_v35  ;;  %v4976_v36 = vunpack.i.h.bf16 %v4974_v11  ;;  %v4975_v55 = vunpack.i.l.bf16 %v4974_v11  ;;  %v2329_v56 = vpack.c.bf16 %v2323_v8, %v2321_v23  ;;  %v9672_v35 = vld [vmem:[#allocation55_spill] sm:$0xff]  ;;  %v9674_v11 = vld [vmem:[#allocation56_spill] sm:$0xff] }
 0x2e2   :  { %v9659_v2 = vunpack.i.h.bf16 %v9630_v17  ;;  %v2284_v37 = vsel %vm609_vm8, %v8100_v60, %v4970_v18  ;;  %v2291_v14 = vsel %vm609_vm8, %v8108_v62, %v4971_v32  ;;  %v9660_v30 = vunpack.i.h.bf16 %v7719_v41  ;;  %v9673_v32 = vld [vmem:[#allocation53_spill] sm:$0xff] }
 0x2e3   :  { %v9661_v15 = vunpack.i.h.bf16 %v7463_v6  ;;  %v9662_v17 = vunpack.i.l.bf16 %v7948_v50  ;;  %v9663_v44 = vunpack.i.h.bf16 %v7948_v50  ;;  %v9664_v62 = vunpack.i.h.bf16 %v7888_v52 }
 0x2e4   :  { %v625_v39 = vsel %vm617_vm12, %v624_v57, %v9659_v2  ;;  %v1044_v51 = vsel %vm615_vm11, %v1043_v42, %v9660_v30  ;;  %v2299_v20 = vrot.slane %v839_v48, 4  ;;  %v4985_v38 = vunpack.i.l.bf16 %v8131_v45  ;;  %v3128_v53 = vpop.permute.xlu1 %3127 }
 0x2e5   :  { %v1260_v54 = vsel %vm617_vm12, %v7611_v13, %v9661_v15  ;;  %v2285_v22 = vsel %vm611_vm9, %v2284_v37, %v9662_v17  ;;  %v2292_v60 = vsel %vm611_vm9, %v2291_v14, %v9663_v44  ;;  %v1045_v41 = vsel %vm617_vm12, %v1044_v51, %v9664_v62  ;;  %v8289_v23 = vpop.permute.xlu2 %4998  ;;  %v9677_v37 = vld [vmem:[#allocation40_spill] sm:$0xff]  ;;  %v9678_v51 = vld [vmem:[#allocation9_spill] sm:$0xff] }
 0x2e6   :  { %v2286_v6 = vsel %vm613_vm10, %v2285_v22, %v4975_v55  ;;  %v2293_v13 = vsel %vm613_vm10, %v2292_v60, %v4976_v36  ;;  %v2305_v21 = vrot.slane %v1260_v54, 4  ;;  %v4660_v58 = vunpack.i.l.bf16 %v9665_v4  ;;  %v9679_v54 = vld [vmem:[#allocation32_spill] sm:$0xff] }
 0x2e7   :  { %v9666_v27 = vunpack.i.l.bf16 %v7965_v47  ;;  %v9667_v7 = vunpack.i.h.bf16 %v7965_v47  ;;  %v2322_v63 = vsel %vm2320_vm13, %v625_v39, %v2299_v20  ;;  %v8280_v12 = vpop.permute.xlu0 %4978  ;;  %v3628_v57 = vrot.slane %v9672_v35, 4 }
 0x2e8   :  { %v2324_v9 = vsel %vm2320_vm13, %v1045_v41, %v2305_v21  ;;  %9668 = vst [vmem:[#allocation48_spill] sm:$0xff] %v8280_v12  ;;  %v4980_v47 = vunpack.i.l.bf16 %v8280_v12  ;;  %v3174_v25 = vsel %vm605_vm6, %v9669_v40, %v4660_v58  ;;  %v3696_v18 = vrot.slane %v9673_v32, 4 }
 0x2e9   :  { %v2287_v50 = vsel %vm615_vm11, %v2286_v6, %v9666_v27  ;;  %v2294_v52 = vsel %vm615_vm11, %v2293_v13, %v9667_v7  ;;  %v2330_v3 = vpack.c.bf16 %v2324_v9, %v2322_v63  ;;  %v3629_v14 = vsel %vm106_vm0, %v3628_v57, %v9677_v37 }
 0x2ea   :  { %v2288_v1 = vsel %vm617_vm12, %v2287_v50, %v4985_v38  ;;  %v2295_v28 = vsel %vm617_vm12, %v2294_v52, %v4986_v19  ;;  %v3175_v45 = vsel %vm607_vm7, %v3174_v25, %v4980_v47  ;;  %v8329_v22 = vperm.slane %v3629_v14, %v9678_v51 }
 0x2eb   :  { %v2333_v49 = vpack.c.bf16 %v2288_v1, %v2288_v1  ;;  %v2334_v29 = vpack.c.bf16 %v2295_v28, %v2295_v28  ;;  %v3176_v19 = vsel %vm609_vm8, %v3175_v45, %v3128_v53  ;;  %v9353_v62 = vunpack.i.l.bf16 %v8289_v23  ;;  %v9680_v53 = vld [vmem:[#allocation10_spill] sm:$0xff] }
 0x2ec   :  { %v3177_v61 = vsel %vm611_vm9, %v3176_v19, %v8189_v34  ;;  %v3140_v59 = vpop.permute.xlu1 %3139  ;;  %v9671_v34 = vld [vmem:[#allocation52_spill] sm:$0xff]  ;;  %v9350_v38 = vunpack.i.h.bf16 %v8289_v23 }
 0x2ed   :  { %v2341_v24 = vsel %vm2339_vm14, %v2333_v49, 0  ;;  %v2344_v16 = vsel %vm2339_vm14, %v2334_v29, 0  ;;  %v8298_v26 = vpop.permute.xlu2 %5013  ;;  %v3640_v8 = vrot.slane %v9671_v34, 4  ;;  %v3846_v1 = vrot.slane %v9353_v62, 4 }
 0x2ee   :  { %2351 = vmatpush.bf16.msra.mxu0 %v2341_v24  ;;  %2364 = vmatpush.bf16.msra.mxu1 %v2344_v16  ;;  %v9344_v6 = vunpack.i.h.bf16 %v8298_v26  ;;  %v9345_v13 = vunpack.i.l.bf16 %v8298_v26  ;;  %v3902_v29 = vrot.slane %v9350_v38, 4 }
 0x2ef   :  { %v3136_v10 = vpop.permute.xlu0 %3135 }
 0x2f0   :  { %v3178_v48 = vsel %vm613_vm10, %v3177_v61, %v3136_v10  ;;  %v3224_v47 = vrot.slane %v9345_v13, 4 }
 0x2f1   :  { %v3179_v46 = vsel %vm615_vm11, %v3178_v48, %v3140_v59 }
 0x2f2   :  { %2352 = vmatpush.bf16.msra.mxu0 %v2331_v33  ;;  %2365 = vmatpush.bf16.msra.mxu1 %v2332_v5  ;;  %v8296_v42 = vsel %vm617_vm12, %v3179_v46, %v3144_v43  ;;  %v3684_v33 = vrot.slane %v9674_v11, 4  ;;  %v9675_v5 = vld [vmem:[#allocation31_spill] sm:$0xff] }
 0x2f3   :  { %9670 = vst [vmem:[#allocation19_spill] sm:$0xff] %v8296_v42  ;;  %v3641_v36 = vsel %vm106_vm0, %v3640_v8, %v9675_v5 }
 0x2f4   :  { %v8300_v31 = vpop.permute.xlu1 %4993  ;;  %v8321_v15 = vperm.slane %v3641_v36, %v9678_v51  ;;  %v3685_v43 = vsel %vm106_vm0, %v3684_v33, %v9679_v54 }
 0x2f5   :  { %v8318_v30 = vpop.permute.xlu2 %5028  ;;  %v8332_v44 = vperm.slane %v3685_v43, %v9678_v51  ;;  %v9349_v28 = vunpack.i.h.bf16 %v8300_v31  ;;  %v9348_v46 = vunpack.i.l.bf16 %v8300_v31 }
 0x2f6   :  { %2353 = vmatpush.bf16.msra.mxu0 %v2329_v56  ;;  %2366 = vmatpush.bf16.msra.mxu1 %v2330_v3  ;;  %v9676_v56 = vld [vmem:[#allocation38_spill] sm:$0xff]  ;;  %v3652_v60 = vrot.slane %v8321_v15, 4  ;;  %v9356_v27 = vunpack.i.l.bf16 %v8318_v30  ;;  %v9355_v7 = vunpack.i.h.bf16 %v8318_v30  ;;  %v3280_v3 = vrot.slane %v9344_v6, 4 }
 0x2f7   :  { %v8302_v0 = vpop.permute.xlu0 %4988  ;;  %v3697_v2 = vsel %vm106_vm0, %v3696_v18, %v9676_v56  ;;  %v3486_v48 = vrot.slane %v9349_v28, 4 }
 0x2f8   :  { %v8326_v17 = vperm.slane %v3697_v2, %v9678_v51  ;;  %v3653_v58 = vsel %vm106_vm0, %v3652_v60, %v8329_v22  ;;  %v4990_v52 = vunpack.i.l.bf16 %v8302_v0  ;;  %v3847_v16 = vsel %vm106_vm0, %v3846_v1, %v9356_v27 }
 0x2f9   :  { %v8358_v49 = vperm.slane %v3653_v58, %v9680_v53  ;;  %v3903_v19 = vsel %vm106_vm0, %v3902_v29, %v9355_v7  ;;  %v4991_v8 = vunpack.i.h.bf16 %v8302_v0  ;;  %v8385_v33 = vperm.slane %v3847_v16, %v9678_v51 }
 0x2fa   :  { %v3708_v20 = vrot.slane %v8326_v17, 4  ;;  %v4052_v61 = vrot.slane %v4990_v52, 4  ;;  %v8391_v43 = vperm.slane %v3903_v19, %v9678_v51  ;;  %v3430_v29 = vrot.slane %v9348_v46, 4 }
 0x2fb   :  { %9681 = vst [vmem:[#allocation20_spill] sm:$0xff] %v8358_v49  ;;  %v4108_v16 = vrot.slane %v4991_v8, 4 }
 0x2fc   :  { %v8310_v55 = vpop.permute.xlu1 %5008  ;;  %v3709_v50 = vsel %vm106_vm0, %v3708_v20, %v8332_v44 }
 0x2fd   :  { %v8355_v9 = vpop.permute.xlu2 %5043  ;;  %v8367_v24 = vperm.slane %v3709_v50, %v9680_v53  ;;  %v9357_v40 = vunpack.i.h.bf16 %v8310_v55  ;;  %v5010_v25 = vunpack.i.l.bf16 %v8310_v55  ;;  %v9683_v6 = vunpack.i.h.bf16 %v8310_v55 }
 0x2fe   :  { %v9346_v59 = vunpack.i.l.bf16 %v8355_v9  ;;  %v9347_v57 = vunpack.i.h.bf16 %v8355_v9 }
 0x2ff   :  { %v8314_v39 = vpop.permute.xlu0 %5003  ;;  %9682 = vst [vmem:[#allocation36_spill] sm:$0xff] %v8367_v24  ;;  %v4096_v60 = vrot.slane %v9357_v40, 4  ;;  %v4040_v0 = vrot.slane %v5010_v25, 4 }
 0x300   :  { %v5005_v63 = vunpack.i.l.bf16 %v8314_v39  ;;  %v5006_v45 = vunpack.i.h.bf16 %v8314_v39  ;;  %v3225_v58 = vsel %vm106_vm0, %v3224_v47, %v9346_v59  ;;  %v3281_v19 = vsel %vm106_vm0, %v3280_v3, %v9347_v57 }
 0x301   :  { %v8415_v13 = vperm.slane %v3225_v58, %v9678_v51 }
 0x302   :  { %v4054_v10 = vrot.slane %v5005_v63, 4  ;;  %v4053_v36 = vsel %vm106_vm0, %v4052_v61, %v5005_v63  ;;  %v4110_v20 = vrot.slane %v5006_v45, 4  ;;  %v4109_v3 = vsel %vm106_vm0, %v4108_v16, %v5006_v45 }
 0x303   :  { %v4059_v61 = vperm.slane %v4053_v36, %v9678_v51  ;;  %v8422_v36 = vperm.slane %v3281_v19, %v9678_v51  ;;  %v4115_v19 = vperm.slane %v4109_v3, %v9678_v51 }
 0x304   :  { %v8336_v41 = vpop.permute.xlu1 %5023  ;;  %v4055_v50 = vsel %vm106_vm0, %v4990_v52, %v4054_v10  ;;  %v4111_v57 = vsel %vm106_vm0, %v4991_v8, %v4110_v20 }
 0x305   :  { %v9352_v47 = vunpack.i.l.bf16 %v8336_v41  ;;  %v8418_v59 = vperm.slane %v4055_v50, %v9678_v51  ;;  %v4064_v58 = vrot.slane %v4059_v61, 4  ;;  %v9360_v8 = vunpack.i.h.bf16 %v8336_v41 }
 0x307   :  { %v8342_v21 = vpop.permute.xlu0 %5018 }
 0x308   :  { %v9354_v63 = vunpack.i.h.bf16 %v8342_v21  ;;  %v9351_v1 = vunpack.i.l.bf16 %v8342_v21 }
 0x30c   :  { %v5039_v18 = vpop.permute.xlu1 %5038 }
 0x30d   :  { %v5041_v2 = vunpack.i.h.bf16 %v5039_v18  ;;  %v5040_v39 = vunpack.i.l.bf16 %v5039_v18 }
 0x30f   :  { %v8388_v14 = vpop.permute.xlu0 %5033  ;;  %v4041_v52 = vsel %vm106_vm0, %v4040_v0, %v5040_v39  ;;  %v4097_v10 = vsel %vm106_vm0, %v4096_v60, %v5041_v2  ;;  %v3487_v0 = vsel %vm106_vm0, %v3486_v48, %v9354_v63  ;;  %v3431_v60 = vsel %vm106_vm0, %v3430_v29, %v9351_v1 }
 0x310   :  { %v4047_v46 = vperm.slane %v4041_v52, %v9678_v51  ;;  %v4103_v50 = vperm.slane %v4097_v10, %v9678_v51  ;;  %v9358_v45 = vunpack.i.l.bf16 %v8388_v14  ;;  %v3418_v48 = vrot.slane %v9352_v47, 4  ;;  %v8444_v52 = vpop.permute.xlu2 %5058 }
 0x311   :  { %v8447_v10 = vperm.slane %v3487_v0, %v9678_v51  ;;  %v8450_v38 = vperm.slane %v3431_v60, %v9678_v51  ;;  %v4042_v3 = vrot.slane %v5040_v39, 4  ;;  %v8453_v1 = vperm.slane %v4111_v57, %v9678_v51 }
 0x312   :  { %v9361_v47 = vunpack.i.h.bf16 %v8388_v14  ;;  %v4098_v7 = vrot.slane %v5041_v2, 4  ;;  %v4066_v27 = vrot.slane %v4047_v46, 4  ;;  %v4122_v29 = vrot.slane %v4103_v50, 4 }
 0x313   :  { %v3834_v0 = vrot.slane %v9358_v45, 4  ;;  %v4120_v60 = vrot.slane %v4115_v19, 4  ;;  %v3474_v39 = vrot.slane %v9360_v8, 4  ;;  %v3498_v18 = vrot.slane %v8447_v10, 4 }
 0x314   :  { %v8434_v16 = vpop.permute.xlu1 %5053  ;;  %v3442_v40 = vrot.slane %v8450_v38, 4  ;;  %v4043_v2 = vsel %vm106_vm0, %v5010_v25, %v4042_v3  ;;  %v4065_v45 = vsel %vm106_vm0, %v4064_v58, %v4047_v46  ;;  %v3890_v8 = vrot.slane %v9361_v47, 4 }
 0x315   :  { %v9359_v20 = vunpack.i.l.bf16 %v8434_v16  ;;  %v9362_v62 = vunpack.i.h.bf16 %v8434_v16  ;;  %v4099_v42 = vsel %vm106_vm0, %v9683_v6, %v4098_v7  ;;  %v9684_v25 = vunpack.i.l.bf16 %v8444_v52 }
 0x316   :  { %v4067_v3 = vsel %vm106_vm0, %v4059_v61, %v4066_v27  ;;  %v4123_v46 = vsel %vm106_vm0, %v4115_v19, %v4122_v29  ;;  %v8499_v7 = vperm.slane %v4065_v45, %v9680_v53  ;;  %v9687_v61 = vunpack.i.h.bf16 %v8444_v52 }
 0x317   :  { %v8441_v28 = vpop.permute.xlu0 %5048  ;;  %v3419_v63 = vsel %vm106_vm0, %v3418_v48, %v9359_v20  ;;  %v4121_v20 = vsel %vm106_vm0, %v4120_v60, %v4103_v50  ;;  %v3475_v57 = vsel %vm106_vm0, %v3474_v39, %v9362_v62  ;;  %v4075_v60 = vperm.slane %v4067_v3, %v9680_v53 }
 0x318   :  { %v8472_v48 = vperm.slane %v3419_v63, %v9678_v51  ;;  %v3835_v63 = vsel %vm106_vm0, %v3834_v0, %v9684_v25  ;;  %v9363_v58 = vunpack.i.h.bf16 %v8441_v28  ;;  %v9365_v50 = vunpack.i.l.bf16 %v8441_v28  ;;  %9685 = vst [vmem:[#allocation49_spill] sm:$0xff] %v8499_v7 }
 0x319   :  { %v4131_v39 = vperm.slane %v4123_v46, %v9680_v53  ;;  %v3481_v6 = vperm.slane %v3475_v57, %v9678_v51  ;;  %v8502_v27 = vperm.slane %v4121_v20, %v9680_v53  ;;  %v3891_v19 = vsel %vm106_vm0, %v3890_v8, %v9687_v61 }
 0x31a   :  { %v3443_v55 = vsel %vm106_vm0, %v3442_v40, %v8472_v48  ;;  %v8510_v3 = vperm.slane %v3835_v63, %v9678_v51  ;;  %v4088_v40 = vrot.slane %v8499_v7, 4  ;;  %v4090_v57 = vrot.slane %v4075_v60, 4 }
 0x31b   :  { %9686 = vst [vmem:[#allocation27_spill] sm:$0xff] %v8502_v27  ;;  %v5072_v29 = vpack.i.bf16 %v4131_v39, %v4075_v60  ;;  %v4144_v45 = vrot.slane %v8502_v27, 4  ;;  %v3268_v20 = vrot.slane %v9363_v58, 4  ;;  %v3212_v46 = vrot.slane %v9365_v50, 4 }
 0x31c   :  { %v4146_v8 = vrot.slane %v4131_v39, 4  ;;  %v8520_v61 = vperm.slane %v3443_v55, %v9680_v53  ;;  %v4132_v63 = vrot.slane %v8453_v1, 4  ;;  %v3499_v62 = vsel %vm106_vm0, %v3498_v18, %v3481_v6 }
 0x31d   :  { %5073 = vrot.lane.b32.xlu2 %v5072_v29, %s5316_s26  ;;  %v4089_v0 = vsel %vm106_vm0, 0.0, %v4088_v40  ;;  %v4145_v60 = vsel %vm106_vm0, 0.0, %v4144_v45  ;;  %v3897_v25 = vperm.slane %v3891_v19, %v9678_v51  ;;  %v8534_v29 = vperm.slane %v4043_v2, %v9678_v51 }
 0x31e   :  { %v5067_v58 = vpack.i.bf16 %v4145_v60, %v4089_v0  ;;  %v8537_v18 = vperm.slane %v4099_v42, %v9678_v51  ;;  %v3444_v40 = vrot.slane %v8472_v48, 4  ;;  %v4091_v45 = vsel %vm106_vm0, 0.0, %v4090_v57 }
 0x31f   :  { %v8493_v47 = vpop.permute.xlu0 %5063  ;;  %v4147_v19 = vsel %vm106_vm0, 0.0, %v4146_v8  ;;  %v8545_v0 = vperm.slane %v3499_v62, %v9680_v53  ;;  %v9690_v2 = vrot.slane %v8385_v33, 4  ;;  %v3500_v42 = vrot.slane %v3481_v6, 4 }
 0x320   :  { %v9688_v7 = vunpack.i.l.bf16 %v8493_v47  ;;  %v9689_v39 = vunpack.i.h.bf16 %v8493_v47  ;;  %5068 = vrot.lane.b32.xlu1 %v5067_v58, %s5317_s29  ;;  %v5087_v57 = vpack.i.bf16 %v4147_v19, %v4091_v45  ;;  %v9692_v60 = vrot.slane %v8391_v43, 4 }
 0x321   :  { %v3522_v62 = vrot.slane %v8545_v0, 4  ;;  %v4133_v45 = vsel %vm106_vm0, %v4132_v63, %v8537_v18  ;;  %v3236_v19 = vrot.slane %v8415_v13, 4 }
 0x322   :  { %v3213_v50 = vsel %vm106_vm0, %v3212_v46, %v9688_v7  ;;  %v3269_v55 = vsel %vm106_vm0, %v3268_v20, %v9689_v39  ;;  %v3466_v7 = vrot.slane %v8520_v61, 4  ;;  %v3859_v20 = vsel %vm106_vm0, %v9690_v2, %v8510_v3 }
 0x323   :  { %v8552_v46 = vperm.slane %v3213_v50, %v9678_v51  ;;  %v8555_v48 = vperm.slane %v3269_v55, %v9678_v51  ;;  %v8558_v58 = vperm.slane %v3859_v20, %v9680_v53  ;;  %v3915_v39 = vsel %vm106_vm0, %v9692_v60, %v3897_v25 }
 0x324   :  { %v3467_v8 = vsel %vm106_vm0, 0.0, %v3466_v7  ;;  %v8567_v50 = vperm.slane %v3915_v39, %v9680_v53  ;;  %v9693_v55 = vrot.slane %v8418_v59, 4  ;;  %v3292_v7 = vrot.slane %v8422_v36, 4 }
 0x325   :  { %9691 = vst [vmem:[#allocation65_spill] sm:$0xff] %v8558_v58  ;;  %v3882_v6 = vrot.slane %v8558_v58, 4  ;;  %v3916_v20 = vrot.slane %v3897_v25, 4  ;;  %5088 = vrot.lane.b32.xlu2 %v5087_v57, %s5313_s24  ;;  %v3523_v60 = vsel %vm106_vm0, 0.0, %v3522_v62  ;;  %v3860_v39 = vrot.slane %v8510_v3, 4 }
 0x326   :  { %v4077_v2 = vsel %vm106_vm0, %v9693_v55, %v8534_v29  ;;  %v5077_v27 = vpack.i.bf16 %v3523_v60, %v3467_v8  ;;  %v3938_v4 = vrot.slane %v8567_v50, 4  ;;  %v8586_v63 = vperm.slane %v4133_v45, %v9680_v53 }
 0x327   :  { %v3883_v12 = vsel %vm106_vm0, 0.0, %v3882_v6  ;;  %v8583_v55 = vperm.slane %v4077_v2, %v9680_v53  ;;  %v3445_v25 = vsel %vm106_vm0, %v8450_v38, %v3444_v40  ;;  %v3501_v57 = vsel %vm106_vm0, %v8447_v10, %v3500_v42 }
 0x328   :  { %v3237_v3 = vsel %vm106_vm0, %v3236_v19, %v8552_v46  ;;  %v3293_v8 = vsel %vm106_vm0, %v3292_v7, %v8555_v48  ;;  %5078 = vrot.lane.b32.xlu0 %v5077_v27, %s5317_s29  ;;  %v3939_v62 = vsel %vm106_vm0, 0.0, %v3938_v4  ;;  %v3676_v6 = vrot.slane %v8358_v49, 4 }
 0x329   :  { %v9694_v2 = vunpack.i.l.bf16 %v8318_v30  ;;  %v5082_v60 = vpack.i.bf16 %v3939_v62, %v3883_v12  ;;  %v3732_v38 = vrot.slane %v8367_v24, 4  ;;  %v3453_v10 = vperm.slane %v3445_v25, %v9680_v53 }
 0x32a   :  { %v3509_v40 = vperm.slane %v3501_v57, %v9680_v53  ;;  %v3861_v42 = vsel %vm106_vm0, %v8385_v33, %v3860_v39  ;;  %v3917_v27 = vsel %vm106_vm0, %v8391_v43, %v3916_v20  ;;  %v5102_v4 = vpack.i.bf16 %v8586_v63, %v8583_v55 }
 0x32b   :  { %v3848_v45 = vrot.slane %v9694_v2, 4  ;;  %5083 = vrot.lane.b32.xlu1 %v5082_v60, %s5317_s29  ;;  %v8612_v19 = vperm.slane %v3237_v3, %v9680_v53  ;;  %v8615_v12 = vperm.slane %v3293_v8, %v9680_v53  ;;  %v9697_v7 = vunpack.i.h.bf16 %v8318_v30  ;;  %v9699_v8 = vld [vmem:[#allocation47_spill] sm:$0xff] }
 0x32c   :  { %v3677_v57 = vsel %vm106_vm0, 0.0, %v3676_v6  ;;  %v9698_v33 = vunpack.i.h.bf16 %v8342_v21  ;;  %v8624_v43 = vperm.slane %v3861_v42, %v9680_v53  ;;  %v8627_v20 = vperm.slane %v3917_v27, %v9680_v53 }
 0x32d   :  { %9695 = vst [vmem:[#allocation64_spill] sm:$0xff] %v8612_v19  ;;  %v3904_v25 = vrot.slane %v9697_v7, 4  ;;  %5103 = vrot.lane.b32.xlu2 %v5102_v4, %s5314_s1  ;;  %v3733_v3 = vsel %vm106_vm0, 0.0, %v3732_v38  ;;  %v9700_v30 = vunpack.i.l.bf16 %v8289_v23  ;;  %v9701_v6 = vunpack.i.l.bf16 %v8342_v21 }
 0x32e   :  { %9696 = vst [vmem:[#allocation25_spill] sm:$0xff] %v8615_v12  ;;  %v3488_v39 = vrot.slane %v9698_v33, 4  ;;  %v5092_v7 = vpack.i.bf16 %v3509_v40, %v3453_v10  ;;  %v4585_v4 = vunpack.i.l.bf16 %v9699_v8  ;;  %v9702_v33 = vld [vmem:[#allocation43_spill] sm:$0xff]  ;;  %v3260_v49 = vrot.slane %v8612_v19, 4 }
 0x32f   :  { %v3849_v2 = vsel %vm106_vm0, %v9700_v30, %v3848_v45  ;;  %v3432_v60 = vrot.slane %v9701_v6, 4  ;;  %v3316_v27 = vrot.slane %v8615_v12, 4  ;;  %v9703_v38 = vunpack.i.h.bf16 %v8289_v23 }
 0x330   :  { %v3238_v24 = vrot.slane %v8552_v46, 4  ;;  %v3294_v45 = vrot.slane %v8555_v48, 4  ;;  %5093 = vrot.lane.b32.xlu0 %v5092_v7, %s5316_s26  ;;  %v5117_v21 = vpack.i.bf16 %v3733_v3, %v3677_v57  ;;  %v8647_v30 = vperm.slane %v3849_v2, %v9678_v51 }
 0x331   :  { %v3905_v62 = vsel %vm106_vm0, %v9703_v38, %v3904_v25  ;;  %v9704_v6 = vunpack.i.h.bf16 %v8300_v31  ;;  %v9705_v19 = vunpack.i.l.bf16 %v8434_v16  ;;  %v5097_v23 = vpack.i.bf16 %v8627_v20, %v8624_v43 }
 0x332   :  { %v9706_v46 = vunpack.i.l.bf16 %v8300_v31  ;;  %v9707_v25 = vunpack.i.h.bf16 %v8434_v16  ;;  %v3468_v3 = vrot.slane %v3453_v10, 4  ;;  %v3524_v2 = vrot.slane %v3509_v40, 4 }
 0x333   :  { %v3489_v42 = vsel %vm106_vm0, %v9704_v6, %v3488_v39  ;;  %v3420_v12 = vrot.slane %v9705_v19, 4  ;;  %v9708_v7 = vunpack.i.h.bf16 %v8444_v52  ;;  %v9709_v39 = vunpack.i.l.bf16 %v8444_v52  ;;  %5098 = vrot.lane.b32.xlu1 %v5097_v23, %s5316_s26 }
 0x334   :  { %v3433_v48 = vsel %vm106_vm0, %v9706_v46, %v3432_v60  ;;  %v3476_v57 = vrot.slane %v9707_v25, 4  ;;  %v3261_v19 = vsel %vm106_vm0, 0.0, %v3260_v49  ;;  %v3317_v58 = vsel %vm106_vm0, 0.0, %v3316_v27 }
 0x335   :  { %v3892_v38 = vrot.slane %v9708_v7, 4  ;;  %v3836_v6 = vrot.slane %v9709_v39, 4  ;;  %v8669_v31 = vperm.slane %v3905_v62, %v9678_v51  ;;  %v8672_v16 = vperm.slane %v3489_v42, %v9678_v51  ;;  %5118 = vrot.lane.b32.xlu2 %v5117_v21, %s5317_s29 }
 0x336   :  { %v3239_v10 = vsel %vm106_vm0, %v8415_v13, %v3238_v24  ;;  %v3295_v40 = vsel %vm106_vm0, %v8422_v36, %v3294_v45  ;;  %v8679_v52 = vperm.slane %v3433_v48, %v9678_v51  ;;  %v9710_v60 = vunpack.i.h.bf16 %v8388_v14 }
 0x337   :  { %v9711_v27 = vunpack.i.l.bf16 %v8388_v14  ;;  %v9712_v42 = vunpack.i.l.bf16 %v8336_v41  ;;  %v9713_v13 = vunpack.i.h.bf16 %v8336_v41  ;;  %v5107_v36 = vpack.i.bf16 %v3317_v58, %v3261_v19 }
 0x338   :  { %v3893_v49 = vsel %vm106_vm0, %v9710_v60, %v3892_v38  ;;  %v3469_v45 = vsel %vm106_vm0, 0.0, %v3468_v3  ;;  %v3525_v46 = vsel %vm106_vm0, 0.0, %v3524_v2  ;;  %v8697_v48 = vperm.slane %v3239_v10, %v9680_v53 }
 0x339   :  { %v3837_v62 = vsel %vm106_vm0, %v9711_v27, %v3836_v6  ;;  %v3421_v23 = vsel %vm106_vm0, %v9712_v42, %v3420_v12  ;;  %v3477_v24 = vsel %vm106_vm0, %v9713_v13, %v3476_v57  ;;  %v8700_v14 = vperm.slane %v3295_v40, %v9680_v53  ;;  %5108 = vrot.lane.b32.xlu0 %v5107_v36, %s5317_s29 }
 0x33a   :  { %v3884_v25 = vrot.slane %v8624_v43, 4  ;;  %v3940_v12 = vrot.slane %v8627_v20, 4  ;;  %v4655_v21 = vunpack.i.l.bf16 %v9702_v33  ;;  %v8706_v41 = vperm.slane %v3893_v49, %v9678_v51 }
 0x33b   :  { %v8709_v58 = vperm.slane %v3837_v62, %v9678_v51  ;;  %v3654_v57 = vrot.slane %v8329_v22, 4  ;;  %v3870_v3 = vrot.slane %v8647_v30, 4  ;;  %v8715_v2 = vperm.slane %v3421_v23, %v9678_v51  ;;  %v9716_v62 = vld [vmem:[#allocation45_spill] sm:$0xff] }
 0x33c   :  { %v8718_v43 = vperm.slane %v3477_v24, %v9678_v51  ;;  %v5112_v20 = vpack.i.bf16 %v3525_v46, %v3469_v45  ;;  %v3926_v7 = vrot.slane %v8669_v31, 4  ;;  %v3510_v38 = vrot.slane %v8672_v16, 4 }
 0x33d   :  { %v4092_v39 = vrot.slane %v8583_v55, 4  ;;  %v4148_v6 = vrot.slane %v8586_v63, 4  ;;  %v3454_v19 = vrot.slane %v8679_v52, 4  ;;  %v5132_v22 = vpack.i.bf16 %v8700_v14, %v8697_v48  ;;  %v9714_v55 = vld [vmem:[#allocation58_spill] sm:$0xff] }
 0x33e   :  { %5113 = vrot.lane.b32.xlu1 %v5112_v20, %s5313_s24  ;;  %v3885_v10 = vsel %vm106_vm0, 0.0, %v3884_v25  ;;  %v3941_v40 = vsel %vm106_vm0, 0.0, %v3940_v12  ;;  %v3871_v60 = vsel %vm106_vm0, %v3870_v3, %v8709_v58  ;;  %v3927_v49 = vsel %vm106_vm0, %v3926_v7, %v8706_v41 }
 0x33f   :  { %v2545_v63 = vsel %vm615_vm11, %v9714_v55, %v4585_v4  ;;  %v9715_v27 = vunpack.i.h.bf16 %v9699_v8  ;;  %5133 = vrot.lane.b32.xlu2 %v5132_v22, %s5316_s26  ;;  %v3455_v23 = vsel %vm106_vm0, %v3454_v19, %v8715_v2  ;;  %v3511_v13 = vsel %vm106_vm0, %v3510_v38, %v8718_v43 }
 0x340   :  { %v8746_v24 = vsel %vm617_vm12, %v2545_v63, %v4655_v21  ;;  %v9717_v36 = vunpack.i.h.bf16 %v9702_v33  ;;  %v5122_v8 = vpack.i.bf16 %v3941_v40, %v3885_v10  ;;  %v4093_v45 = vsel %vm106_vm0, 0.0, %v4092_v39 }
 0x341   :  { %v2552_v42 = vsel %vm615_vm11, %v9716_v62, %v9715_v27  ;;  %v4149_v46 = vsel %vm106_vm0, 0.0, %v4148_v6  ;;  %v3710_v25 = vrot.slane %v8332_v44, 4  ;;  %v8757_v12 = vperm.slane %v3871_v60, %v9680_v53 }
 0x342   :  { %v8751_v4 = vsel %vm617_vm12, %v2552_v42, %v9717_v36  ;;  %v8760_v3 = vperm.slane %v3927_v49, %v9680_v53  ;;  %5123 = vrot.lane.b32.xlu0 %v5122_v8, %s5313_s24  ;;  %v3461_v33 = vperm.slane %v3455_v23, %v9680_v53  ;;  %v3517_v21 = vperm.slane %v3511_v13, %v9680_v53 }
 0x343   :  { %v4078_v20 = vrot.slane %v8534_v29, 4  ;;  %v4134_v7 = vrot.slane %v8537_v18, 4  ;;  %v5127_v38 = vpack.i.bf16 %v4149_v46, %v4093_v45  ;;  %v3655_v44 = vsel %vm106_vm0, %v8321_v15, %v3654_v57 }
 0x344   :  { %v3711_v39 = vsel %vm106_vm0, %v8326_v17, %v3710_v25  ;;  %v5147_v6 = vpack.i.bf16 %v8760_v3, %v8757_v12  ;;  %v3642_v19 = vrot.slane %v9675_v5, 4  ;;  %v3470_v22 = vrot.slane %v3461_v33, 4 }
 0x345   :  { %v3526_v10 = vrot.slane %v3517_v21, 4  ;;  %v3663_v29 = vperm.slane %v3655_v44, %v9680_v53  ;;  %v3719_v18 = vperm.slane %v3711_v39, %v9680_v53  ;;  %v4079_v15 = vsel %vm106_vm0, %v8418_v59, %v4078_v20 }
 0x346   :  { %5128 = vrot.lane.b32.xlu1 %v5127_v38, %s5311_s22  ;;  %v4135_v17 = vsel %vm106_vm0, %v8453_v1, %v4134_v7  ;;  %v3698_v57 = vrot.slane %v9676_v56, 4  ;;  %v5137_v40 = vpack.i.bf16 %v3517_v21, %v3461_v33  ;;  %v3686_v60 = vrot.slane %v9679_v54, 4 }
 0x347   :  { %5148 = vrot.lane.b32.xlu2 %v5147_v6, %s5314_s1  ;;  %v9718_v5 = vunpack.i.h.bf16 %v8355_v9  ;;  %v9719_v55 = vunpack.i.l.bf16 %v8355_v9  ;;  %v3471_v27 = vsel %vm106_vm0, 0.0, %v3470_v22  ;;  %v3527_v59 = vsel %vm106_vm0, 0.0, %v3526_v10 }
 0x348   :  { %v4087_v62 = vperm.slane %v4079_v15, %v9680_v53  ;;  %v4143_v1 = vperm.slane %v4135_v17, %v9680_v53  ;;  %v3630_v56 = vrot.slane %v9677_v37, 4  ;;  %v9720_v54 = vunpack.i.h.bf16 %v8493_v47 }
 0x349   :  { %v3282_v49 = vrot.slane %v9718_v5, 4  ;;  %v3226_v63 = vrot.slane %v9719_v55, 4  ;;  %v5142_v23 = vpack.i.bf16 %v3719_v18, %v3663_v29  ;;  %v3643_v9 = vsel %vm106_vm0, %v9671_v34, %v3642_v19 }
 0x34a   :  { %5138 = vrot.lane.b32.xlu0 %v5137_v40, %s5314_s1  ;;  %v3270_v42 = vrot.slane %v9720_v54, 4  ;;  %v9721_v13 = vunpack.i.l.bf16 %v8493_v47  ;;  %v3262_v8 = vrot.slane %v8697_v48, 4  ;;  %v3318_v45 = vrot.slane %v8700_v14, 4 }
 0x34b   :  { %v3699_v46 = vsel %vm106_vm0, %v9673_v32, %v3698_v57  ;;  %v5162_v37 = vpack.i.bf16 %v3527_v59, %v3471_v27  ;;  %v3678_v25 = vrot.slane %v3663_v29, 4  ;;  %v3631_v33 = vsel %vm106_vm0, %v9672_v35, %v3630_v56 }
 0x34c   :  { %v3214_v36 = vrot.slane %v9721_v13, 4  ;;  %v3687_v34 = vsel %vm106_vm0, %v9674_v11, %v3686_v60  ;;  %v9722_v47 = vunpack.i.l.bf16 %v8298_v26  ;;  %v9723_v48 = vunpack.i.h.bf16 %v8298_v26 }
 0x34d   :  { %v4094_v20 = vrot.slane %v4087_v62, 4  ;;  %v4150_v32 = vrot.slane %v4143_v1, 4  ;;  %v9724_v7 = vunpack.i.h.bf16 %v8441_v28  ;;  %v3734_v35 = vrot.slane %v3719_v18, 4 }
 0x34e   :  { %5143 = vrot.lane.b32.xlu1 %v5142_v23, %s5316_s26  ;;  %v3227_v21 = vsel %vm106_vm0, %v9722_v47, %v3226_v63  ;;  %v3283_v14 = vsel %vm106_vm0, %v9723_v48, %v3282_v49  ;;  %v8820_v44 = vperm.slane %v3643_v9, %v9678_v51  ;;  %v8823_v11 = vperm.slane %v3699_v46, %v9678_v51 }
 0x34f   :  { %v3271_v38 = vsel %vm106_vm0, %v9724_v7, %v3270_v42  ;;  %5163 = vrot.lane.b32.xlu2 %v5162_v37, %s5311_s22  ;;  %v9725_v39 = vunpack.i.l.bf16 %v8441_v28  ;;  %v5152_v6 = vpack.i.bf16 %v4143_v1, %v4087_v62  ;;  %v3263_v19 = vsel %vm106_vm0, 0.0, %v3262_v8 }
 0x350   :  { %v3319_v22 = vsel %vm106_vm0, 0.0, %v3318_v45  ;;  %v8831_v10 = vperm.slane %v3227_v21, %v9678_v51  ;;  %v8834_v29 = vperm.slane %v3283_v14, %v9678_v51  ;;  %v8837_v18 = vperm.slane %v3631_v33, %v9678_v51 }
 0x351   :  { %v3215_v26 = vsel %vm106_vm0, %v9725_v39, %v3214_v36  ;;  %v4095_v28 = vsel %vm106_vm0, 0.0, %v4094_v20  ;;  %v4151_v15 = vsel %vm106_vm0, 0.0, %v4150_v32  ;;  %v3679_v17 = vsel %vm106_vm0, 0.0, %v3678_v25 }
 0x352   :  { %5153 = vrot.lane.b32.xlu0 %v5152_v6, %s5315_s25  ;;  %v8844_v57 = vperm.slane %v3687_v34, %v9678_v51  ;;  %v8847_v40 = vperm.slane %v3215_v26, %v9678_v51  ;;  %v8850_v60 = vperm.slane %v3271_v38, %v9678_v51  ;;  %v5157_v5 = vpack.i.bf16 %v3319_v22, %v3263_v19  ;;  %v9726_v19 = vld [vmem:[#allocation33_spill] sm:$0xff] }
 0x353   :  { %v3664_v49 = vrot.slane %v8820_v44, 4  ;;  %v3735_v55 = vsel %vm106_vm0, 0.0, %v3734_v35  ;;  %v3886_v63 = vrot.slane %v8757_v12, 4  ;;  %v3942_v27 = vrot.slane %v8760_v3, 4 }
 0x354   :  { %v3720_v59 = vrot.slane %v8823_v11, 4  ;;  %v3248_v62 = vrot.slane %v8831_v10, 4  ;;  %v3304_v1 = vrot.slane %v8834_v29, 4  ;;  %v5177_v56 = vpack.i.bf16 %v4151_v15, %v4095_v28  ;;  %v9727_v28 = vld [vmem:[#allocation28_spill] sm:$0xff] }
 0x355   :  { %v3665_v54 = vsel %vm106_vm0, %v3664_v49, %v8837_v18  ;;  %v5167_v12 = vpack.i.bf16 %v3735_v55, %v3679_v17  ;;  %v3456_v9 = vrot.slane %v8715_v2, 4  ;;  %v3512_v13 = vrot.slane %v8718_v43, 4 }
 0x356   :  { %5158 = vrot.lane.b32.xlu1 %v5157_v5, %s5313_s24  ;;  %v3721_v42 = vsel %vm106_vm0, %v3720_v59, %v8844_v57  ;;  %v3249_v3 = vsel %vm106_vm0, %v3248_v62, %v8847_v40  ;;  %v3305_v23 = vsel %vm106_vm0, %v3304_v1, %v8850_v60  ;;  %v3887_v36 = vsel %vm106_vm0, 0.0, %v3886_v63 }
 0x357   :  { %5178 = vrot.lane.b32.xlu2 %v5177_v56, %s5312_s23  ;;  %v3943_v8 = vsel %vm106_vm0, 0.0, %v3942_v27  ;;  %v3671_v45 = vperm.slane %v3665_v54, %v9680_v53  ;;  %v3727_v46 = vperm.slane %v3721_v42, %v9680_v53  ;;  %v3255_v37 = vperm.slane %v3249_v3, %v9680_v53  ;;  %v9728_v56 = vld [vmem:[#allocation30_spill] sm:$0xff] }
 0x358   :  { %v3311_v25 = vperm.slane %v3305_v23, %v9680_v53  ;;  %v3928_v33 = vrot.slane %v8706_v41, 4  ;;  %v3872_v2 = vrot.slane %v8709_v58, 4  ;;  %v5172_v34 = vpack.i.bf16 %v3943_v8, %v3887_v36  ;;  %v9729_v42 = vld [vmem:[#allocation26_spill] sm:$0xff] }
 0x359   :  { %v3457_v43 = vsel %vm106_vm0, %v8679_v52, %v3456_v9  ;;  %v3513_v47 = vsel %vm106_vm0, %v8672_v16, %v3512_v13  ;;  %v5192_v21 = vpack.i.bf16 %v3727_v46, %v3671_v45  ;;  %v3264_v48 = vrot.slane %v3255_v37, 4  ;;  %v9730_v13 = vld [vmem:[#allocation24_spill] sm:$0xff] }
 0x35a   :  { %5168 = vrot.lane.b32.xlu0 %v5167_v12, %s5313_s24  ;;  %v3320_v14 = vrot.slane %v3311_v25, 4  ;;  %v3465_v20 = vperm.slane %v3457_v43, %v9680_v53  ;;  %v3521_v41 = vperm.slane %v3513_v47, %v9680_v53  ;;  %v3873_v58 = vsel %vm106_vm0, %v8647_v30, %v3872_v2 }
 0x35b   :  { %v3929_v52 = vsel %vm106_vm0, %v8669_v31, %v3928_v33  ;;  %v5182_v32 = vpack.i.bf16 %v3311_v25, %v3255_v37  ;;  %v3265_v16 = vsel %vm106_vm0, 0.0, %v3264_v48  ;;  %v3881_v38 = vperm.slane %v3873_v58, %v9680_v53 }
 0x35c   :  { %v3321_v7 = vsel %vm106_vm0, 0.0, %v3320_v14  ;;  %v3937_v35 = vperm.slane %v3929_v52, %v9680_v53  ;;  %v5187_v39 = vpack.i.bf16 %v3521_v41, %v3465_v20  ;;  %v3112_v22 = vrot.slane %v9726_v19, 4 }
 0x35d   :  { %v5202_v26 = vpack.i.bf16 %v3321_v7, %v3265_v16  ;;  %v3888_v6 = vrot.slane %v3881_v38, 4  ;;  %v3076_v15 = vrot.slane %v9727_v28, 4  ;;  %v3472_v17 = vrot.slane %v3465_v20, 4 }
 0x35e   :  { %5173 = vrot.lane.b32.xlu1 %v5172_v34, %s5311_s22  ;;  %v3944_v30 = vrot.slane %v3937_v35, 4  ;;  %v5197_v31 = vpack.i.bf16 %v3937_v35, %v3881_v38  ;;  %v3528_v5 = vrot.slane %v3521_v41, 4  ;;  %v3666_v63 = vrot.slane %v8837_v18, 4 }
 0x35f   :  { %5193 = vrot.lane.b32.xlu2 %v5192_v21, %s5314_s1  ;;  %v3889_v49 = vsel %vm106_vm0, 0.0, %v3888_v6  ;;  %v3722_v27 = vrot.slane %v8844_v57, 4  ;;  %v3680_v59 = vrot.slane %v3671_v45, 4  ;;  %v3113_v62 = vsel %vm106_vm0, 0.0, %v3112_v22 }
 0x360   :  { %v3945_v55 = vsel %vm106_vm0, 0.0, %v3944_v30  ;;  %v3736_v1 = vrot.slane %v3727_v46, 4  ;;  %v3064_v54 = vrot.slane %v9728_v56, 4  ;;  %v3077_v12 = vsel %vm106_vm0, %v9729_v42, %v3076_v15 }
 0x361   :  { %v5217_v3 = vpack.i.bf16 %v3945_v55, %v3889_v49  ;;  %v3473_v23 = vsel %vm106_vm0, 0.0, %v3472_v17  ;;  %v3529_v9 = vsel %vm106_vm0, 0.0, %v3528_v5  ;;  %v3667_v18 = vsel %vm106_vm0, %v8820_v44, %v3666_v63 }
 0x362   :  { %5183 = vrot.lane.b32.xlu0 %v5182_v32, %s5314_s1  ;;  %v3723_v57 = vsel %vm106_vm0, %v8823_v11, %v3722_v27  ;;  %v3065_v36 = vsel %vm106_vm0, %v9730_v13, %v3064_v54  ;;  %v3681_v8 = vsel %vm106_vm0, 0.0, %v3680_v59  ;;  %v3085_v45 = vperm.slane %v3077_v12, %v9678_v51 }
 0x363   :  { %v3250_v46 = vrot.slane %v8847_v40, 4  ;;  %v3306_v37 = vrot.slane %v8850_v60, 4  ;;  %v5207_v25 = vpack.i.bf16 %v3529_v9, %v3473_v23  ;;  %v3737_v33 = vsel %vm106_vm0, 0.0, %v3736_v1 }
 0x364   :  { %v3675_v44 = vperm.slane %v3667_v18, %v9680_v53  ;;  %v3731_v11 = vperm.slane %v3723_v57, %v9680_v53  ;;  %v3073_v2 = vperm.slane %v3065_v36, %v9678_v51  ;;  %v5212_v34 = vpack.i.bf16 %v3737_v33, %v3681_v8  ;;  %v9732_v33 = vld [vmem:[#allocation57_spill] sm:$0xff] }
 0x365   :  { %v3098_v43 = vrot.slane %v3085_v45, 4  ;;  %v3251_v47 = vsel %vm106_vm0, %v8831_v10, %v3250_v46  ;;  %v3307_v40 = vsel %vm106_vm0, %v8834_v29, %v3306_v37 }
 0x366   :  { %5188 = vrot.lane.b32.xlu1 %v5187_v39, %s5315_s25  ;;  %v5227_v60 = vpack.i.bf16 %v3731_v11, %v3675_v44  ;;  %v3682_v48 = vrot.slane %v3675_v44, 4  ;;  %v3738_v14 = vrot.slane %v3731_v11, 4  ;;  %v3259_v51 = vperm.slane %v3251_v47, %v9680_v53 }
 0x367   :  { %5203 = vrot.lane.b32.xlu2 %v5202_v26, %s5311_s22  ;;  %v3099_v21 = vsel %vm106_vm0, %v3098_v43, %v3073_v2  ;;  %v3315_v20 = vperm.slane %v3307_v40, %v9680_v53  ;;  %v3100_v35 = vrot.slane %v3073_v2, 4  ;;  %v4746_v44 = vunpack.i.h.bf16 %v9732_v33  ;;  %v9733_v43 = vld [vmem:[#allocation34_spill] sm:$0xff] }
 0x368   :  { %v3105_v41 = vperm.slane %v3099_v21, %v9680_v53  ;;  %v3683_v10 = vsel %vm106_vm0, 0.0, %v3682_v48  ;;  %v3739_v29 = vsel %vm106_vm0, 0.0, %v3738_v14  ;;  %v3266_v32 = vrot.slane %v3259_v51, 4  ;;  %v9735_v14 = vld [vmem:[#allocation25_spill] sm:$0xff] }
 0x369   :  { %v5222_v52 = vpack.i.bf16 %v3315_v20, %v3259_v51  ;;  %v3322_v16 = vrot.slane %v3315_v20, 4  ;;  %v5237_v7 = vpack.i.bf16 %v3739_v29, %v3683_v10  ;;  %v9736_v20 = vld [vmem:[#allocation64_spill] sm:$0xff] }
 0x36a   :  { %5198 = vrot.lane.b32.xlu0 %v5197_v31, %s5315_s25  ;;  %v3114_v38 = vrot.slane %v3105_v41, 4  ;;  %v3267_v39 = vsel %vm106_vm0, 0.0, %v3266_v32  ;;  %v3101_v31 = vsel %vm106_vm0, %v3085_v45, %v3100_v35  ;;  %v9731_v45 = vld [vmem:[#allocation65_spill] sm:$0xff] }
 0x36b   :  { %v3323_v26 = vsel %vm106_vm0, 0.0, %v3322_v16  ;;  %v3109_v22 = vperm.slane %v3101_v31, %v9680_v53 }
 0x36c   :  { %v3115_v6 = vsel %vm106_vm0, 0.0, %v3114_v38  ;;  %v5232_v19 = vpack.i.bf16 %v3323_v26, %v3267_v39  ;;  %v9737_v38 = vld [vmem:[#allocation50_spill] sm:$0xff]  ;;  %v9738_v39 = vld [vmem:[#allocation15_spill] sm:$0xff] }
 0x36d   :  { %v3116_v28 = vrot.slane %v3109_v22, 4  ;;  %v4886_v35 = vunpack.i.h.bf16 %v9737_v38 }
 0x36e   :  { %3155 = vrot.lane.b32.xlu1 %v3113_v62, %s5313_s24 }
 0x36f   :  { %5218 = vrot.lane.b32.xlu2 %v5217_v3, %s5312_s23  ;;  %v3117_v17 = vsel %vm106_vm0, 0.0, %v3116_v28 }
 0x372   :  { %5208 = vrot.lane.b32.xlu0 %v5207_v25, %s5312_s23 }
 0x376   :  { %5213 = vrot.lane.b32.xlu1 %v5212_v34, %s5311_s22  ;;  %v4745_v34 = vunpack.i.l.bf16 %v9732_v33  ;;  %v9743_v33 = vld [vmem:[#allocation41_spill] sm:$0xff] }
 0x377   :  { %5228 = vrot.lane.b32.xlu2 %v5227_v60, %s5315_s25  ;;  %v8939_v58 = vpop.permute.xlu2 %5073  ;;  %v9734_v60 = vld [vmem:[#allocation51_spill] sm:$0xff] }
 0x378   :  { %v4896_v21 = vunpack.i.h.bf16 %v9734_v60  ;;  %v4895_v48 = vunpack.i.l.bf16 %v9734_v60  ;;  %v9747_v60 = vld [vmem:[#allocation11_spill] sm:$0xff] }
 0x37a   :  { %3159 = vrot.lane.b32.xlu0 %v3105_v41, %s5314_s1  ;;  %v2964_v26 = vsel %vm613_vm10, %v9738_v39, %v4895_v48 }
 0x37e   :  { %5223 = vrot.lane.b32.xlu1 %v5222_v52, %s5315_s25 }
 0x37f   :  { %5238 = vrot.lane.b32.xlu2 %v5237_v7, %s5312_s23  ;;  %v8949_v30 = vpop.permute.xlu2 %5088  ;;  %v4760_v7 = vunpack.i.l.bf16 %v9733_v43 }
 0x382   :  { %3163 = vrot.lane.b32.xlu0 %v3115_v6, %s5311_s22  ;;  %v9739_v6 = vld [vmem:[#allocation46_spill] sm:$0xff] }
 0x383   :  { %v2971_v31 = vsel %vm613_vm10, %v9739_v6, %v4896_v21 }
 0x386   :  { %5233 = vrot.lane.b32.xlu1 %v5232_v19, %s5312_s23  ;;  %v4885_v19 = vunpack.i.l.bf16 %v9737_v38 }
 0x387   :  { %v8955_v15 = vpop.permute.xlu2 %5103 }
 0x388   :  { %v5106_v38 = vunpack.i.h.bf16 %v8955_v15 }
 0x38a   :  { %3167 = vrot.lane.b32.xlu0 %v3109_v22, %s5315_s25  ;;  %v9740_v22 = vld [vmem:[#allocation18_spill] sm:$0xff] }
 0x38b   :  { %v4900_v28 = vunpack.i.l.bf16 %v9740_v22 }
 0x38e   :  { %3171 = vrot.lane.b32.xlu1 %v3117_v17, %s5312_s23 }
 0x38f   :  { %v8960_v5 = vpop.permute.xlu2 %5118 }
 0x392   :  { %v8962_v49 = vpop.permute.xlu1 %5068 }
 0x399   :  { %v5134_v55 = vpop.permute.xlu2 %5133 }
 0x39a   :  { %v5079_v63 = vpop.permute.xlu0 %5078  ;;  %v5136_v47 = vunpack.i.h.bf16 %v5134_v55  ;;  %v5135_v40 = vunpack.i.l.bf16 %v5134_v55 }
 0x39b   :  { %v5081_v53 = vunpack.i.h.bf16 %v5079_v63  ;;  %v5080_v62 = vunpack.i.l.bf16 %v5079_v63  ;;  %v9741_v63 = vld [vmem:[#allocation63_spill] sm:$0xff] }
 0x39d   :  { %v5084_v27 = vpop.permute.xlu1 %5083  ;;  %v3593_v3 = vsel %vm605_vm6, %v8545_v0, %v5081_v53  ;;  %v3586_v23 = vsel %vm605_vm6, %v8520_v61, %v5080_v62  ;;  %v2965_v53 = vsel %vm615_vm11, %v2964_v26, %v4760_v7  ;;  %v9742_v62 = vld [vmem:[#allocation44_spill] sm:$0xff] }
 0x39e   :  { %v5086_v56 = vunpack.i.h.bf16 %v5084_v27  ;;  %v5085_v54 = vunpack.i.l.bf16 %v5084_v27  ;;  %v2759_v27 = vsel %vm615_vm11, %v9741_v63, %v4745_v34  ;;  %v9745_v34 = vld [vmem:[#allocation27_spill] sm:$0xff] }
 0x3a0   :  { %v4009_v8 = vsel %vm605_vm6, %v8567_v50, %v5086_v56  ;;  %v4002_v46 = vsel %vm605_vm6, %v9731_v45, %v5085_v54  ;;  %v4761_v50 = vunpack.i.h.bf16 %v9733_v43  ;;  %v5070_v45 = vunpack.i.l.bf16 %v8962_v49 }
 0x3a1   :  { %v8964_v59 = vpop.permute.xlu2 %5148 }
 0x3a2   :  { %v5094_v1 = vpop.permute.xlu0 %5093  ;;  %v2972_v56 = vsel %vm615_vm11, %v2971_v31, %v4761_v50 }
 0x3a3   :  { %v5096_v42 = vunpack.i.h.bf16 %v5094_v1  ;;  %v5095_v12 = vunpack.i.l.bf16 %v5094_v1  ;;  %v2766_v1 = vsel %vm615_vm11, %v9742_v62, %v4746_v44  ;;  %v4661_v44 = vunpack.i.h.bf16 %v9743_v33 }
 0x3a5   :  { %v3587_v9 = vsel %vm607_vm7, %v3586_v23, %v5095_v12  ;;  %v3594_v18 = vsel %vm607_vm7, %v3593_v3, %v5096_v42  ;;  %v5099_v57 = vpop.permute.xlu1 %5098  ;;  %v2760_v42 = vsel %vm617_vm12, %v2759_v27, %v4885_v19  ;;  %v2767_v12 = vsel %vm617_vm12, %v2766_v1, %v4886_v35 }
 0x3a6   :  { %v5101_v13 = vunpack.i.h.bf16 %v5099_v57  ;;  %v5100_v36 = vunpack.i.l.bf16 %v5099_v57  ;;  %v4901_v3 = vunpack.i.h.bf16 %v9740_v22  ;;  %v5105_v35 = vunpack.i.l.bf16 %v8955_v15 }
 0x3a8   :  { %v8977_v37 = vsel %vm607_vm7, %v4002_v46, %v5100_v36  ;;  %v8980_v0 = vsel %vm607_vm7, %v4009_v8, %v5101_v13  ;;  %v9025_v13 = vsel %vm617_vm12, %v2965_v53, %v4900_v28  ;;  %v5071_v8 = vunpack.i.h.bf16 %v8962_v49 }
 0x3a9   :  { %v8982_v61 = vpop.permute.xlu2 %5163  ;;  %v9034_v46 = vsel %vm617_vm12, %v2972_v56, %v4901_v3  ;;  %v5076_v49 = vunpack.i.h.bf16 %v8939_v58 }
 0x3aa   :  { %v4215_v43 = vsel %vm605_vm6, %v9745_v34, %v5071_v8 }
 0x3ab   :  { %v5109_v25 = vpop.permute.xlu0 %5108  ;;  %v4216_v21 = vsel %vm607_vm7, %v4215_v43, %v5076_v49  ;;  %v5151_v49 = vunpack.i.h.bf16 %v8964_v59 }
 0x3ac   :  { %v5111_v11 = vunpack.i.h.bf16 %v5109_v25  ;;  %v5110_v2 = vunpack.i.l.bf16 %v5109_v25 }
 0x3ae   :  { %v3387_v51 = vsel %vm605_vm6, %v9735_v14, %v5111_v11  ;;  %v3380_v41 = vsel %vm605_vm6, %v9736_v20, %v5110_v2  ;;  %v9744_v11 = vld [vmem:[#allocation48_spill] sm:$0xff] }
 0x3af   :  { %v8994_v32 = vsel %vm607_vm7, %v3380_v41, %v5135_v40  ;;  %v8997_v16 = vsel %vm607_vm7, %v3387_v51, %v5136_v47  ;;  %v4981_v2 = vunpack.i.h.bf16 %v9744_v11  ;;  %v5075_v40 = vunpack.i.l.bf16 %v8939_v58 }
 0x3b0   :  { %v5114_v10 = vpop.permute.xlu1 %5113  ;;  %v5091_v41 = vunpack.i.h.bf16 %v8949_v30 }
 0x3b1   :  { %v5116_v29 = vunpack.i.h.bf16 %v5114_v10  ;;  %v5115_v52 = vunpack.i.l.bf16 %v5114_v10  ;;  %v5179_v23 = vpop.permute.xlu2 %5178  ;;  %v5090_v10 = vunpack.i.l.bf16 %v8949_v30 }
 0x3b2   :  { %v4217_v7 = vsel %vm609_vm8, %v4216_v21, %v5091_v41  ;;  %v5181_v22 = vunpack.i.h.bf16 %v5179_v23  ;;  %v5180_v28 = vunpack.i.l.bf16 %v5179_v23 }
 0x3b3   :  { %v9008_v17 = vsel %vm609_vm8, %v3594_v18, %v5116_v29  ;;  %v9011_v55 = vsel %vm609_vm8, %v3587_v9, %v5115_v52  ;;  %v4224_v9 = vrot.slane %v2760_v42, 4  ;;  %v4225_v18 = vrot.slane %v2767_v12, 4 }
 0x3b4   :  { %v9019_v54 = vpop.permute.xlu0 %5123  ;;  %v4218_v6 = vsel %vm611_vm9, %v4217_v7, %v5106_v38  ;;  %v9749_v38 = vld [vmem:[#allocation36_spill] sm:$0xff] }
 0x3b5   :  { %v9029_v36 = vsel %vm2320_vm13, %v8746_v24, %v4224_v9  ;;  %v9038_v25 = vsel %vm2320_vm13, %v8751_v4, %v4225_v18  ;;  %v9746_v24 = vld [vmem:[#allocation49_spill] sm:$0xff]  ;;  %v3181_v4 = vsel %vm605_vm6, %v9747_v60, %v4661_v44  ;;  %v5126_v33 = vunpack.i.h.bf16 %v9019_v54 }
 0x3b6   :  { %v4208_v50 = vsel %vm605_vm6, %v9746_v24, %v5070_v45  ;;  %v9059_v20 = vsel %vm607_vm7, %v3181_v4, %v4981_v2  ;;  %v5125_v44 = vunpack.i.l.bf16 %v9019_v54  ;;  %v9748_v2 = vld [vmem:[#allocation19_spill] sm:$0xff]  ;;  %v5121_v24 = vunpack.i.h.bf16 %v8960_v5 }
 0x3b7   :  { %v4209_v48 = vsel %vm607_vm7, %v4208_v50, %v5075_v40  ;;  %v4230_v34 = vrot.slane %v9748_v2, 4  ;;  %v5120_v50 = vunpack.i.l.bf16 %v8960_v5  ;;  %v5150_v40 = vunpack.i.l.bf16 %v8964_v59 }
 0x3b8   :  { %v5129_v57 = vpop.permute.xlu1 %5128  ;;  %v4210_v52 = vsel %vm609_vm8, %v4209_v48, %v5090_v10  ;;  %v4004_v60 = vsel %vm609_vm8, %v8977_v37, %v5125_v44  ;;  %v4011_v4 = vsel %vm609_vm8, %v8980_v0, %v5126_v33 }
 0x3b9   :  { %v9054_v14 = vpop.permute.xlu2 %5193  ;;  %v5131_v29 = vunpack.i.h.bf16 %v5129_v57  ;;  %v5130_v58 = vunpack.i.l.bf16 %v5129_v57  ;;  %v4211_v26 = vsel %vm611_vm9, %v4210_v52, %v5105_v35  ;;  %v9102_v59 = vsel %vm2320_vm13, %v9025_v13, %v4230_v34 }
 0x3ba   :  { %v4254_v0 = vpack.c.bf16 %v9102_v59, %v9029_v36  ;;  %v4005_v35 = vsel %vm611_vm9, %v4004_v60, %v5150_v40 }
 0x3bb   :  { %v4212_v30 = vsel %vm613_vm10, %v4211_v26, %v5130_v58  ;;  %v4219_v63 = vsel %vm613_vm10, %v4218_v6, %v5131_v29  ;;  %v435_v58 = vld [vmem:[#allocation3] sm:$0xff] }
 0x3bc   :  { %v9046_v47 = vpop.permute.xlu0 %5138  ;;  %v9104_v7 = vpack.c.bf16 %v435_v58, %v435_v58  ;;  %v9750_v26 = vld [vmem:[#allocation20_spill] sm:$0xff] }
 0x3bd   :  { %v3796_v6 = vsel %vm605_vm6, %v9750_v26, %v5120_v50 }
 0x3be   :  { %4376 = vmatmul.msk.bf16.vlgmr.msra.gmra.mxu0 %vm2335_vm15, %v9104_v7  ;;  %4377 = vmatmul.msk.bf16.vlgmr.msra.gmra.mxu1 %vm2335_vm15, %v9104_v7 }
 0x3c0   :  { %v9056_v51 = vpop.permute.xlu1 %5143 }
 0x3c1   :  { %v9077_v56 = vpop.permute.xlu2 %5203  ;;  %v5146_v54 = vunpack.i.h.bf16 %v9056_v51  ;;  %v5145_v48 = vunpack.i.l.bf16 %v9056_v51  ;;  %v3803_v51 = vsel %vm605_vm6, %v9749_v38, %v5121_v24 }
 0x3c4   :  { %v5154_v39 = vpop.permute.xlu0 %5153 }
 0x3c5   :  { %v5156_v31 = vunpack.i.h.bf16 %v5154_v39  ;;  %v5155_v19 = vunpack.i.l.bf16 %v5154_v39  ;;  %v4012_v39 = vsel %vm611_vm9, %v4011_v4, %v5151_v49 }
 0x3c7   :  { %v4213_v53 = vsel %vm615_vm11, %v4212_v30, %v5155_v19  ;;  %v4220_v62 = vsel %vm615_vm11, %v4219_v63, %v5156_v31 }
 0x3c8   :  { %v9071_v27 = vpop.permute.xlu1 %5158  ;;  %v4214_v15 = vsel %vm617_vm12, %v4213_v53, %v5180_v28  ;;  %v4221_v1 = vsel %vm617_vm12, %v4220_v62, %v5181_v22  ;;  %v3804_v22 = vsel %vm607_vm7, %v3803_v51, %v5146_v54  ;;  %v3797_v28 = vsel %vm607_vm7, %v3796_v6, %v5145_v48 }
 0x3c9   :  { %v4258_v42 = vpack.c.bf16 %v4214_v15, %v4214_v15  ;;  %v4259_v12 = vpack.c.bf16 %v4221_v1, %v4221_v1  ;;  %v5219_v57 = vpop.permute.xlu2 %5218 }
 0x3ca   :  { %v5221_v53 = vunpack.i.h.bf16 %v5219_v57  ;;  %v5220_v62 = vunpack.i.l.bf16 %v5219_v57 }
 0x3cb   :  { %v4261_v3 = vsel %vm2339_vm14, %v4258_v42, 0  ;;  %v4264_v23 = vsel %vm2339_vm14, %v4259_v12, 0  ;;  %v5196_v42 = vunpack.i.h.bf16 %v9054_v14  ;;  %v5195_v12 = vunpack.i.l.bf16 %v9054_v14 }
 0x3cc   :  { %v5169_v9 = vpop.permute.xlu0 %5168  ;;  %4271 = vmatpush.bf16.msra.mxu2 %v4261_v3  ;;  %4284 = vmatpush.bf16.msra.mxu3 %v4264_v23 }
 0x3cd   :  { %v5171_v37 = vunpack.i.h.bf16 %v5169_v9  ;;  %v5170_v52 = vunpack.i.l.bf16 %v5169_v9 }
 0x3cf   :  { %v3798_v15 = vsel %vm609_vm8, %v3797_v28, %v5170_v52  ;;  %v3805_v1 = vsel %vm609_vm8, %v3804_v22, %v5171_v37  ;;  %v5161_v37 = vunpack.i.h.bf16 %v9071_v27  ;;  %v5160_v52 = vunpack.i.l.bf16 %v9071_v27 }
 0x3d0   :  { %v5174_v18 = vpop.permute.xlu1 %5173  ;;  %v3799_v57 = vsel %vm611_vm9, %v3798_v15, %v5195_v12  ;;  %v3806_v34 = vsel %vm611_vm9, %v3805_v1, %v5196_v42  ;;  %v5205_v15 = vunpack.i.l.bf16 %v9077_v56 }
 0x3d1   :  { %v5229_v43 = vpop.permute.xlu2 %5228  ;;  %v5176_v41 = vunpack.i.h.bf16 %v5174_v18  ;;  %v5175_v10 = vunpack.i.l.bf16 %v5174_v18 }
 0x3d2   :  { %v5230_v2 = vunpack.i.l.bf16 %v5229_v43 }
 0x3d3   :  { %v4006_v13 = vsel %vm613_vm10, %v4005_v35, %v5175_v10  ;;  %v4013_v31 = vsel %vm613_vm10, %v4012_v39, %v5176_v41  ;;  %v5141_v10 = vunpack.i.h.bf16 %v9046_v47 }
 0x3d4   :  { %v9081_v8 = vpop.permute.xlu0 %5183 }
 0x3d5   :  { %v5186_v51 = vunpack.i.h.bf16 %v9081_v8  ;;  %v5185_v35 = vunpack.i.l.bf16 %v9081_v8  ;;  %v3596_v26 = vsel %vm611_vm9, %v9008_v17, %v5141_v10  ;;  %v3389_v8 = vsel %vm609_vm8, %v8997_v16, %v5161_v37 }
 0x3d6   :  { %v5206_v16 = vunpack.i.h.bf16 %v9077_v56 }
 0x3d7   :  { %v3390_v28 = vsel %vm611_vm9, %v3389_v8, %v5186_v51 }
 0x3d8   :  { %v9083_v45 = vpop.permute.xlu1 %5188 }
 0x3d9   :  { %v5239_v3 = vpop.permute.xlu2 %5238  ;;  %v5190_v6 = vunpack.i.l.bf16 %v9083_v45 }
 0x3da   :  { %v5241_v24 = vunpack.i.h.bf16 %v5239_v3  ;;  %v5240_v50 = vunpack.i.l.bf16 %v5239_v3  ;;  %v3391_v3 = vsel %vm613_vm10, %v3390_v28, %v5206_v16 }
 0x3dc   :  { %v5199_v11 = vpop.permute.xlu0 %5198 }
 0x3dd   :  { %v5201_v29 = vunpack.i.h.bf16 %v5199_v11  ;;  %v5200_v5 = vunpack.i.l.bf16 %v5199_v11  ;;  %v5231_v11 = vunpack.i.h.bf16 %v5229_v43 }
 0x3df   :  { %v4007_v30 = vsel %vm615_vm11, %v4006_v13, %v5200_v5  ;;  %v4014_v63 = vsel %vm615_vm11, %v4013_v31, %v5201_v29  ;;  %v5140_v29 = vunpack.i.l.bf16 %v9046_v47  ;;  %v5191_v47 = vunpack.i.h.bf16 %v9083_v45 }
 0x3e0   :  { %v9096_v21 = vpop.permute.xlu1 %3155  ;;  %v4008_v33 = vsel %vm617_vm12, %v4007_v30, %v5220_v62  ;;  %v4015_v44 = vsel %vm617_vm12, %v4014_v63, %v5221_v53  ;;  %v5166_v13 = vunpack.i.h.bf16 %v8982_v61  ;;  %v5165_v31 = vunpack.i.l.bf16 %v8982_v61 }
 0x3e1   :  { %v4242_v60 = vrot.slane %v4008_v33, 4  ;;  %v4243_v54 = vrot.slane %v4015_v44, 4  ;;  %v3589_v39 = vsel %vm611_vm9, %v9011_v55, %v5140_v29  ;;  %v3382_v55 = vsel %vm609_vm8, %v8994_v32, %v5160_v52 }
 0x3e2   :  { %v3383_v17 = vsel %vm611_vm9, %v3382_v55, %v5185_v35  ;;  %v3590_v45 = vsel %vm613_vm10, %v3589_v39, %v5165_v31  ;;  %v3597_v30 = vsel %vm613_vm10, %v3596_v26, %v5166_v13  ;;  %v3183_v56 = vsel %vm609_vm8, %v9059_v20, %v9096_v21 }
 0x3e3   :  { %v3591_v61 = vsel %vm615_vm11, %v3590_v45, %v5190_v6  ;;  %v3598_v53 = vsel %vm615_vm11, %v3597_v30, %v5191_v47  ;;  %v3384_v12 = vsel %vm613_vm10, %v3383_v17, %v5205_v15  ;;  %v5324_v26 = vmov 0  }
 0x3e4   :  { %v9116_v19 = vpop.permute.xlu0 %5208  ;;  %5242 = vset.pattern.permute.xlu2 %v5324_v26  ;;  %5243 = vset.pattern.permute.xlu0 %v5324_v26 }
 0x3e5   :  { %v5211_v27 = vunpack.i.h.bf16 %v9116_v19  ;;  %v5210_v22 = vunpack.i.l.bf16 %v9116_v19 }
 0x3e7   :  { %v3592_v32 = vsel %vm617_vm12, %v3591_v61, %v5210_v22  ;;  %v3599_v1 = vsel %vm617_vm12, %v3598_v53, %v5211_v27 }
 0x3e8   :  { %v5214_v23 = vpop.permute.xlu1 %5213  ;;  %v4237_v33 = vrot.slane %v3599_v1, 4  ;;  %v4328_v1 = vld [vmem:[%s9210_s3] sm:$0xff]  ;;  %s5325_s3 = smov [#allocation6]  }
 0x3e9   :  { %v5216_v9 = vunpack.i.h.bf16 %v5214_v23  ;;  %v5215_v18 = vunpack.i.l.bf16 %v5214_v23  ;;  %s4361_s12 = sshll.u32 %s5325_s3, 4  ;;  %s4362_s12 = int_to_ptr.vmem [resolvable:$true] %s4361_s12 }
 0x3eb   :  { %v3800_v49 = vsel %vm613_vm10, %v3799_v57, %v5215_v18  ;;  %v3807_v14 = vsel %vm613_vm10, %v3806_v34, %v5216_v9  ;;  %v4236_v18 = vrot.slane %v3592_v32, 4 }
 0x3ec   :  { %v3801_v40 = vsel %vm615_vm11, %v3800_v49, %v5230_v2  ;;  %v3808_v4 = vsel %vm615_vm11, %v3807_v14, %v5231_v11  ;;  %v3160_v48 = vpop.permute.xlu0 %3159 }
 0x3ed   :  { %v3802_v41 = vsel %vm617_vm12, %v3801_v40, %v5240_v50  ;;  %v3809_v43 = vsel %vm617_vm12, %v3808_v4, %v5241_v24  ;;  %v3184_v34 = vsel %vm611_vm9, %v3183_v56, %v3160_v48 }
 0x3ee   :  { %v4252_v5 = vsel %vm2320_vm13, %v3802_v41, %v4242_v60  ;;  %v4253_v58 = vsel %vm2320_vm13, %v3809_v43, %v4243_v54 }
 0x3f0   :  { %v5224_v38 = vpop.permute.xlu1 %5223 }
 0x3f1   :  { %v5226_v19 = vunpack.i.h.bf16 %v5224_v38  ;;  %v5225_v62 = vunpack.i.l.bf16 %v5224_v38 }
 0x3f3   :  { %v3385_v44 = vsel %vm615_vm11, %v3384_v12, %v5225_v62  ;;  %v3392_v11 = vsel %vm615_vm11, %v3391_v3, %v5226_v19  ;;  %v4315_v62 = vld [vmem:[%s9209_s2] sm:$0xff] }
 0x3f4   :  { %v3164_v63 = vpop.permute.xlu0 %3163 }
 0x3f5   :  { %v3185_v49 = vsel %vm613_vm10, %v3184_v34, %v3164_v63 }
 0x3f8   :  { %v5234_v42 = vpop.permute.xlu1 %5233 }
 0x3f9   :  { %v5236_v23 = vunpack.i.h.bf16 %v5234_v42  ;;  %v5235_v9 = vunpack.i.l.bf16 %v5234_v42 }
 0x3fb   :  { %v3386_v2 = vsel %vm617_vm12, %v3385_v44, %v5235_v9  ;;  %v3393_v57 = vsel %vm617_vm12, %v3392_v11, %v5236_v23 }
 0x3fc   :  { %v4250_v24 = vsel %vm2320_vm13, %v3386_v2, %v4236_v18  ;;  %v4251_v50 = vsel %vm2320_vm13, %v3393_v57, %v4237_v33  ;;  %v3168_v60 = vpop.permute.xlu0 %3167 }
 0x3fd   :  { %v4256_v14 = vpack.c.bf16 %v4252_v5, %v4250_v24  ;;  %v4257_v40 = vpack.c.bf16 %v4253_v58, %v4251_v50  ;;  %v3186_v4 = vsel %vm615_vm11, %v3185_v49, %v3168_v60 }
 0x3ff   :  { %4272 = vmatpush.bf16.msra.mxu2 %v4256_v14  ;;  %4285 = vmatpush.bf16.msra.mxu3 %v4257_v40 }
 0x400   :  { %v3172_v20 = vpop.permute.xlu1 %3171 }
 0x401   :  { %v3187_v21 = vsel %vm617_vm12, %v3186_v4, %v3172_v20 }
 0x402   :  { %v4231_v54 = vrot.slane %v3187_v21, 4 }
 0x403   :  { %4273 = vmatpush.bf16.msra.mxu2 %v4254_v0 }
 0x404   :  { %v4249_v48 = vsel %vm2320_vm13, %v9034_v46, %v4231_v54 }
 0x405   :  { %v4255_v41 = vpack.c.bf16 %v4249_v48, %v9038_v25 }
 0x406   :  { %4378 = vmatmul.msk.bf16.vlgmr.msra.gmra.mxu2 %vm2335_vm15, %v9104_v7 }
 0x407   :  { %4286 = vmatpush.bf16.msra.mxu3 %v4255_v41 }
 0x40a   :  { %4379 = vmatmul.msk.bf16.vlgmr.msra.gmra.mxu3 %vm2335_vm15, %v9104_v7 }
 0x43b   :  { %v2355_v43 = vpop.f32.mrf.mxu0  ;;  %v2368_v10 = vpop.f32.mrf.mxu1 }
 0x43c   :  { %v4292_v29 = vadd.f32 %v2368_v10, %v2355_v43  ;;  %v4298_v5 = vmul.f32 %v2355_v43, %v2355_v43  ;;  %v4299_v58 = vmul.f32 %v2368_v10, %v2368_v10 }
 0x43e   :  { %4293 = vadd.xlane.f32.xlu2 %v4292_v29  ;;  %v4302_v0 = vadd.f32 %v4299_v58, %v4298_v5 }
 0x440   :  { %4303 = vadd.xlane.f32.xlu1 %v4302_v0 }
 0x443   :  { %v2357_v36 = vpop.f32.mrf.mxu0  ;;  %v2370_v59 = vpop.f32.mrf.mxu1 }
 0x489   :  { %v4275_v46 = vpop.f32.mrf.mxu2 }
 0x48a   :  { %v4300_v37 = vmul.f32 %v4275_v46, %v4275_v46 }
 0x48d   :  { %v4288_v25 = vpop.f32.mrf.mxu3 }
 0x48e   :  { %v4295_v52 = vadd.f32 %v4288_v25, %v4275_v46  ;;  %v4301_v38 = vmul.f32 %v4288_v25, %v4288_v25 }
 0x490   :  { %4296 = vadd.xlane.f32.xlu0 %v4295_v52  ;;  %v4305_v51 = vadd.f32 %v4301_v38, %v4300_v37 }
 0x491   :  { %v4277_v35 = vpop.f32.mrf.mxu2 }
 0x492   :  { %4306 = vadd.xlane.f32.xlu2 %v4305_v51 }
 0x495   :  { %v4290_v7 = vpop.f32.mrf.mxu3 }
 0x4b1   :  { %v4294_v39 = vpop.xlane.xlu2 %4293 }
 0x4b3   :  { %v4304_v13 = vpop.xlane.xlu1 %4303 }
 0x503   :  { %v4297_v47 = vpop.xlane.xlu0 %4296 }
 0x504   :  { %v4308_v6 = vadd.f32 %v4297_v47, %v4294_v39 }
 0x505   :  { %v4307_v31 = vpop.xlane.xlu2 %4306 }
 0x506   :  { %v4310_v27 = vmul.f32 0.001953125, %v4308_v6  ;;  %v4309_v22 = vadd.f32 %v4307_v31, %v4304_v13 }
 0x508   :  { %v4312_v8 = vmul.f32 %v4310_v27, %v4310_v27  ;;  %v4311_v55 = vmul.f32 0.001953125, %v4309_v22 }
 0x50a   :  { %v4313_v17 = vsub.f32 %v4311_v55, %v4312_v8 }
 0x50c   :  { %v4314_v28 = vmax.f32 %v4313_v17, 0.0 }
 0x50e   :  { %v4316_v45 = vadd.f32 1e-05, %v4314_v28 }
 0x510   :  { %5244 = vrsqrt.f32 %v4316_v45  ;;  %vm4323_vm1 = vweird.f32 %v4316_v45 }
 0x516   :  { %v5245_v30 = vpop.eup %5244 }
 0x517   :  { %v4318_v63 = vmul.f32 %v5245_v30, %v4316_v45  ;;  %vm4324_vm0 = vweird.f32 %v5245_v30 }
 0x518   :  { %vm4325_vm2 = vmor %vm4323_vm1, %vm4324_vm0 }
 0x519   :  { %v4319_v61 = vmul.f32 %v5245_v30, %v4318_v63 }
 0x51b   :  { %v4320_v53 = vmul.f32 0.5, %v4319_v61 }
 0x51d   :  { %v4321_v19 = vsub.f32 1.5, %v4320_v53 }
 0x51f   :  { %v4322_v16 = vmul.f32 %v5245_v30, %v4321_v19 }
 0x521   :  { %v4326_v15 = vsel %vm4325_vm2, %v5245_v30, %v4322_v16 }
 0x522   :  { %v4327_v32 = vmul.f32 %v4326_v15, %v4315_v62 }
 0x524   :  { %4333 = vperm.xlu2 %5242, %v4327_v32   ;;  %v4329_v42 = vmul.f32 %v4327_v32, %v4310_v27 }
 0x526   :  { %v4330_v12 = vsub.f32 %v4328_v1, %v4329_v42 }
 0x528   :  { %4342 = vperm.xlu0 %5243, %v4330_v12  }
 0x57e   :  { %v4334_v3 = vpop.permute.xlu2 %4333 }
 0x57f   :  { %v4336_v23 = vmul.f32 %v4334_v3, %v2355_v43  ;;  %v4337_v9 = vmul.f32 %v4334_v3, %v2368_v10  ;;  %v4338_v18 = vmul.f32 %v4334_v3, %v4275_v46  ;;  %v4339_v33 = vmul.f32 %v4334_v3, %v4288_v25 }
 0x59a   :  { %v4343_v44 = vpop.permute.xlu0 %4342 }
 0x59b   :  { %v4345_v11 = vadd.f32 %v4343_v44, %v4336_v23  ;;  %v4346_v56 = vadd.f32 %v4343_v44, %v4337_v9  ;;  %v4347_v2 = vadd.f32 %v4343_v44, %v4338_v18  ;;  %v4348_v57 = vadd.f32 %v4343_v44, %v4339_v33 }
 0x59d   :  { %v4349_v34 = vmax.f32 %v4345_v11, 0.0  ;;  %v4350_v24 = vmax.f32 %v4346_v56, 0.0  ;;  %v4351_v50 = vmax.f32 %v4347_v2, 0.0  ;;  %v4352_v49 = vmax.f32 %v4348_v57, 0.0 }
 0x59f   :  { %4353 = vst [vmem:[#allocation6] sm:$0xff] %v4349_v34 }
 0x5a0   :  { %4354 = vst [vmem:[#allocation6 + $0x8] sm:$0xff] %v4350_v24 }
 0x5a1   :  { %4355 = vst [vmem:[#allocation6 + $0x10] sm:$0xff] %v4351_v50 }
 0x5a2   :  { %4356 = vst [vmem:[#allocation6 + $0x18] sm:$0xff] %v4352_v49 }
 0x5a3   :  { %4369 = dma.vmem_to_hbm [thread:$0]  %s4362_s12, 512, %s4364_s11, [#allocation5], %s5326_s13, %s5326_s13, %s5317_s29  }
 0x5a4   :  { %5308 = dma.done.wait [#allocation5], 512  }
 0x5a5   :  { %5309 = vsyncadd [#allocation5], 4294966784 }
 0x5a6   :  { %4374 = vsyncpa [#allocation4], 1 }
 0x5a7   :  { %4375 = vsyncpa [#allocation5], 1 }

</bundles_post_ra>
